<compile_context>
chip_gen: v7x
topology: tpu7x:2x2x1
jax: 0.10.0
libtpu: 0.0.40
codegen_flags: <defaults>
</compile_context>

<pallas_src>
import jax
import jax.numpy as jnp
from jax import lax
from jax.experimental import pallas as pl
from jax.experimental.pallas import tpu as pltpu

P = 49        # conv2 output positions (7*7)
N_TAP = 16    # conv2 taps (4*4)
F1 = 16       # conv1 patch features (Cin=1 * 4 * 4)
C1 = 16       # conv1 output channels
C2 = 32       # conv2 output channels
NPAD = 128    # lane-padded fully-connected width
TB_MAX = 32   # max images per grid step


# ----------------------------------------------------------------------------
# Fused kernel: whole forward pass for tb images per grid step.
# ----------------------------------------------------------------------------
def _fused_kernel(p_ref, w1_ref, b1_ref, w2_ref, b2r_ref,
                  wf1_ref, bf1_ref, wf2_ref, bf2_ref, o_ref):
    tb = o_ref.shape[0]

    # conv1, evaluated at all 16 conv2 tap offsets at once via block-diagonal W1.
    h1 = jnp.dot(p_ref[...], w1_ref[...], preferred_element_type=jnp.float32)
    h1 = jnp.maximum(h1 + b1_ref[...], 0.0)                        # (P*tb, 256) f32

    # conv2: one matmul over the (tap, cin) = 256 feature axis.  b2r already
    # folds the correction for taps inside conv2's zero padding (no mask mul).
    h2 = jnp.dot(h1.astype(jnp.bfloat16), w2_ref[...],
                 preferred_element_type=jnp.float32)
    h2 = jnp.maximum(h2 + b2r_ref[...], 0.0)                       # (P*tb, 32) f32

    # fc1: contract over (position, channel) as P small MXU matmuls
    # (tb,32)@(32,128), accumulated in f32.  Rows are position-major, so each
    # slice start (p*tb) is sublane-aligned.
    f1 = jnp.zeros((tb, NPAD), jnp.float32)
    for p in range(P):
        lhs = h2[p * tb:(p + 1) * tb, :].astype(jnp.bfloat16)
        f1 = f1 + jnp.dot(lhs, wf1_ref[p], preferred_element_type=jnp.float32)
    f1 = jnp.maximum(f1 + bf1_ref[...], 0.0)                       # (tb, 128)

    # fc2 (N padded 10 -> 128 with zero columns; sliced back outside).
    out = jnp.dot(f1.astype(jnp.bfloat16), wf2_ref[...],
                  preferred_element_type=jnp.float32) + bf2_ref[...]
    o_ref[...] = out.astype(o_ref.dtype)                           # (tb, 128)


# ----------------------------------------------------------------------------
# One-time parameter packing (outside jit): MXU-ready, bf16, lane-padded layouts.
# ----------------------------------------------------------------------------
def pack_params(params):
    f32, bf16 = jnp.float32, jnp.bfloat16

    # conv1 (16,1,4,4) -> (F1, C1), then block-diagonal across the 16 conv2 taps.
    w1 = params["conv1_w"].astype(f32).reshape(C1, F1).T                     # (F1, C1)
    eye = jnp.eye(N_TAP, dtype=f32)
    w1_bd = (eye[:, None, :, None] * w1[None, :, None, :]).reshape(
        N_TAP * F1, N_TAP * C1).astype(bf16)                                 # (256, 256)
    b1 = jnp.tile(params["conv1_b"].astype(f32), N_TAP).reshape(1, N_TAP * C1)

    # conv2 (32,16,4,4) -> rows ordered (tap, cin) = (ky*4+kx)*16 + ci.
    w2f = jnp.transpose(params["conv2_w"].astype(f32), (2, 3, 1, 0)).reshape(
        N_TAP * C1, C2)                                                      # (256, 32)
    w2 = w2f.astype(bf16)

    # Position-dependent conv2 bias: for taps that land in conv2's zero padding
    # the patch features are zero, so the kernel produces relu(b1) instead of the
    # true 0 there; subtract that constant contribution from the bias.
    oy, ox = jnp.meshgrid(jnp.arange(7), jnp.arange(7), indexing="ij")
    ky, kx = jnp.meshgrid(jnp.arange(4), jnp.arange(4), indexing="ij")
    y1 = 2 * oy.reshape(-1, 1) + ky.reshape(1, -1) - 1                       # (49, 16)
    x1 = 2 * ox.reshape(-1, 1) + kx.reshape(1, -1) - 1
    invalid = 1.0 - ((y1 >= 0) & (y1 < 14) & (x1 >= 0) & (x1 < 14)).astype(f32)
    invalid_pc = jnp.repeat(invalid, C1, axis=1)                             # (49, 256)
    relu_b1 = jnp.tile(jnp.maximum(params["conv1_b"].astype(f32), 0.0), N_TAP)
    corr = (invalid_pc * relu_b1[None, :]) @ w2f                             # (49, 32)
    b2_pos = params["conv2_b"].astype(f32)[None, :] - corr                   # (49, 32)

    # fc1 (1568,100): torch flatten index = c*49 + p -> (p, c, n), pad n to 128.
    wf1 = params["fc1_w"].astype(f32).reshape(C2, P, 100).transpose(1, 0, 2)
    wf1 = jnp.pad(wf1, ((0, 0), (0, 0), (0, NPAD - 100))).astype(bf16)       # (49,32,128)
    bf1 = jnp.pad(params["fc1_b"].astype(f32), (0, NPAD - 100)).reshape(1, NPAD)

    # fc2 (100,10) -> (128,128), zero-padded.
    wf2 = jnp.pad(params["fc2_w"].astype(f32),
                  ((0, NPAD - 100), (0, NPAD - 10))).astype(bf16)
    bf2 = jnp.pad(params["fc2_b"].astype(f32), (0, NPAD - 10)).reshape(1, NPAD)

    return dict(w1_bd=w1_bd, b1=b1, w2=w2, b2_pos=b2_pos,
                wf1=wf1, bf1=bf1, wf2=wf2, bf2=bf2)


# ----------------------------------------------------------------------------
# Host-side patch extraction (the only XLA glue that touches activations).
# ----------------------------------------------------------------------------
def _build_patches(x, b_pad, tb):
    """(B,1,28,28) NCHW -> (g*P*tb, 256) bf16: for every grid step, conv2 output
    position p and conv2 tap k, the 16 conv1-patch features feeding that tap.
    Rows are ordered (step, position, image) so per-position slices in the
    kernel are contiguous and sublane-aligned."""
    b = x.shape[0]
    x = x.astype(jnp.float32)
    if b_pad > b:
        x = jnp.pad(x, ((0, b_pad - b), (0, 0), (0, 0), (0, 0)))
    xp = jnp.pad(x, ((0, 0), (0, 0), (1, 1), (1, 1)))                        # (Bp,1,30,30)
    # conv1 im2col at all 14x14 conv1 output positions; feature index = ky*4+kx.
    cols = [xp[:, 0, i:i + 27:2, j:j + 27:2] for i in range(4) for j in range(4)]
    p1 = jnp.stack(cols, axis=-1)                                            # (Bp,14,14,16)
    p1 = jnp.pad(p1, ((0, 0), (1, 1), (1, 1), (0, 0)))                       # conv2 zero pad
    # Conv2 tap (ky,kx) at output (oy,ox) reads conv1 position (2*oy+ky-1, 2*ox+kx-1)
    # == padded index (2*oy+ky, 2*ox+kx).
    taps = [p1[:, i:i + 13:2, j:j + 13:2, :].reshape(b_pad, P, F1)
            for i in range(4) for j in range(4)]
    pd = jnp.stack(taps, axis=2).reshape(b_pad, P, N_TAP * F1)               # (Bp,49,256)
    g = b_pad // tb
    pd = pd.reshape(g, tb, P, N_TAP * F1).transpose(0, 2, 1, 3)              # (g,49,tb,256)
    return pd.reshape(g * P * tb, N_TAP * F1).astype(jnp.bfloat16)


def _round_up(n, m):
    return ((n + m - 1) // m) * m


# ----------------------------------------------------------------------------
# WrapperMNIST forward (preprocess = identity).
# ----------------------------------------------------------------------------
def wrapper_mnist_forward(packed, x):
    b = x.shape[0]
    tb = min(TB_MAX, _round_up(b, 8))        # images per grid step (multiple of 8)
    b_pad = _round_up(b, tb)
    g = b_pad // tb
    rows = P * tb
    feat = N_TAP * F1

    patches = _build_patches(x, b_pad, tb)                          # (g*rows, 256) bf16
    b2r = jnp.repeat(packed["b2_pos"], tb, axis=0)                  # (rows, 32) f32

    def res(shape):  # resident block: full array, constant index map
        return pl.BlockSpec(shape, lambda i, _n=len(shape): (0,) * _n)

    in_specs = [
        pl.BlockSpec((rows, feat), lambda i: (i, 0)),   # patches (streamed over batch)
        res((feat, feat)),                              # w1_bd   (bf16)
        res((1, feat)),                                 # b1
        res((feat, C2)),                                # w2      (bf16)
        res((rows, C2)),                                # b2r (per-position bias rows)
        res((P, C2, NPAD)),                             # wf1     (bf16)
        res((1, NPAD)),                                 # bf1
        res((NPAD, NPAD)),                              # wf2     (bf16)
        res((1, NPAD)),                                 # bf2
    ]
    args = (patches, packed["w1_bd"], packed["b1"], packed["w2"], b2r,
            packed["wf1"], packed["bf1"], packed["wf2"], packed["bf2"])

    per_step_flops = (2 * rows * feat * (feat + C2)
                      + 2 * P * tb * C2 * NPAD + 2 * tb * NPAD * NPAD)
    bytes_accessed = sum(int(a.size) * a.dtype.itemsize for a in args) \
        + b_pad * NPAD * 4

    out = pl.pallas_call(
        _fused_kernel,
        out_shape=jax.ShapeDtypeStruct((b_pad, NPAD), jnp.float32),
        grid=(g,),
        in_specs=in_specs,
        out_specs=pl.BlockSpec((tb, NPAD), lambda i: (i, 0)),
        compiler_params=pltpu.CompilerParams(dimension_semantics=("parallel",)),
        cost_estimate=pl.CostEstimate(flops=int(g * per_step_flops),
                                      transcendentals=0,
                                      bytes_accessed=int(bytes_accessed)),
    )(*args)

    return out[:b, :10]


# ----------------------------------------------------------------------------
# Pure-JAX reference (structural correctness check) and init.
# ----------------------------------------------------------------------------
def reference_forward(params, x):
    dn = ("NCHW", "OIHW", "NCHW")
    hp = lax.Precision.HIGHEST
    h = lax.conv_general_dilated(x, params["conv1_w"], (2, 2), ((1, 1), (1, 1)),
                                 dimension_numbers=dn, precision=hp)
    h = jnp.maximum(h + params["conv1_b"].reshape(1, -1, 1, 1), 0.0)
    h = lax.conv_general_dilated(h, params["conv2_w"], (2, 2), ((1, 1), (1, 1)),
                                 dimension_numbers=dn, precision=hp)
    h = jnp.maximum(h + params["conv2_b"].reshape(1, -1, 1, 1), 0.0)
    h = h.reshape(x.shape[0], -1)
    h = jnp.maximum(jnp.dot(h, params["fc1_w"], precision=hp) + params["fc1_b"], 0.0)
    return jnp.dot(h, params["fc2_w"], precision=hp) + params["fc2_b"]


def init_params(key):
    ks = jax.random.split(key, 8)
    s = 0.05
    return {
        "conv1_w": s * jax.random.normal(ks[0], (16, 1, 4, 4), jnp.float32),
        "conv1_b": s * jax.random.normal(ks[1], (16,), jnp.float32),
        "conv2_w": s * jax.random.normal(ks[2], (32, 16, 4, 4), jnp.float32),
        "conv2_b": s * jax.random.normal(ks[3], (32,), jnp.float32),
        "fc1_w": s * jax.random.normal(ks[4], (32 * 7 * 7, 100), jnp.float32),
        "fc1_b": s * jax.random.normal(ks[5], (100,), jnp.float32),
        "fc2_w": s * jax.random.normal(ks[6], (100, 10), jnp.float32),
        "fc2_b": s * jax.random.normal(ks[7], (10,), jnp.float32),
    }


if __name__ == "__main__":
    x = jax.random.normal(jax.random.PRNGKey(0), (2, 1, 28, 28), jnp.float32)
    params = init_params(jax.random.PRNGKey(42))
    packed = pack_params(params)

    fwd = jax.jit(wrapper_mnist_forward)
    out = jax.block_until_ready(fwd(packed, x))
    assert out.shape == (2, 10), out.shape
    assert out.dtype == jnp.float32

    ref = jax.block_until_ready(jax.jit(reference_forward)(params, x))
    rel = float(jnp.max(jnp.abs(out - ref)) / (jnp.max(jnp.abs(ref)) + 1e-6))
    assert rel < 5e-2, f"mismatch vs reference: rel={rel}"
    print("KERNEL_OK")
</pallas_src>

<mosaic_0001>
module attributes {stable_mosaic.version = 11 : i64} {
  func.func @_fused_kernel(%arg0: i32, %arg1: memref<392x256xbf16, #tpu.memory_space<vmem>>, %arg2: memref<256x256xbf16, #tpu.memory_space<vmem>>, %arg3: memref<1x256xf32, #tpu.memory_space<vmem>>, %arg4: memref<256x32xbf16, #tpu.memory_space<vmem>>, %arg5: memref<392x32xf32, #tpu.memory_space<vmem>>, %arg6: memref<49x32x128xbf16, #tpu.memory_space<vmem>>, %arg7: memref<1x128xf32, #tpu.memory_space<vmem>>, %arg8: memref<128x128xbf16, #tpu.memory_space<vmem>>, %arg9: memref<1x128xf32, #tpu.memory_space<vmem>>, %arg10: memref<8x128xf32, #tpu.memory_space<vmem>>) attributes {dimension_semantics = [#tpu.dimension_semantics<parallel>], iteration_bounds = array<i64: 1>, scalar_prefetch = 0 : i64, scratch_operands = 0 : i64, tpu.core_type = #tpu.core_type<tc>, window_params = [{transform_indices = @transform_0, window_bounds = array<i64: 392, 256>}, {pipeline_mode = #tpu.pipeline_mode<synchronous>, transform_indices = @transform_1, window_bounds = array<i64: 256, 256>}, {pipeline_mode = #tpu.pipeline_mode<synchronous>, transform_indices = @transform_2, window_bounds = array<i64: 1, 256>}, {pipeline_mode = #tpu.pipeline_mode<synchronous>, transform_indices = @transform_3, window_bounds = array<i64: 256, 32>}, {pipeline_mode = #tpu.pipeline_mode<synchronous>, transform_indices = @transform_4, window_bounds = array<i64: 392, 32>}, {pipeline_mode = #tpu.pipeline_mode<synchronous>, transform_indices = @transform_5, window_bounds = array<i64: 49, 32, 128>}, {pipeline_mode = #tpu.pipeline_mode<synchronous>, transform_indices = @transform_6, window_bounds = array<i64: 1, 128>}, {pipeline_mode = #tpu.pipeline_mode<synchronous>, transform_indices = @transform_7, window_bounds = array<i64: 128, 128>}, {pipeline_mode = #tpu.pipeline_mode<synchronous>, transform_indices = @transform_8, window_bounds = array<i64: 1, 128>}, {transform_indices = @transform_9, window_bounds = array<i64: 8, 128>}]} {
    %c0 = arith.constant 0 : index
    %c0_0 = arith.constant 0 : index
    %0 = vector.load %arg1[%c0, %c0_0] : memref<392x256xbf16, #tpu.memory_space<vmem>>, vector<392x256xbf16>
    %c0_1 = arith.constant 0 : index
    %c0_2 = arith.constant 0 : index
    %1 = vector.load %arg2[%c0_1, %c0_2] : memref<256x256xbf16, #tpu.memory_space<vmem>>, vector<256x256xbf16>
    %cst = arith.constant dense<0.000000e+00> : vector<392x256xf32>
    %2 = tpu.matmul %0, %1, %cst {dimension_numbers = #tpu.dot_dimension_numbers<[1], [0], [0], [1], [0, 0, 1, 1], [], []>} : vector<392x256xbf16>, vector<256x256xbf16>, vector<392x256xf32> -> vector<392x256xf32>
    %c0_3 = arith.constant 0 : index
    %c0_4 = arith.constant 0 : index
    %3 = vector.load %arg3[%c0_3, %c0_4] : memref<1x256xf32, #tpu.memory_space<vmem>>, vector<1x256xf32>
    %4 = vector.broadcast %3 : vector<1x256xf32> to vector<392x256xf32>
    %5 = arith.addf %2, %4 : vector<392x256xf32>
    %cst_5 = arith.constant 0.000000e+00 : f32
    %6 = vector.broadcast %cst_5 : f32 to vector<392x256xf32>
    %7 = arith.maximumf %5, %6 : vector<392x256xf32>
    %8 = arith.truncf %7 : vector<392x256xf32> to vector<392x256xbf16>
    %c0_6 = arith.constant 0 : index
    %c0_7 = arith.constant 0 : index
    %9 = vector.load %arg4[%c0_6, %c0_7] : memref<256x32xbf16, #tpu.memory_space<vmem>>, vector<256x32xbf16>
    %cst_8 = arith.constant dense<0.000000e+00> : vector<392x32xf32>
    %10 = tpu.matmul %8, %9, %cst_8 {dimension_numbers = #tpu.dot_dimension_numbers<[1], [0], [0], [1], [0, 0, 1, 1], [], []>} : vector<392x256xbf16>, vector<256x32xbf16>, vector<392x32xf32> -> vector<392x32xf32>
    %c0_9 = arith.constant 0 : index
    %c0_10 = arith.constant 0 : index
    %11 = vector.load %arg5[%c0_9, %c0_10] : memref<392x32xf32, #tpu.memory_space<vmem>>, vector<392x32xf32>
    %12 = arith.addf %10, %11 : vector<392x32xf32>
    %cst_11 = arith.constant 0.000000e+00 : f32
    %13 = vector.broadcast %cst_11 : f32 to vector<392x32xf32>
    %14 = arith.maximumf %12, %13 : vector<392x32xf32>
    %cst_12 = arith.constant 0.000000e+00 : f32
    %15 = vector.broadcast %cst_12 : f32 to vector<8x128xf32>
    %16 = vector.extract_strided_slice %14 {offsets = [0, 0], sizes = [8, 32], strides = [1, 1]} : vector<392x32xf32> to vector<8x32xf32>
    %17 = arith.truncf %16 : vector<8x32xf32> to vector<8x32xbf16>
    %c0_13 = arith.constant 0 : index
    %c0_14 = arith.constant 0 : index
    %c0_15 = arith.constant 0 : index
    %18 = vector.load %arg6[%c0_13, %c0_14, %c0_15] : memref<49x32x128xbf16, #tpu.memory_space<vmem>>, vector<1x32x128xbf16>
    %19 = vector.shape_cast %18 : vector<1x32x128xbf16> to vector<32x128xbf16>
    %cst_16 = arith.constant dense<0.000000e+00> : vector<8x128xf32>
    %20 = tpu.matmul %17, %19, %cst_16 {dimension_numbers = #tpu.dot_dimension_numbers<[1], [0], [0], [1], [0, 0, 1, 1], [], []>} : vector<8x32xbf16>, vector<32x128xbf16>, vector<8x128xf32> -> vector<8x128xf32>
    %21 = arith.addf %15, %20 : vector<8x128xf32>
    %22 = vector.extract_strided_slice %14 {offsets = [8, 0], sizes = [8, 32], strides = [1, 1]} : vector<392x32xf32> to vector<8x32xf32>
    %23 = arith.truncf %22 : vector<8x32xf32> to vector<8x32xbf16>
    %c1 = arith.constant 1 : index
    %c0_17 = arith.constant 0 : index
    %c0_18 = arith.constant 0 : index
    %24 = vector.load %arg6[%c1, %c0_17, %c0_18] : memref<49x32x128xbf16, #tpu.memory_space<vmem>>, vector<1x32x128xbf16>
    %25 = vector.shape_cast %24 : vector<1x32x128xbf16> to vector<32x128xbf16>
    %cst_19 = arith.constant dense<0.000000e+00> : vector<8x128xf32>
    %26 = tpu.matmul %23, %25, %cst_19 {dimension_numbers = #tpu.dot_dimension_numbers<[1], [0], [0], [1], [0, 0, 1, 1], [], []>} : vector<8x32xbf16>, vector<32x128xbf16>, vector<8x128xf32> -> vector<8x128xf32>
    %27 = arith.addf %21, %26 : vector<8x128xf32>
    %28 = vector.extract_strided_slice %14 {offsets = [16, 0], sizes = [8, 32], strides = [1, 1]} : vector<392x32xf32> to vector<8x32xf32>
    %29 = arith.truncf %28 : vector<8x32xf32> to vector<8x32xbf16>
    %c2 = arith.constant 2 : index
    %c0_20 = arith.constant 0 : index
    %c0_21 = arith.constant 0 : index
    %30 = vector.load %arg6[%c2, %c0_20, %c0_21] : memref<49x32x128xbf16, #tpu.memory_space<vmem>>, vector<1x32x128xbf16>
    %31 = vector.shape_cast %30 : vector<1x32x128xbf16> to vector<32x128xbf16>
    %cst_22 = arith.constant dense<0.000000e+00> : vector<8x128xf32>
    %32 = tpu.matmul %29, %31, %cst_22 {dimension_numbers = #tpu.dot_dimension_numbers<[1], [0], [0], [1], [0, 0, 1, 1], [], []>} : vector<8x32xbf16>, vector<32x128xbf16>, vector<8x128xf32> -> vector<8x128xf32>
    %33 = arith.addf %27, %32 : vector<8x128xf32>
    %34 = vector.extract_strided_slice %14 {offsets = [24, 0], sizes = [8, 32], strides = [1, 1]} : vector<392x32xf32> to vector<8x32xf32>
    %35 = arith.truncf %34 : vector<8x32xf32> to vector<8x32xbf16>
    %c3 = arith.constant 3 : index
    %c0_23 = arith.constant 0 : index
    %c0_24 = arith.constant 0 : index
    %36 = vector.load %arg6[%c3, %c0_23, %c0_24] : memref<49x32x128xbf16, #tpu.memory_space<vmem>>, vector<1x32x128xbf16>
    %37 = vector.shape_cast %36 : vector<1x32x128xbf16> to vector<32x128xbf16>
    %cst_25 = arith.constant dense<0.000000e+00> : vector<8x128xf32>
    %38 = tpu.matmul %35, %37, %cst_25 {dimension_numbers = #tpu.dot_dimension_numbers<[1], [0], [0], [1], [0, 0, 1, 1], [], []>} : vector<8x32xbf16>, vector<32x128xbf16>, vector<8x128xf32> -> vector<8x128xf32>
    %39 = arith.addf %33, %38 : vector<8x128xf32>
    %40 = vector.extract_strided_slice %14 {offsets = [32, 0], sizes = [8, 32], strides = [1, 1]} : vector<392x32xf32> to vector<8x32xf32>
    %41 = arith.truncf %40 : vector<8x32xf32> to vector<8x32xbf16>
    %c4 = arith.constant 4 : index
    %c0_26 = arith.constant 0 : index
    %c0_27 = arith.constant 0 : index
    %42 = vector.load %arg6[%c4, %c0_26, %c0_27] : memref<49x32x128xbf16, #tpu.memory_space<vmem>>, vector<1x32x128xbf16>
    %43 = vector.shape_cast %42 : vector<1x32x128xbf16> to vector<32x128xbf16>
    %cst_28 = arith.constant dense<0.000000e+00> : vector<8x128xf32>
    %44 = tpu.matmul %41, %43, %cst_28 {dimension_numbers = #tpu.dot_dimension_numbers<[1], [0], [0], [1], [0, 0, 1, 1], [], []>} : vector<8x32xbf16>, vector<32x128xbf16>, vector<8x128xf32> -> vector<8x128xf32>
    %45 = arith.addf %39, %44 : vector<8x128xf32>
    %46 = vector.extract_strided_slice %14 {offsets = [40, 0], sizes = [8, 32], strides = [1, 1]} : vector<392x32xf32> to vector<8x32xf32>
    %47 = arith.truncf %46 : vector<8x32xf32> to vector<8x32xbf16>
    %c5 = arith.constant 5 : index
    %c0_29 = arith.constant 0 : index
    %c0_30 = arith.constant 0 : index
    %48 = vector.load %arg6[%c5, %c0_29, %c0_30] : memref<49x32x128xbf16, #tpu.memory_space<vmem>>, vector<1x32x128xbf16>
    %49 = vector.shape_cast %48 : vector<1x32x128xbf16> to vector<32x128xbf16>
    %cst_31 = arith.constant dense<0.000000e+00> : vector<8x128xf32>
    %50 = tpu.matmul %47, %49, %cst_31 {dimension_numbers = #tpu.dot_dimension_numbers<[1], [0], [0], [1], [0, 0, 1, 1], [], []>} : vector<8x32xbf16>, vector<32x128xbf16>, vector<8x128xf32> -> vector<8x128xf32>
    %51 = arith.addf %45, %50 : vector<8x128xf32>
    %52 = vector.extract_strided_slice %14 {offsets = [48, 0], sizes = [8, 32], strides = [1, 1]} : vector<392x32xf32> to vector<8x32xf32>
    %53 = arith.truncf %52 : vector<8x32xf32> to vector<8x32xbf16>
    %c6 = arith.constant 6 : index
    %c0_32 = arith.constant 0 : index
    %c0_33 = arith.constant 0 : index
    %54 = vector.load %arg6[%c6, %c0_32, %c0_33] : memref<49x32x128xbf16, #tpu.memory_space<vmem>>, vector<1x32x128xbf16>
    %55 = vector.shape_cast %54 : vector<1x32x128xbf16> to vector<32x128xbf16>
    %cst_34 = arith.constant dense<0.000000e+00> : vector<8x128xf32>
    %56 = tpu.matmul %53, %55, %cst_34 {dimension_numbers = #tpu.dot_dimension_numbers<[1], [0], [0], [1], [0, 0, 1, 1], [], []>} : vector<8x32xbf16>, vector<32x128xbf16>, vector<8x128xf32> -> vector<8x128xf32>
    %57 = arith.addf %51, %56 : vector<8x128xf32>
    %58 = vector.extract_strided_slice %14 {offsets = [56, 0], sizes = [8, 32], strides = [1, 1]} : vector<392x32xf32> to vector<8x32xf32>
    %59 = arith.truncf %58 : vector<8x32xf32> to vector<8x32xbf16>
    %c7 = arith.constant 7 : index
    %c0_35 = arith.constant 0 : index
    %c0_36 = arith.constant 0 : index
    %60 = vector.load %arg6[%c7, %c0_35, %c0_36] : memref<49x32x128xbf16, #tpu.memory_space<vmem>>, vector<1x32x128xbf16>
    %61 = vector.shape_cast %60 : vector<1x32x128xbf16> to vector<32x128xbf16>
    %cst_37 = arith.constant dense<0.000000e+00> : vector<8x128xf32>
    %62 = tpu.matmul %59, %61, %cst_37 {dimension_numbers = #tpu.dot_dimension_numbers<[1], [0], [0], [1], [0, 0, 1, 1], [], []>} : vector<8x32xbf16>, vector<32x128xbf16>, vector<8x128xf32> -> vector<8x128xf32>
    %63 = arith.addf %57, %62 : vector<8x128xf32>
    %64 = vector.extract_strided_slice %14 {offsets = [64, 0], sizes = [8, 32], strides = [1, 1]} : vector<392x32xf32> to vector<8x32xf32>
    %65 = arith.truncf %64 : vector<8x32xf32> to vector<8x32xbf16>
    %c8 = arith.constant 8 : index
    %c0_38 = arith.constant 0 : index
    %c0_39 = arith.constant 0 : index
    %66 = vector.load %arg6[%c8, %c0_38, %c0_39] : memref<49x32x128xbf16, #tpu.memory_space<vmem>>, vector<1x32x128xbf16>
    %67 = vector.shape_cast %66 : vector<1x32x128xbf16> to vector<32x128xbf16>
    %cst_40 = arith.constant dense<0.000000e+00> : vector<8x128xf32>
    %68 = tpu.matmul %65, %67, %cst_40 {dimension_numbers = #tpu.dot_dimension_numbers<[1], [0], [0], [1], [0, 0, 1, 1], [], []>} : vector<8x32xbf16>, vector<32x128xbf16>, vector<8x128xf32> -> vector<8x128xf32>
    %69 = arith.addf %63, %68 : vector<8x128xf32>
    %70 = vector.extract_strided_slice %14 {offsets = [72, 0], sizes = [8, 32], strides = [1, 1]} : vector<392x32xf32> to vector<8x32xf32>
    %71 = arith.truncf %70 : vector<8x32xf32> to vector<8x32xbf16>
    %c9 = arith.constant 9 : index
    %c0_41 = arith.constant 0 : index
    %c0_42 = arith.constant 0 : index
    %72 = vector.load %arg6[%c9, %c0_41, %c0_42] : memref<49x32x128xbf16, #tpu.memory_space<vmem>>, vector<1x32x128xbf16>
    %73 = vector.shape_cast %72 : vector<1x32x128xbf16> to vector<32x128xbf16>
    %cst_43 = arith.constant dense<0.000000e+00> : vector<8x128xf32>
    %74 = tpu.matmul %71, %73, %cst_43 {dimension_numbers = #tpu.dot_dimension_numbers<[1], [0], [0], [1], [0, 0, 1, 1], [], []>} : vector<8x32xbf16>, vector<32x128xbf16>, vector<8x128xf32> -> vector<8x128xf32>
    %75 = arith.addf %69, %74 : vector<8x128xf32>
    %76 = vector.extract_strided_slice %14 {offsets = [80, 0], sizes = [8, 32], strides = [1, 1]} : vector<392x32xf32> to vector<8x32xf32>
    %77 = arith.truncf %76 : vector<8x32xf32> to vector<8x32xbf16>
    %c10 = arith.constant 10 : index
    %c0_44 = arith.constant 0 : index
    %c0_45 = arith.constant 0 : index
    %78 = vector.load %arg6[%c10, %c0_44, %c0_45] : memref<49x32x128xbf16, #tpu.memory_space<vmem>>, vector<1x32x128xbf16>
    %79 = vector.shape_cast %78 : vector<1x32x128xbf16> to vector<32x128xbf16>
    %cst_46 = arith.constant dense<0.000000e+00> : vector<8x128xf32>
    %80 = tpu.matmul %77, %79, %cst_46 {dimension_numbers = #tpu.dot_dimension_numbers<[1], [0], [0], [1], [0, 0, 1, 1], [], []>} : vector<8x32xbf16>, vector<32x128xbf16>, vector<8x128xf32> -> vector<8x128xf32>
    %81 = arith.addf %75, %80 : vector<8x128xf32>
    %82 = vector.extract_strided_slice %14 {offsets = [88, 0], sizes = [8, 32], strides = [1, 1]} : vector<392x32xf32> to vector<8x32xf32>
    %83 = arith.truncf %82 : vector<8x32xf32> to vector<8x32xbf16>
    %c11 = arith.constant 11 : index
    %c0_47 = arith.constant 0 : index
    %c0_48 = arith.constant 0 : index
    %84 = vector.load %arg6[%c11, %c0_47, %c0_48] : memref<49x32x128xbf16, #tpu.memory_space<vmem>>, vector<1x32x128xbf16>
    %85 = vector.shape_cast %84 : vector<1x32x128xbf16> to vector<32x128xbf16>
    %cst_49 = arith.constant dense<0.000000e+00> : vector<8x128xf32>
    %86 = tpu.matmul %83, %85, %cst_49 {dimension_numbers = #tpu.dot_dimension_numbers<[1], [0], [0], [1], [0, 0, 1, 1], [], []>} : vector<8x32xbf16>, vector<32x128xbf16>, vector<8x128xf32> -> vector<8x128xf32>
    %87 = arith.addf %81, %86 : vector<8x128xf32>
    %88 = vector.extract_strided_slice %14 {offsets = [96, 0], sizes = [8, 32], strides = [1, 1]} : vector<392x32xf32> to vector<8x32xf32>
    %89 = arith.truncf %88 : vector<8x32xf32> to vector<8x32xbf16>
    %c12 = arith.constant 12 : index
    %c0_50 = arith.constant 0 : index
    %c0_51 = arith.constant 0 : index
    %90 = vector.load %arg6[%c12, %c0_50, %c0_51] : memref<49x32x128xbf16, #tpu.memory_space<vmem>>, vector<1x32x128xbf16>
    %91 = vector.shape_cast %90 : vector<1x32x128xbf16> to vector<32x128xbf16>
    %cst_52 = arith.constant dense<0.000000e+00> : vector<8x128xf32>
    %92 = tpu.matmul %89, %91, %cst_52 {dimension_numbers = #tpu.dot_dimension_numbers<[1], [0], [0], [1], [0, 0, 1, 1], [], []>} : vector<8x32xbf16>, vector<32x128xbf16>, vector<8x128xf32> -> vector<8x128xf32>
    %93 = arith.addf %87, %92 : vector<8x128xf32>
    %94 = vector.extract_strided_slice %14 {offsets = [104, 0], sizes = [8, 32], strides = [1, 1]} : vector<392x32xf32> to vector<8x32xf32>
    %95 = arith.truncf %94 : vector<8x32xf32> to vector<8x32xbf16>
    %c13 = arith.constant 13 : index
    %c0_53 = arith.constant 0 : index
    %c0_54 = arith.constant 0 : index
    %96 = vector.load %arg6[%c13, %c0_53, %c0_54] : memref<49x32x128xbf16, #tpu.memory_space<vmem>>, vector<1x32x128xbf16>
    %97 = vector.shape_cast %96 : vector<1x32x128xbf16> to vector<32x128xbf16>
    %cst_55 = arith.constant dense<0.000000e+00> : vector<8x128xf32>
    %98 = tpu.matmul %95, %97, %cst_55 {dimension_numbers = #tpu.dot_dimension_numbers<[1], [0], [0], [1], [0, 0, 1, 1], [], []>} : vector<8x32xbf16>, vector<32x128xbf16>, vector<8x128xf32> -> vector<8x128xf32>
    %99 = arith.addf %93, %98 : vector<8x128xf32>
    %100 = vector.extract_strided_slice %14 {offsets = [112, 0], sizes = [8, 32], strides = [1, 1]} : vector<392x32xf32> to vector<8x32xf32>
    %101 = arith.truncf %100 : vector<8x32xf32> to vector<8x32xbf16>
    %c14 = arith.constant 14 : index
    %c0_56 = arith.constant 0 : index
    %c0_57 = arith.constant 0 : index
    %102 = vector.load %arg6[%c14, %c0_56, %c0_57] : memref<49x32x128xbf16, #tpu.memory_space<vmem>>, vector<1x32x128xbf16>
    %103 = vector.shape_cast %102 : vector<1x32x128xbf16> to vector<32x128xbf16>
    %cst_58 = arith.constant dense<0.000000e+00> : vector<8x128xf32>
    %104 = tpu.matmul %101, %103, %cst_58 {dimension_numbers = #tpu.dot_dimension_numbers<[1], [0], [0], [1], [0, 0, 1, 1], [], []>} : vector<8x32xbf16>, vector<32x128xbf16>, vector<8x128xf32> -> vector<8x128xf32>
    %105 = arith.addf %99, %104 : vector<8x128xf32>
    %106 = vector.extract_strided_slice %14 {offsets = [120, 0], sizes = [8, 32], strides = [1, 1]} : vector<392x32xf32> to vector<8x32xf32>
    %107 = arith.truncf %106 : vector<8x32xf32> to vector<8x32xbf16>
    %c15 = arith.constant 15 : index
    %c0_59 = arith.constant 0 : index
    %c0_60 = arith.constant 0 : index
    %108 = vector.load %arg6[%c15, %c0_59, %c0_60] : memref<49x32x128xbf16, #tpu.memory_space<vmem>>, vector<1x32x128xbf16>
    %109 = vector.shape_cast %108 : vector<1x32x128xbf16> to vector<32x128xbf16>
    %cst_61 = arith.constant dense<0.000000e+00> : vector<8x128xf32>
    %110 = tpu.matmul %107, %109, %cst_61 {dimension_numbers = #tpu.dot_dimension_numbers<[1], [0], [0], [1], [0, 0, 1, 1], [], []>} : vector<8x32xbf16>, vector<32x128xbf16>, vector<8x128xf32> -> vector<8x128xf32>
    %111 = arith.addf %105, %110 : vector<8x128xf32>
    %112 = vector.extract_strided_slice %14 {offsets = [128, 0], sizes = [8, 32], strides = [1, 1]} : vector<392x32xf32> to vector<8x32xf32>
    %113 = arith.truncf %112 : vector<8x32xf32> to vector<8x32xbf16>
    %c16 = arith.constant 16 : index
    %c0_62 = arith.constant 0 : index
    %c0_63 = arith.constant 0 : index
    %114 = vector.load %arg6[%c16, %c0_62, %c0_63] : memref<49x32x128xbf16, #tpu.memory_space<vmem>>, vector<1x32x128xbf16>
    %115 = vector.shape_cast %114 : vector<1x32x128xbf16> to vector<32x128xbf16>
    %cst_64 = arith.constant dense<0.000000e+00> : vector<8x128xf32>
    %116 = tpu.matmul %113, %115, %cst_64 {dimension_numbers = #tpu.dot_dimension_numbers<[1], [0], [0], [1], [0, 0, 1, 1], [], []>} : vector<8x32xbf16>, vector<32x128xbf16>, vector<8x128xf32> -> vector<8x128xf32>
    %117 = arith.addf %111, %116 : vector<8x128xf32>
    %118 = vector.extract_strided_slice %14 {offsets = [136, 0], sizes = [8, 32], strides = [1, 1]} : vector<392x32xf32> to vector<8x32xf32>
    %119 = arith.truncf %118 : vector<8x32xf32> to vector<8x32xbf16>
    %c17 = arith.constant 17 : index
    %c0_65 = arith.constant 0 : index
    %c0_66 = arith.constant 0 : index
    %120 = vector.load %arg6[%c17, %c0_65, %c0_66] : memref<49x32x128xbf16, #tpu.memory_space<vmem>>, vector<1x32x128xbf16>
    %121 = vector.shape_cast %120 : vector<1x32x128xbf16> to vector<32x128xbf16>
    %cst_67 = arith.constant dense<0.000000e+00> : vector<8x128xf32>
    %122 = tpu.matmul %119, %121, %cst_67 {dimension_numbers = #tpu.dot_dimension_numbers<[1], [0], [0], [1], [0, 0, 1, 1], [], []>} : vector<8x32xbf16>, vector<32x128xbf16>, vector<8x128xf32> -> vector<8x128xf32>
    %123 = arith.addf %117, %122 : vector<8x128xf32>
    %124 = vector.extract_strided_slice %14 {offsets = [144, 0], sizes = [8, 32], strides = [1, 1]} : vector<392x32xf32> to vector<8x32xf32>
    %125 = arith.truncf %124 : vector<8x32xf32> to vector<8x32xbf16>
    %c18 = arith.constant 18 : index
    %c0_68 = arith.constant 0 : index
    %c0_69 = arith.constant 0 : index
    %126 = vector.load %arg6[%c18, %c0_68, %c0_69] : memref<49x32x128xbf16, #tpu.memory_space<vmem>>, vector<1x32x128xbf16>
    %127 = vector.shape_cast %126 : vector<1x32x128xbf16> to vector<32x128xbf16>
    %cst_70 = arith.constant dense<0.000000e+00> : vector<8x128xf32>
    %128 = tpu.matmul %125, %127, %cst_70 {dimension_numbers = #tpu.dot_dimension_numbers<[1], [0], [0], [1], [0, 0, 1, 1], [], []>} : vector<8x32xbf16>, vector<32x128xbf16>, vector<8x128xf32> -> vector<8x128xf32>
    %129 = arith.addf %123, %128 : vector<8x128xf32>
    %130 = vector.extract_strided_slice %14 {offsets = [152, 0], sizes = [8, 32], strides = [1, 1]} : vector<392x32xf32> to vector<8x32xf32>
    %131 = arith.truncf %130 : vector<8x32xf32> to vector<8x32xbf16>
    %c19 = arith.constant 19 : index
    %c0_71 = arith.constant 0 : index
    %c0_72 = arith.constant 0 : index
    %132 = vector.load %arg6[%c19, %c0_71, %c0_72] : memref<49x32x128xbf16, #tpu.memory_space<vmem>>, vector<1x32x128xbf16>
    %133 = vector.shape_cast %132 : vector<1x32x128xbf16> to vector<32x128xbf16>
    %cst_73 = arith.constant dense<0.000000e+00> : vector<8x128xf32>
    %134 = tpu.matmul %131, %133, %cst_73 {dimension_numbers = #tpu.dot_dimension_numbers<[1], [0], [0], [1], [0, 0, 1, 1], [], []>} : vector<8x32xbf16>, vector<32x128xbf16>, vector<8x128xf32> -> vector<8x128xf32>
    %135 = arith.addf %129, %134 : vector<8x128xf32>
    %136 = vector.extract_strided_slice %14 {offsets = [160, 0], sizes = [8, 32], strides = [1, 1]} : vector<392x32xf32> to vector<8x32xf32>
    %137 = arith.truncf %136 : vector<8x32xf32> to vector<8x32xbf16>
    %c20 = arith.constant 20 : index
    %c0_74 = arith.constant 0 : index
    %c0_75 = arith.constant 0 : index
    %138 = vector.load %arg6[%c20, %c0_74, %c0_75] : memref<49x32x128xbf16, #tpu.memory_space<vmem>>, vector<1x32x128xbf16>
    %139 = vector.shape_cast %138 : vector<1x32x128xbf16> to vector<32x128xbf16>
    %cst_76 = arith.constant dense<0.000000e+00> : vector<8x128xf32>
    %140 = tpu.matmul %137, %139, %cst_76 {dimension_numbers = #tpu.dot_dimension_numbers<[1], [0], [0], [1], [0, 0, 1, 1], [], []>} : vector<8x32xbf16>, vector<32x128xbf16>, vector<8x128xf32> -> vector<8x128xf32>
    %141 = arith.addf %135, %140 : vector<8x128xf32>
    %142 = vector.extract_strided_slice %14 {offsets = [168, 0], sizes = [8, 32], strides = [1, 1]} : vector<392x32xf32> to vector<8x32xf32>
    %143 = arith.truncf %142 : vector<8x32xf32> to vector<8x32xbf16>
    %c21 = arith.constant 21 : index
    %c0_77 = arith.constant 0 : index
    %c0_78 = arith.constant 0 : index
    %144 = vector.load %arg6[%c21, %c0_77, %c0_78] : memref<49x32x128xbf16, #tpu.memory_space<vmem>>, vector<1x32x128xbf16>
    %145 = vector.shape_cast %144 : vector<1x32x128xbf16> to vector<32x128xbf16>
    %cst_79 = arith.constant dense<0.000000e+00> : vector<8x128xf32>
    %146 = tpu.matmul %143, %145, %cst_79 {dimension_numbers = #tpu.dot_dimension_numbers<[1], [0], [0], [1], [0, 0, 1, 1], [], []>} : vector<8x32xbf16>, vector<32x128xbf16>, vector<8x128xf32> -> vector<8x128xf32>
    %147 = arith.addf %141, %146 : vector<8x128xf32>
    %148 = vector.extract_strided_slice %14 {offsets = [176, 0], sizes = [8, 32], strides = [1, 1]} : vector<392x32xf32> to vector<8x32xf32>
    %149 = arith.truncf %148 : vector<8x32xf32> to vector<8x32xbf16>
    %c22 = arith.constant 22 : index
    %c0_80 = arith.constant 0 : index
    %c0_81 = arith.constant 0 : index
    %150 = vector.load %arg6[%c22, %c0_80, %c0_81] : memref<49x32x128xbf16, #tpu.memory_space<vmem>>, vector<1x32x128xbf16>
    %151 = vector.shape_cast %150 : vector<1x32x128xbf16> to vector<32x128xbf16>
    %cst_82 = arith.constant dense<0.000000e+00> : vector<8x128xf32>
    %152 = tpu.matmul %149, %151, %cst_82 {dimension_numbers = #tpu.dot_dimension_numbers<[1], [0], [0], [1], [0, 0, 1, 1], [], []>} : vector<8x32xbf16>, vector<32x128xbf16>, vector<8x128xf32> -> vector<8x128xf32>
    %153 = arith.addf %147, %152 : vector<8x128xf32>
    %154 = vector.extract_strided_slice %14 {offsets = [184, 0], sizes = [8, 32], strides = [1, 1]} : vector<392x32xf32> to vector<8x32xf32>
    %155 = arith.truncf %154 : vector<8x32xf32> to vector<8x32xbf16>
    %c23 = arith.constant 23 : index
    %c0_83 = arith.constant 0 : index
    %c0_84 = arith.constant 0 : index
    %156 = vector.load %arg6[%c23, %c0_83, %c0_84] : memref<49x32x128xbf16, #tpu.memory_space<vmem>>, vector<1x32x128xbf16>
    %157 = vector.shape_cast %156 : vector<1x32x128xbf16> to vector<32x128xbf16>
    %cst_85 = arith.constant dense<0.000000e+00> : vector<8x128xf32>
    %158 = tpu.matmul %155, %157, %cst_85 {dimension_numbers = #tpu.dot_dimension_numbers<[1], [0], [0], [1], [0, 0, 1, 1], [], []>} : vector<8x32xbf16>, vector<32x128xbf16>, vector<8x128xf32> -> vector<8x128xf32>
    %159 = arith.addf %153, %158 : vector<8x128xf32>
    %160 = vector.extract_strided_slice %14 {offsets = [192, 0], sizes = [8, 32], strides = [1, 1]} : vector<392x32xf32> to vector<8x32xf32>
    %161 = arith.truncf %160 : vector<8x32xf32> to vector<8x32xbf16>
    %c24 = arith.constant 24 : index
    %c0_86 = arith.constant 0 : index
    %c0_87 = arith.constant 0 : index
    %162 = vector.load %arg6[%c24, %c0_86, %c0_87] : memref<49x32x128xbf16, #tpu.memory_space<vmem>>, vector<1x32x128xbf16>
    %163 = vector.shape_cast %162 : vector<1x32x128xbf16> to vector<32x128xbf16>
    %cst_88 = arith.constant dense<0.000000e+00> : vector<8x128xf32>
    %164 = tpu.matmul %161, %163, %cst_88 {dimension_numbers = #tpu.dot_dimension_numbers<[1], [0], [0], [1], [0, 0, 1, 1], [], []>} : vector<8x32xbf16>, vector<32x128xbf16>, vector<8x128xf32> -> vector<8x128xf32>
    %165 = arith.addf %159, %164 : vector<8x128xf32>
    %166 = vector.extract_strided_slice %14 {offsets = [200, 0], sizes = [8, 32], strides = [1, 1]} : vector<392x32xf32> to vector<8x32xf32>
    %167 = arith.truncf %166 : vector<8x32xf32> to vector<8x32xbf16>
    %c25 = arith.constant 25 : index
    %c0_89 = arith.constant 0 : index
    %c0_90 = arith.constant 0 : index
    %168 = vector.load %arg6[%c25, %c0_89, %c0_90] : memref<49x32x128xbf16, #tpu.memory_space<vmem>>, vector<1x32x128xbf16>
    %169 = vector.shape_cast %168 : vector<1x32x128xbf16> to vector<32x128xbf16>
    %cst_91 = arith.constant dense<0.000000e+00> : vector<8x128xf32>
    %170 = tpu.matmul %167, %169, %cst_91 {dimension_numbers = #tpu.dot_dimension_numbers<[1], [0], [0], [1], [0, 0, 1, 1], [], []>} : vector<8x32xbf16>, vector<32x128xbf16>, vector<8x128xf32> -> vector<8x128xf32>
    %171 = arith.addf %165, %170 : vector<8x128xf32>
    %172 = vector.extract_strided_slice %14 {offsets = [208, 0], sizes = [8, 32], strides = [1, 1]} : vector<392x32xf32> to vector<8x32xf32>
    %173 = arith.truncf %172 : vector<8x32xf32> to vector<8x32xbf16>
    %c26 = arith.constant 26 : index
    %c0_92 = arith.constant 0 : index
    %c0_93 = arith.constant 0 : index
    %174 = vector.load %arg6[%c26, %c0_92, %c0_93] : memref<49x32x128xbf16, #tpu.memory_space<vmem>>, vector<1x32x128xbf16>
    %175 = vector.shape_cast %174 : vector<1x32x128xbf16> to vector<32x128xbf16>
    %cst_94 = arith.constant dense<0.000000e+00> : vector<8x128xf32>
    %176 = tpu.matmul %173, %175, %cst_94 {dimension_numbers = #tpu.dot_dimension_numbers<[1], [0], [0], [1], [0, 0, 1, 1], [], []>} : vector<8x32xbf16>, vector<32x128xbf16>, vector<8x128xf32> -> vector<8x128xf32>
    %177 = arith.addf %171, %176 : vector<8x128xf32>
    %178 = vector.extract_strided_slice %14 {offsets = [216, 0], sizes = [8, 32], strides = [1, 1]} : vector<392x32xf32> to vector<8x32xf32>
    %179 = arith.truncf %178 : vector<8x32xf32> to vector<8x32xbf16>
    %c27 = arith.constant 27 : index
    %c0_95 = arith.constant 0 : index
    %c0_96 = arith.constant 0 : index
    %180 = vector.load %arg6[%c27, %c0_95, %c0_96] : memref<49x32x128xbf16, #tpu.memory_space<vmem>>, vector<1x32x128xbf16>
    %181 = vector.shape_cast %180 : vector<1x32x128xbf16> to vector<32x128xbf16>
    %cst_97 = arith.constant dense<0.000000e+00> : vector<8x128xf32>
    %182 = tpu.matmul %179, %181, %cst_97 {dimension_numbers = #tpu.dot_dimension_numbers<[1], [0], [0], [1], [0, 0, 1, 1], [], []>} : vector<8x32xbf16>, vector<32x128xbf16>, vector<8x128xf32> -> vector<8x128xf32>
    %183 = arith.addf %177, %182 : vector<8x128xf32>
    %184 = vector.extract_strided_slice %14 {offsets = [224, 0], sizes = [8, 32], strides = [1, 1]} : vector<392x32xf32> to vector<8x32xf32>
    %185 = arith.truncf %184 : vector<8x32xf32> to vector<8x32xbf16>
    %c28 = arith.constant 28 : index
    %c0_98 = arith.constant 0 : index
    %c0_99 = arith.constant 0 : index
    %186 = vector.load %arg6[%c28, %c0_98, %c0_99] : memref<49x32x128xbf16, #tpu.memory_space<vmem>>, vector<1x32x128xbf16>
    %187 = vector.shape_cast %186 : vector<1x32x128xbf16> to vector<32x128xbf16>
    %cst_100 = arith.constant dense<0.000000e+00> : vector<8x128xf32>
    %188 = tpu.matmul %185, %187, %cst_100 {dimension_numbers = #tpu.dot_dimension_numbers<[1], [0], [0], [1], [0, 0, 1, 1], [], []>} : vector<8x32xbf16>, vector<32x128xbf16>, vector<8x128xf32> -> vector<8x128xf32>
    %189 = arith.addf %183, %188 : vector<8x128xf32>
    %190 = vector.extract_strided_slice %14 {offsets = [232, 0], sizes = [8, 32], strides = [1, 1]} : vector<392x32xf32> to vector<8x32xf32>
    %191 = arith.truncf %190 : vector<8x32xf32> to vector<8x32xbf16>
    %c29 = arith.constant 29 : index
    %c0_101 = arith.constant 0 : index
    %c0_102 = arith.constant 0 : index
    %192 = vector.load %arg6[%c29, %c0_101, %c0_102] : memref<49x32x128xbf16, #tpu.memory_space<vmem>>, vector<1x32x128xbf16>
    %193 = vector.shape_cast %192 : vector<1x32x128xbf16> to vector<32x128xbf16>
    %cst_103 = arith.constant dense<0.000000e+00> : vector<8x128xf32>
    %194 = tpu.matmul %191, %193, %cst_103 {dimension_numbers = #tpu.dot_dimension_numbers<[1], [0], [0], [1], [0, 0, 1, 1], [], []>} : vector<8x32xbf16>, vector<32x128xbf16>, vector<8x128xf32> -> vector<8x128xf32>
    %195 = arith.addf %189, %194 : vector<8x128xf32>
    %196 = vector.extract_strided_slice %14 {offsets = [240, 0], sizes = [8, 32], strides = [1, 1]} : vector<392x32xf32> to vector<8x32xf32>
    %197 = arith.truncf %196 : vector<8x32xf32> to vector<8x32xbf16>
    %c30 = arith.constant 30 : index
    %c0_104 = arith.constant 0 : index
    %c0_105 = arith.constant 0 : index
    %198 = vector.load %arg6[%c30, %c0_104, %c0_105] : memref<49x32x128xbf16, #tpu.memory_space<vmem>>, vector<1x32x128xbf16>
    %199 = vector.shape_cast %198 : vector<1x32x128xbf16> to vector<32x128xbf16>
    %cst_106 = arith.constant dense<0.000000e+00> : vector<8x128xf32>
    %200 = tpu.matmul %197, %199, %cst_106 {dimension_numbers = #tpu.dot_dimension_numbers<[1], [0], [0], [1], [0, 0, 1, 1], [], []>} : vector<8x32xbf16>, vector<32x128xbf16>, vector<8x128xf32> -> vector<8x128xf32>
    %201 = arith.addf %195, %200 : vector<8x128xf32>
    %202 = vector.extract_strided_slice %14 {offsets = [248, 0], sizes = [8, 32], strides = [1, 1]} : vector<392x32xf32> to vector<8x32xf32>
    %203 = arith.truncf %202 : vector<8x32xf32> to vector<8x32xbf16>
    %c31 = arith.constant 31 : index
    %c0_107 = arith.constant 0 : index
    %c0_108 = arith.constant 0 : index
    %204 = vector.load %arg6[%c31, %c0_107, %c0_108] : memref<49x32x128xbf16, #tpu.memory_space<vmem>>, vector<1x32x128xbf16>
    %205 = vector.shape_cast %204 : vector<1x32x128xbf16> to vector<32x128xbf16>
    %cst_109 = arith.constant dense<0.000000e+00> : vector<8x128xf32>
    %206 = tpu.matmul %203, %205, %cst_109 {dimension_numbers = #tpu.dot_dimension_numbers<[1], [0], [0], [1], [0, 0, 1, 1], [], []>} : vector<8x32xbf16>, vector<32x128xbf16>, vector<8x128xf32> -> vector<8x128xf32>
    %207 = arith.addf %201, %206 : vector<8x128xf32>
    %208 = vector.extract_strided_slice %14 {offsets = [256, 0], sizes = [8, 32], strides = [1, 1]} : vector<392x32xf32> to vector<8x32xf32>
    %209 = arith.truncf %208 : vector<8x32xf32> to vector<8x32xbf16>
    %c32 = arith.constant 32 : index
    %c0_110 = arith.constant 0 : index
    %c0_111 = arith.constant 0 : index
    %210 = vector.load %arg6[%c32, %c0_110, %c0_111] : memref<49x32x128xbf16, #tpu.memory_space<vmem>>, vector<1x32x128xbf16>
    %211 = vector.shape_cast %210 : vector<1x32x128xbf16> to vector<32x128xbf16>
    %cst_112 = arith.constant dense<0.000000e+00> : vector<8x128xf32>
    %212 = tpu.matmul %209, %211, %cst_112 {dimension_numbers = #tpu.dot_dimension_numbers<[1], [0], [0], [1], [0, 0, 1, 1], [], []>} : vector<8x32xbf16>, vector<32x128xbf16>, vector<8x128xf32> -> vector<8x128xf32>
    %213 = arith.addf %207, %212 : vector<8x128xf32>
    %214 = vector.extract_strided_slice %14 {offsets = [264, 0], sizes = [8, 32], strides = [1, 1]} : vector<392x32xf32> to vector<8x32xf32>
    %215 = arith.truncf %214 : vector<8x32xf32> to vector<8x32xbf16>
    %c33 = arith.constant 33 : index
    %c0_113 = arith.constant 0 : index
    %c0_114 = arith.constant 0 : index
    %216 = vector.load %arg6[%c33, %c0_113, %c0_114] : memref<49x32x128xbf16, #tpu.memory_space<vmem>>, vector<1x32x128xbf16>
    %217 = vector.shape_cast %216 : vector<1x32x128xbf16> to vector<32x128xbf16>
    %cst_115 = arith.constant dense<0.000000e+00> : vector<8x128xf32>
    %218 = tpu.matmul %215, %217, %cst_115 {dimension_numbers = #tpu.dot_dimension_numbers<[1], [0], [0], [1], [0, 0, 1, 1], [], []>} : vector<8x32xbf16>, vector<32x128xbf16>, vector<8x128xf32> -> vector<8x128xf32>
    %219 = arith.addf %213, %218 : vector<8x128xf32>
    %220 = vector.extract_strided_slice %14 {offsets = [272, 0], sizes = [8, 32], strides = [1, 1]} : vector<392x32xf32> to vector<8x32xf32>
    %221 = arith.truncf %220 : vector<8x32xf32> to vector<8x32xbf16>
    %c34 = arith.constant 34 : index
    %c0_116 = arith.constant 0 : index
    %c0_117 = arith.constant 0 : index
    %222 = vector.load %arg6[%c34, %c0_116, %c0_117] : memref<49x32x128xbf16, #tpu.memory_space<vmem>>, vector<1x32x128xbf16>
    %223 = vector.shape_cast %222 : vector<1x32x128xbf16> to vector<32x128xbf16>
    %cst_118 = arith.constant dense<0.000000e+00> : vector<8x128xf32>
    %224 = tpu.matmul %221, %223, %cst_118 {dimension_numbers = #tpu.dot_dimension_numbers<[1], [0], [0], [1], [0, 0, 1, 1], [], []>} : vector<8x32xbf16>, vector<32x128xbf16>, vector<8x128xf32> -> vector<8x128xf32>
    %225 = arith.addf %219, %224 : vector<8x128xf32>
    %226 = vector.extract_strided_slice %14 {offsets = [280, 0], sizes = [8, 32], strides = [1, 1]} : vector<392x32xf32> to vector<8x32xf32>
    %227 = arith.truncf %226 : vector<8x32xf32> to vector<8x32xbf16>
    %c35 = arith.constant 35 : index
    %c0_119 = arith.constant 0 : index
    %c0_120 = arith.constant 0 : index
    %228 = vector.load %arg6[%c35, %c0_119, %c0_120] : memref<49x32x128xbf16, #tpu.memory_space<vmem>>, vector<1x32x128xbf16>
    %229 = vector.shape_cast %228 : vector<1x32x128xbf16> to vector<32x128xbf16>
    %cst_121 = arith.constant dense<0.000000e+00> : vector<8x128xf32>
    %230 = tpu.matmul %227, %229, %cst_121 {dimension_numbers = #tpu.dot_dimension_numbers<[1], [0], [0], [1], [0, 0, 1, 1], [], []>} : vector<8x32xbf16>, vector<32x128xbf16>, vector<8x128xf32> -> vector<8x128xf32>
    %231 = arith.addf %225, %230 : vector<8x128xf32>
    %232 = vector.extract_strided_slice %14 {offsets = [288, 0], sizes = [8, 32], strides = [1, 1]} : vector<392x32xf32> to vector<8x32xf32>
    %233 = arith.truncf %232 : vector<8x32xf32> to vector<8x32xbf16>
    %c36 = arith.constant 36 : index
    %c0_122 = arith.constant 0 : index
    %c0_123 = arith.constant 0 : index
    %234 = vector.load %arg6[%c36, %c0_122, %c0_123] : memref<49x32x128xbf16, #tpu.memory_space<vmem>>, vector<1x32x128xbf16>
    %235 = vector.shape_cast %234 : vector<1x32x128xbf16> to vector<32x128xbf16>
    %cst_124 = arith.constant dense<0.000000e+00> : vector<8x128xf32>
    %236 = tpu.matmul %233, %235, %cst_124 {dimension_numbers = #tpu.dot_dimension_numbers<[1], [0], [0], [1], [0, 0, 1, 1], [], []>} : vector<8x32xbf16>, vector<32x128xbf16>, vector<8x128xf32> -> vector<8x128xf32>
    %237 = arith.addf %231, %236 : vector<8x128xf32>
    %238 = vector.extract_strided_slice %14 {offsets = [296, 0], sizes = [8, 32], strides = [1, 1]} : vector<392x32xf32> to vector<8x32xf32>
    %239 = arith.truncf %238 : vector<8x32xf32> to vector<8x32xbf16>
    %c37 = arith.constant 37 : index
    %c0_125 = arith.constant 0 : index
    %c0_126 = arith.constant 0 : index
    %240 = vector.load %arg6[%c37, %c0_125, %c0_126] : memref<49x32x128xbf16, #tpu.memory_space<vmem>>, vector<1x32x128xbf16>
    %241 = vector.shape_cast %240 : vector<1x32x128xbf16> to vector<32x128xbf16>
    %cst_127 = arith.constant dense<0.000000e+00> : vector<8x128xf32>
    %242 = tpu.matmul %239, %241, %cst_127 {dimension_numbers = #tpu.dot_dimension_numbers<[1], [0], [0], [1], [0, 0, 1, 1], [], []>} : vector<8x32xbf16>, vector<32x128xbf16>, vector<8x128xf32> -> vector<8x128xf32>
    %243 = arith.addf %237, %242 : vector<8x128xf32>
    %244 = vector.extract_strided_slice %14 {offsets = [304, 0], sizes = [8, 32], strides = [1, 1]} : vector<392x32xf32> to vector<8x32xf32>
    %245 = arith.truncf %244 : vector<8x32xf32> to vector<8x32xbf16>
    %c38 = arith.constant 38 : index
    %c0_128 = arith.constant 0 : index
    %c0_129 = arith.constant 0 : index
    %246 = vector.load %arg6[%c38, %c0_128, %c0_129] : memref<49x32x128xbf16, #tpu.memory_space<vmem>>, vector<1x32x128xbf16>
    %247 = vector.shape_cast %246 : vector<1x32x128xbf16> to vector<32x128xbf16>
    %cst_130 = arith.constant dense<0.000000e+00> : vector<8x128xf32>
    %248 = tpu.matmul %245, %247, %cst_130 {dimension_numbers = #tpu.dot_dimension_numbers<[1], [0], [0], [1], [0, 0, 1, 1], [], []>} : vector<8x32xbf16>, vector<32x128xbf16>, vector<8x128xf32> -> vector<8x128xf32>
    %249 = arith.addf %243, %248 : vector<8x128xf32>
    %250 = vector.extract_strided_slice %14 {offsets = [312, 0], sizes = [8, 32], strides = [1, 1]} : vector<392x32xf32> to vector<8x32xf32>
    %251 = arith.truncf %250 : vector<8x32xf32> to vector<8x32xbf16>
    %c39 = arith.constant 39 : index
    %c0_131 = arith.constant 0 : index
    %c0_132 = arith.constant 0 : index
    %252 = vector.load %arg6[%c39, %c0_131, %c0_132] : memref<49x32x128xbf16, #tpu.memory_space<vmem>>, vector<1x32x128xbf16>
    %253 = vector.shape_cast %252 : vector<1x32x128xbf16> to vector<32x128xbf16>
    %cst_133 = arith.constant dense<0.000000e+00> : vector<8x128xf32>
    %254 = tpu.matmul %251, %253, %cst_133 {dimension_numbers = #tpu.dot_dimension_numbers<[1], [0], [0], [1], [0, 0, 1, 1], [], []>} : vector<8x32xbf16>, vector<32x128xbf16>, vector<8x128xf32> -> vector<8x128xf32>
    %255 = arith.addf %249, %254 : vector<8x128xf32>
    %256 = vector.extract_strided_slice %14 {offsets = [320, 0], sizes = [8, 32], strides = [1, 1]} : vector<392x32xf32> to vector<8x32xf32>
    %257 = arith.truncf %256 : vector<8x32xf32> to vector<8x32xbf16>
    %c40 = arith.constant 40 : index
    %c0_134 = arith.constant 0 : index
    %c0_135 = arith.constant 0 : index
    %258 = vector.load %arg6[%c40, %c0_134, %c0_135] : memref<49x32x128xbf16, #tpu.memory_space<vmem>>, vector<1x32x128xbf16>
    %259 = vector.shape_cast %258 : vector<1x32x128xbf16> to vector<32x128xbf16>
    %cst_136 = arith.constant dense<0.000000e+00> : vector<8x128xf32>
    %260 = tpu.matmul %257, %259, %cst_136 {dimension_numbers = #tpu.dot_dimension_numbers<[1], [0], [0], [1], [0, 0, 1, 1], [], []>} : vector<8x32xbf16>, vector<32x128xbf16>, vector<8x128xf32> -> vector<8x128xf32>
    %261 = arith.addf %255, %260 : vector<8x128xf32>
    %262 = vector.extract_strided_slice %14 {offsets = [328, 0], sizes = [8, 32], strides = [1, 1]} : vector<392x32xf32> to vector<8x32xf32>
    %263 = arith.truncf %262 : vector<8x32xf32> to vector<8x32xbf16>
    %c41 = arith.constant 41 : index
    %c0_137 = arith.constant 0 : index
    %c0_138 = arith.constant 0 : index
    %264 = vector.load %arg6[%c41, %c0_137, %c0_138] : memref<49x32x128xbf16, #tpu.memory_space<vmem>>, vector<1x32x128xbf16>
    %265 = vector.shape_cast %264 : vector<1x32x128xbf16> to vector<32x128xbf16>
    %cst_139 = arith.constant dense<0.000000e+00> : vector<8x128xf32>
    %266 = tpu.matmul %263, %265, %cst_139 {dimension_numbers = #tpu.dot_dimension_numbers<[1], [0], [0], [1], [0, 0, 1, 1], [], []>} : vector<8x32xbf16>, vector<32x128xbf16>, vector<8x128xf32> -> vector<8x128xf32>
    %267 = arith.addf %261, %266 : vector<8x128xf32>
    %268 = vector.extract_strided_slice %14 {offsets = [336, 0], sizes = [8, 32], strides = [1, 1]} : vector<392x32xf32> to vector<8x32xf32>
    %269 = arith.truncf %268 : vector<8x32xf32> to vector<8x32xbf16>
    %c42 = arith.constant 42 : index
    %c0_140 = arith.constant 0 : index
    %c0_141 = arith.constant 0 : index
    %270 = vector.load %arg6[%c42, %c0_140, %c0_141] : memref<49x32x128xbf16, #tpu.memory_space<vmem>>, vector<1x32x128xbf16>
    %271 = vector.shape_cast %270 : vector<1x32x128xbf16> to vector<32x128xbf16>
    %cst_142 = arith.constant dense<0.000000e+00> : vector<8x128xf32>
    %272 = tpu.matmul %269, %271, %cst_142 {dimension_numbers = #tpu.dot_dimension_numbers<[1], [0], [0], [1], [0, 0, 1, 1], [], []>} : vector<8x32xbf16>, vector<32x128xbf16>, vector<8x128xf32> -> vector<8x128xf32>
    %273 = arith.addf %267, %272 : vector<8x128xf32>
    %274 = vector.extract_strided_slice %14 {offsets = [344, 0], sizes = [8, 32], strides = [1, 1]} : vector<392x32xf32> to vector<8x32xf32>
    %275 = arith.truncf %274 : vector<8x32xf32> to vector<8x32xbf16>
    %c43 = arith.constant 43 : index
    %c0_143 = arith.constant 0 : index
    %c0_144 = arith.constant 0 : index
    %276 = vector.load %arg6[%c43, %c0_143, %c0_144] : memref<49x32x128xbf16, #tpu.memory_space<vmem>>, vector<1x32x128xbf16>
    %277 = vector.shape_cast %276 : vector<1x32x128xbf16> to vector<32x128xbf16>
    %cst_145 = arith.constant dense<0.000000e+00> : vector<8x128xf32>
    %278 = tpu.matmul %275, %277, %cst_145 {dimension_numbers = #tpu.dot_dimension_numbers<[1], [0], [0], [1], [0, 0, 1, 1], [], []>} : vector<8x32xbf16>, vector<32x128xbf16>, vector<8x128xf32> -> vector<8x128xf32>
    %279 = arith.addf %273, %278 : vector<8x128xf32>
    %280 = vector.extract_strided_slice %14 {offsets = [352, 0], sizes = [8, 32], strides = [1, 1]} : vector<392x32xf32> to vector<8x32xf32>
    %281 = arith.truncf %280 : vector<8x32xf32> to vector<8x32xbf16>
    %c44 = arith.constant 44 : index
    %c0_146 = arith.constant 0 : index
    %c0_147 = arith.constant 0 : index
    %282 = vector.load %arg6[%c44, %c0_146, %c0_147] : memref<49x32x128xbf16, #tpu.memory_space<vmem>>, vector<1x32x128xbf16>
    %283 = vector.shape_cast %282 : vector<1x32x128xbf16> to vector<32x128xbf16>
    %cst_148 = arith.constant dense<0.000000e+00> : vector<8x128xf32>
    %284 = tpu.matmul %281, %283, %cst_148 {dimension_numbers = #tpu.dot_dimension_numbers<[1], [0], [0], [1], [0, 0, 1, 1], [], []>} : vector<8x32xbf16>, vector<32x128xbf16>, vector<8x128xf32> -> vector<8x128xf32>
    %285 = arith.addf %279, %284 : vector<8x128xf32>
    %286 = vector.extract_strided_slice %14 {offsets = [360, 0], sizes = [8, 32], strides = [1, 1]} : vector<392x32xf32> to vector<8x32xf32>
    %287 = arith.truncf %286 : vector<8x32xf32> to vector<8x32xbf16>
    %c45 = arith.constant 45 : index
    %c0_149 = arith.constant 0 : index
    %c0_150 = arith.constant 0 : index
    %288 = vector.load %arg6[%c45, %c0_149, %c0_150] : memref<49x32x128xbf16, #tpu.memory_space<vmem>>, vector<1x32x128xbf16>
    %289 = vector.shape_cast %288 : vector<1x32x128xbf16> to vector<32x128xbf16>
    %cst_151 = arith.constant dense<0.000000e+00> : vector<8x128xf32>
    %290 = tpu.matmul %287, %289, %cst_151 {dimension_numbers = #tpu.dot_dimension_numbers<[1], [0], [0], [1], [0, 0, 1, 1], [], []>} : vector<8x32xbf16>, vector<32x128xbf16>, vector<8x128xf32> -> vector<8x128xf32>
    %291 = arith.addf %285, %290 : vector<8x128xf32>
    %292 = vector.extract_strided_slice %14 {offsets = [368, 0], sizes = [8, 32], strides = [1, 1]} : vector<392x32xf32> to vector<8x32xf32>
    %293 = arith.truncf %292 : vector<8x32xf32> to vector<8x32xbf16>
    %c46 = arith.constant 46 : index
    %c0_152 = arith.constant 0 : index
    %c0_153 = arith.constant 0 : index
    %294 = vector.load %arg6[%c46, %c0_152, %c0_153] : memref<49x32x128xbf16, #tpu.memory_space<vmem>>, vector<1x32x128xbf16>
    %295 = vector.shape_cast %294 : vector<1x32x128xbf16> to vector<32x128xbf16>
    %cst_154 = arith.constant dense<0.000000e+00> : vector<8x128xf32>
    %296 = tpu.matmul %293, %295, %cst_154 {dimension_numbers = #tpu.dot_dimension_numbers<[1], [0], [0], [1], [0, 0, 1, 1], [], []>} : vector<8x32xbf16>, vector<32x128xbf16>, vector<8x128xf32> -> vector<8x128xf32>
    %297 = arith.addf %291, %296 : vector<8x128xf32>
    %298 = vector.extract_strided_slice %14 {offsets = [376, 0], sizes = [8, 32], strides = [1, 1]} : vector<392x32xf32> to vector<8x32xf32>
    %299 = arith.truncf %298 : vector<8x32xf32> to vector<8x32xbf16>
    %c47 = arith.constant 47 : index
    %c0_155 = arith.constant 0 : index
    %c0_156 = arith.constant 0 : index
    %300 = vector.load %arg6[%c47, %c0_155, %c0_156] : memref<49x32x128xbf16, #tpu.memory_space<vmem>>, vector<1x32x128xbf16>
    %301 = vector.shape_cast %300 : vector<1x32x128xbf16> to vector<32x128xbf16>
    %cst_157 = arith.constant dense<0.000000e+00> : vector<8x128xf32>
    %302 = tpu.matmul %299, %301, %cst_157 {dimension_numbers = #tpu.dot_dimension_numbers<[1], [0], [0], [1], [0, 0, 1, 1], [], []>} : vector<8x32xbf16>, vector<32x128xbf16>, vector<8x128xf32> -> vector<8x128xf32>
    %303 = arith.addf %297, %302 : vector<8x128xf32>
    %304 = vector.extract_strided_slice %14 {offsets = [384, 0], sizes = [8, 32], strides = [1, 1]} : vector<392x32xf32> to vector<8x32xf32>
    %305 = arith.truncf %304 : vector<8x32xf32> to vector<8x32xbf16>
    %c48 = arith.constant 48 : index
    %c0_158 = arith.constant 0 : index
    %c0_159 = arith.constant 0 : index
    %306 = vector.load %arg6[%c48, %c0_158, %c0_159] : memref<49x32x128xbf16, #tpu.memory_space<vmem>>, vector<1x32x128xbf16>
    %307 = vector.shape_cast %306 : vector<1x32x128xbf16> to vector<32x128xbf16>
    %cst_160 = arith.constant dense<0.000000e+00> : vector<8x128xf32>
    %308 = tpu.matmul %305, %307, %cst_160 {dimension_numbers = #tpu.dot_dimension_numbers<[1], [0], [0], [1], [0, 0, 1, 1], [], []>} : vector<8x32xbf16>, vector<32x128xbf16>, vector<8x128xf32> -> vector<8x128xf32>
    %309 = arith.addf %303, %308 : vector<8x128xf32>
    %c0_161 = arith.constant 0 : index
    %c0_162 = arith.constant 0 : index
    %310 = vector.load %arg7[%c0_161, %c0_162] : memref<1x128xf32, #tpu.memory_space<vmem>>, vector<1x128xf32>
    %311 = vector.broadcast %310 : vector<1x128xf32> to vector<8x128xf32>
    %312 = arith.addf %309, %311 : vector<8x128xf32>
    %cst_163 = arith.constant 0.000000e+00 : f32
    %313 = vector.broadcast %cst_163 : f32 to vector<8x128xf32>
    %314 = arith.maximumf %312, %313 : vector<8x128xf32>
    %315 = arith.truncf %314 : vector<8x128xf32> to vector<8x128xbf16>
    %c0_164 = arith.constant 0 : index
    %c0_165 = arith.constant 0 : index
    %316 = vector.load %arg8[%c0_164, %c0_165] : memref<128x128xbf16, #tpu.memory_space<vmem>>, vector<128x128xbf16>
    %cst_166 = arith.constant dense<0.000000e+00> : vector<8x128xf32>
    %317 = tpu.matmul %315, %316, %cst_166 {dimension_numbers = #tpu.dot_dimension_numbers<[1], [0], [0], [1], [0, 0, 1, 1], [], []>} : vector<8x128xbf16>, vector<128x128xbf16>, vector<8x128xf32> -> vector<8x128xf32>
    %c0_167 = arith.constant 0 : index
    %c0_168 = arith.constant 0 : index
    %318 = vector.load %arg9[%c0_167, %c0_168] : memref<1x128xf32, #tpu.memory_space<vmem>>, vector<1x128xf32>
    %319 = vector.broadcast %318 : vector<1x128xf32> to vector<8x128xf32>
    %320 = arith.addf %317, %319 : vector<8x128xf32>
    %c0_169 = arith.constant 0 : index
    %c0_170 = arith.constant 0 : index
    %321 = vector.load %arg10[%c0_169, %c0_170] : memref<8x128xf32, #tpu.memory_space<vmem>>, vector<8x128xf32>
    tpu.vector_store %arg10[%c0_169, %c0_170], %320 {strides = array<i32>} : memref<8x128xf32, #tpu.memory_space<vmem>>, vector<8x128xf32>,
    return
  }
  func.func @transform_0(%arg0: i32) -> (i32, i32) {
    %c0_i32 = arith.constant 0 : i32
    %c0_i32_0 = arith.constant 0 : i32
    return %arg0, %c0_i32 : i32, i32
  }
  func.func @transform_1(%arg0: i32) -> (i32, i32) {
    %c0_i32 = arith.constant 0 : i32
    %c0_i32_0 = arith.constant 0 : i32
    %c0_i32_1 = arith.constant 0 : i32
    return %c0_i32, %c0_i32_0 : i32, i32
  }
  func.func @transform_2(%arg0: i32) -> (i32, i32) {
    %c0_i32 = arith.constant 0 : i32
    %c0_i32_0 = arith.constant 0 : i32
    %c0_i32_1 = arith.constant 0 : i32
    return %c0_i32, %c0_i32_0 : i32, i32
  }
  func.func @transform_3(%arg0: i32) -> (i32, i32) {
    %c0_i32 = arith.constant 0 : i32
    %c0_i32_0 = arith.constant 0 : i32
    %c0_i32_1 = arith.constant 0 : i32
    return %c0_i32, %c0_i32_0 : i32, i32
  }
  func.func @transform_4(%arg0: i32) -> (i32, i32) {
    %c0_i32 = arith.constant 0 : i32
    %c0_i32_0 = arith.constant 0 : i32
    %c0_i32_1 = arith.constant 0 : i32
    return %c0_i32, %c0_i32_0 : i32, i32
  }
  func.func @transform_5(%arg0: i32) -> (i32, i32, i32) {
    %c0_i32 = arith.constant 0 : i32
    %c0_i32_0 = arith.constant 0 : i32
    %c0_i32_1 = arith.constant 0 : i32
    %c0_i32_2 = arith.constant 0 : i32
    return %c0_i32, %c0_i32_0, %c0_i32_1 : i32, i32, i32
  }
  func.func @transform_6(%arg0: i32) -> (i32, i32) {
    %c0_i32 = arith.constant 0 : i32
    %c0_i32_0 = arith.constant 0 : i32
    %c0_i32_1 = arith.constant 0 : i32
    return %c0_i32, %c0_i32_0 : i32, i32
  }
  func.func @transform_7(%arg0: i32) -> (i32, i32) {
    %c0_i32 = arith.constant 0 : i32
    %c0_i32_0 = arith.constant 0 : i32
    %c0_i32_1 = arith.constant 0 : i32
    return %c0_i32, %c0_i32_0 : i32, i32
  }
  func.func @transform_8(%arg0: i32) -> (i32, i32) {
    %c0_i32 = arith.constant 0 : i32
    %c0_i32_0 = arith.constant 0 : i32
    %c0_i32_1 = arith.constant 0 : i32
    return %c0_i32, %c0_i32_0 : i32, i32
  }
  func.func @transform_9(%arg0: i32) -> (i32, i32) {
    %c0_i32 = arith.constant 0 : i32
    %c0_i32_0 = arith.constant 0 : i32
    return %arg0, %c0_i32 : i32, i32
  }
}

</mosaic_0001>

<bundles_post_ra>
// kernel: wrapper_mnist_forward.1
= control target key start
LH: loop header
LB: loop body
LE: loop exit
PB: predicated region body
PF: predicated region fallthrough
CT: control target
= control target key end

     0   :  { %v5876_v1 = vmov 0   ;;  %vm5878_vm0 = vmmov 0   ;;  %vm1443_vm1 = vcmask 261120   ;;  %s7098_s1 = inlined_call_operand.vmem [shape: bf16[256,256], index: 1, kind: input, shape index: {}]   ;;  %s7099_s0 = inlined_call_operand.vmem [shape: bf16[392,256], index: 0, kind: input, shape index: {}]   ;;  %s7100_s3 = inlined_call_operand.vmem [shape: bf16[256,32], index: 3, kind: input, shape index: {}]   ;;  %s7101_s5 = inlined_call_operand.vmem [shape: bf16[49,32,128], index: 5, kind: input, shape index: {}]   ;;  %s7102_s2 = inlined_call_operand.vmem [shape: f32[1,256], index: 2, kind: input, shape index: {}]   ;;  %s7103_s4 = inlined_call_operand.vmem [shape: f32[392,32], index: 4, kind: input, shape index: {}]   ;;  %s7104_s7 = inlined_call_operand.vmem [shape: bf16[128,128], index: 7, kind: input, shape index: {}]   ;;  %s7105_s6 = inlined_call_operand.vmem [shape: f32[1,128], index: 6, kind: input, shape index: {}]   ;;  %s7106_s8 = inlined_call_operand.vmem [shape: f32[1,128], index: 8, kind: input, shape index: {}]   ;;  %s7107_s9 = inlined_call_operand.vmem [shape: f32[8,128], index: 9, kind: output, shape index: {}]  }
   0x1   :  { %v5632_v0 = vld [vmem:[%s7098_s1 + $0x4] ss:$8 sps:$4 sm:$0xff]   ;;  %5597 = vmatprep.subr.bf16.mxu1 %v5876_v1  ;;  %v5634_v2 = vld [vmem:[%s7098_s1] ss:$8 sps:$4 sm:$0xff]   ;;  %v5635_v3 = vld [vmem:[%s7098_s1 + $0x14] ss:$8 sps:$4 sm:$0xff]  }
   0x2   :  { %533 = vmatprep.subr.bf16.mxu0 %v5632_v0  ;;  %v5637_v4 = vld [vmem:[%s7098_s1 + $0x10] ss:$8 sps:$4 sm:$0xff]   ;;  %v5638_v5 = vld [vmem:[%s7098_s1 + $0x24] ss:$8 sps:$4 sm:$0xff]   ;;  %v5640_v6 = vld [vmem:[%s7098_s1 + $0x20] ss:$8 sps:$4 sm:$0xff]  }
   0x3   :  { %534 = vmatpush1.bf16.msra.mxu0 %v5634_v2  ;;  %v5641_v7 = vld [vmem:[%s7098_s1 + $0x34] ss:$8 sps:$4 sm:$0xff]   ;;  %v5643_v8 = vld [vmem:[%s7098_s1 + $0x30] ss:$8 sps:$4 sm:$0xff]   ;;  %v5644_v9 = vld [vmem:[%s7098_s1 + $0x44] ss:$8 sps:$4 sm:$0xff]  }
   0x4   :  { %535 = vmatprep.subr.bf16.mxu0 %v5635_v3  ;;  %v5646_v10 = vld [vmem:[%s7098_s1 + $0x40] ss:$8 sps:$4 sm:$0xff]   ;;  %v5647_v11 = vld [vmem:[%s7098_s1 + $0x54] ss:$8 sps:$4 sm:$0xff]   ;;  %v5649_v12 = vld [vmem:[%s7098_s1 + $0x50] ss:$8 sps:$4 sm:$0xff]  }
   0x5   :  { %v5650_v13 = vld [vmem:[%s7098_s1 + $0x64] ss:$8 sps:$4 sm:$0xff]   ;;  %v5652_v15 = vld [vmem:[%s7098_s1 + $0x60] ss:$8 sps:$4 sm:$0xff]   ;;  %v5653_v16 = vld [vmem:[%s7098_s1 + $0x74] ss:$8 sps:$4 sm:$0xff]  }
   0x6   :  { %v5682_v14 = vld [vmem:[%s7099_s0 + $0x4] ss:$8 sps:$4 sm:$0xff]   ;;  %v5655_v18 = vld [vmem:[%s7098_s1 + $0x70] ss:$8 sps:$4 sm:$0xff]   ;;  %v5658_v21 = vld [vmem:[%s7098_s1 + $0x80] ss:$8 sps:$4 sm:$0xff]  }
   0x7   :  { %536 = vmatpush1.bf16.msra.mxu0 %v5637_v4  ;;  %565 = vmatprep.mubr.bf16.mxu0 %v5682_v14  ;;  %v5981_v17 = vld [vmem:[%s7100_s3] sm:$0xff]   ;;  %v5994_v20 = vld [vmem:[%s7100_s3 + $0x8] sm:$0xff]   ;;  %v5659_v22 = vld [vmem:[%s7098_s1 + $0x94] ss:$8 sps:$4 sm:$0xff]  }
   0x8   :  { %537 = vmatprep.subr.bf16.mxu0 %v5638_v5  ;;  %v5656_v19 = vld [vmem:[%s7098_s1 + $0x84] ss:$8 sps:$4 sm:$0xff]   ;;  %5613 = vmatpush1.bf16.msra.mxu1 %v5981_v17  ;;  %v6007_v23 = vld [vmem:[%s7100_s3 + $0x10] sm:$0xff]   ;;  %v5707_v26 = vld [vmem:[%s7100_s3 + $0x18] sm:$0xff]  }
   0x9   :  { %5598 = vmatprep.subr.bf16.mxu1 %v5876_v1  ;;  %v5661_v24 = vld [vmem:[%s7098_s1 + $0x90] ss:$8 sps:$4 sm:$0xff]   ;;  %v5662_v25 = vld [vmem:[%s7098_s1 + $0xa4] ss:$8 sps:$4 sm:$0xff]   ;;  %v5664_v27 = vld [vmem:[%s7098_s1 + $0xa0] ss:$8 sps:$4 sm:$0xff]  }
   0xa   :  { %v5665_v28 = vld [vmem:[%s7098_s1 + $0xb4] ss:$8 sps:$4 sm:$0xff]   ;;  %v5714_v29 = vld [vmem:[%s7100_s3 + $0x20] sm:$0xff]   ;;  %v5667_v30 = vld [vmem:[%s7098_s1 + $0xb0] ss:$8 sps:$4 sm:$0xff]  }
   0xb   :  { %538 = vmatpush1.bf16.msra.mxu0 %v5640_v6  ;;  %v5668_v31 = vld [vmem:[%s7098_s1 + $0xc4] ss:$8 sps:$4 sm:$0xff]   ;;  %v5670_v33 = vld [vmem:[%s7098_s1 + $0xc0] ss:$8 sps:$4 sm:$0xff]   ;;  %v5671_v34 = vld [vmem:[%s7098_s1 + $0xd4] ss:$8 sps:$4 sm:$0xff]  }
   0xc   :  { %539 = vmatprep.subr.bf16.mxu0 %v5641_v7  ;;  %5614 = vmatpush1.bf16.msra.mxu1 %v5994_v20  ;;  %v5718_v32 = vld [vmem:[%s7100_s3 + $0x28] sm:$0xff]   ;;  %v5673_v35 = vld [vmem:[%s7098_s1 + $0xd0] ss:$8 sps:$4 sm:$0xff]   ;;  %v5677_v40 = vld [vmem:[%s7098_s1 + $0xf4] ss:$8 sps:$4 sm:$0xff]  }
   0xd   :  { %5599 = vmatprep.subr.bf16.mxu1 %v5876_v1  ;;  %v5725_v36 = vld [vmem:[%s7100_s3 + $0x30] sm:$0xff]   ;;  %v5674_v37 = vld [vmem:[%s7098_s1 + $0xe4] ss:$8 sps:$4 sm:$0xff]   ;;  %v5729_v38 = vld [vmem:[%s7100_s3 + $0x38] sm:$0xff]  }
   0xe   :  { %v5676_v39 = vld [vmem:[%s7098_s1 + $0xe0] ss:$8 sps:$4 sm:$0xff]   ;;  %v5679_v42 = vld [vmem:[%s7098_s1 + $0xf0] ss:$8 sps:$4 sm:$0xff]   ;;  %v5683_v44 = vld [vmem:[%s7099_s0 + $0x14] ss:$8 sps:$4 sm:$0xff]  }
   0xf   :  { %540 = vmatpush1.bf16.msra.mxu0 %v5643_v8  ;;  %v5736_v41 = vld [vmem:[%s7100_s3 + $0x40] sm:$0xff]   ;;  %v5742_v45 = vld [vmem:[%s7100_s3 + $0x48] sm:$0xff]   ;;  %v5685_v46 = vld [vmem:[%s7099_s0 + $0x10] ss:$8 sps:$4 sm:$0xff]  }
  0x10   :  { %541 = vmatprep.subr.bf16.mxu0 %v5644_v9  ;;  %5615 = vmatpush1.bf16.msra.mxu1 %v6007_v23  ;;  %v5680_v43 = vld [vmem:[%s7099_s0] ss:$8 sps:$4 sm:$0xff]   ;;  %v5686_v47 = vld [vmem:[%s7099_s0 + $0x24] ss:$8 sps:$4 sm:$0xff]   ;;  %v5690_v49 = vld [vmem:[%s7099_s0 + $0x34] ss:$8 sps:$4 sm:$0xff]  }
  0x11   :  { %5600 = vmatprep.subr.bf16.mxu1 %v5876_v1  ;;  %v5688_v48 = vld [vmem:[%s7099_s0 + $0x20] ss:$8 sps:$4 sm:$0xff]   ;;  %v5747_v50 = vld [vmem:[%s7100_s3 + $0x50] sm:$0xff]   ;;  %v5693_v52 = vld [vmem:[%s7099_s0 + $0x44] ss:$8 sps:$4 sm:$0xff]  }
  0x12   :  { %v5692_v51 = vld [vmem:[%s7099_s0 + $0x30] ss:$8 sps:$4 sm:$0xff]   ;;  %v5695_v53 = vld [vmem:[%s7099_s0 + $0x40] ss:$8 sps:$4 sm:$0xff]   ;;  %v5697_v54 = vld [vmem:[%s7099_s0 + $0x54] ss:$8 sps:$4 sm:$0xff]  }
  0x13   :  { %542 = vmatpush1.bf16.msra.mxu0 %v5646_v10  ;;  %v5754_v55 = vld [vmem:[%s7100_s3 + $0x58] sm:$0xff]   ;;  %v5700_v57 = vld [vmem:[%s7099_s0 + $0x64] ss:$8 sps:$4 sm:$0xff]   ;;  %v5703_v59 = vld [vmem:[%s7099_s0 + $0x60] ss:$8 sps:$4 sm:$0xff]  }
  0x14   :  { %543 = vmatprep.subr.bf16.mxu0 %v5647_v11  ;;  %5616 = vmatpush1.bf16.msra.mxu1 %v5707_v26  ;;  %v5699_v56 = vld [vmem:[%s7099_s0 + $0x50] ss:$8 sps:$4 sm:$0xff]   ;;  %v5758_v58 = vld [vmem:[%s7100_s3 + $0x60] sm:$0xff]   ;;  %v5704_v60 = vld [vmem:[%s7099_s0 + $0x74] ss:$8 sps:$4 sm:$0xff]  }
  0x15   :  { %5601 = vmatprep.subr.bf16.mxu1 %v5876_v1  ;;  %v5706_v61 = vld [vmem:[%s7099_s0 + $0x70] ss:$8 sps:$4 sm:$0xff]   ;;  %v5708_v62 = vld [vmem:[%s7099_s0 + $0x84] ss:$8 sps:$4 sm:$0xff]   ;;  %v5710_v0 = vld [vmem:[%s7099_s0 + $0x80] ss:$8 sps:$4 sm:$0xff]  }
  0x16   :  { %v5765_v63 = vld [vmem:[%s7100_s3 + $0x68] sm:$0xff]   ;;  %v5711_v2 = vld [vmem:[%s7099_s0 + $0x94] ss:$8 sps:$4 sm:$0xff]   ;;  %v5713_v5 = vld [vmem:[%s7099_s0 + $0x90] ss:$8 sps:$4 sm:$0xff]  }
  0x17   :  { %544 = vmatpush1.bf16.msra.mxu0 %v5649_v12  ;;  %v5768_v3 = vld [vmem:[%s7100_s3 + $0x70] sm:$0xff]   ;;  %v5769_v4 = vld [vmem:[%s7100_s3 + $0x78] sm:$0xff]   ;;  %v5715_v6 = vld [vmem:[%s7099_s0 + $0xa4] ss:$8 sps:$4 sm:$0xff]  }
  0x18   :  { %545 = vmatprep.subr.bf16.mxu0 %v5650_v13  ;;  %5617 = vmatpush1.bf16.msra.mxu1 %v5714_v29  ;;  %v5717_v7 = vld [vmem:[%s7099_s0 + $0xa0] ss:$8 sps:$4 sm:$0xff]   ;;  %v5721_v8 = vld [vmem:[%s7099_s0 + $0xb0] ss:$8 sps:$4 sm:$0xff]   ;;  %v5722_v9 = vld [vmem:[%s7099_s0 + $0xc4] ss:$8 sps:$4 sm:$0xff]  }
  0x19   :  { %5602 = vmatprep.subr.bf16.mxu1 %v5876_v1  ;;  %v5724_v10 = vld [vmem:[%s7099_s0 + $0xc0] ss:$8 sps:$4 sm:$0xff]   ;;  %v5726_v11 = vld [vmem:[%s7099_s0 + $0xd4] ss:$8 sps:$4 sm:$0xff]   ;;  %v5728_v12 = vld [vmem:[%s7099_s0 + $0xd0] ss:$8 sps:$4 sm:$0xff]  }
  0x1a   :  { %v5730_v13 = vld [vmem:[%s7099_s0 + $0xe4] ss:$8 sps:$4 sm:$0xff]   ;;  %v5732_v14 = vld [vmem:[%s7099_s0 + $0xe0] ss:$8 sps:$4 sm:$0xff]  }
  0x1b   :  { %546 = vmatpush1.bf16.msra.mxu0 %v5652_v15  ;;  %v5733_v15 = vld [vmem:[%s7099_s0 + $0xf4] ss:$8 sps:$4 sm:$0xff]  }
  0x1c   :  { %547 = vmatprep.subr.bf16.mxu0 %v5653_v16  ;;  %5618 = vmatpush1.bf16.msra.mxu1 %v5718_v32  ;;  %v5735_v16 = vld [vmem:[%s7099_s0 + $0xf0] ss:$8 sps:$4 sm:$0xff]  }
  0x1d   :  { %5603 = vmatprep.subr.bf16.mxu1 %v5876_v1 }
  0x1f   :  { %548 = vmatpush1.bf16.msra.mxu0 %v5655_v18  ;;  %v5739_v18 = vld [vmem:[%s7099_s0 + $0x100] ss:$8 sps:$4 sm:$0xff]  }
  0x20   :  { %549 = vmatprep.subr.bf16.mxu0 %v5656_v19  ;;  %5619 = vmatpush1.bf16.msra.mxu1 %v5725_v36  ;;  %v5740_v19 = vld [vmem:[%s7099_s0 + $0x114] ss:$8 sps:$4 sm:$0xff]  }
  0x21   :  { %5604 = vmatprep.subr.bf16.mxu1 %v5876_v1 }
  0x23   :  { %550 = vmatpush1.bf16.msra.mxu0 %v5658_v21  ;;  %v5744_v21 = vld [vmem:[%s7099_s0 + $0x124] ss:$8 sps:$4 sm:$0xff]  }
  0x24   :  { %551 = vmatprep.subr.bf16.mxu0 %v5659_v22  ;;  %5620 = vmatpush1.bf16.msra.mxu1 %v5729_v38  ;;  %v5877_v22 = vmov 0.0  }
  0x25   :  { %5605 = vmatprep.subr.bf16.mxu1 %v5876_v1 }
  0x27   :  { %552 = vmatpush1.bf16.msra.mxu0 %v5661_v24  ;;  %v5748_v24 = vld [vmem:[%s7099_s0 + $0x134] ss:$8 sps:$4 sm:$0xff]  }
  0x28   :  { %553 = vmatprep.subr.bf16.mxu0 %v5662_v25  ;;  %5621 = vmatpush1.bf16.msra.mxu1 %v5736_v41  ;;  %v5750_v25 = vld [vmem:[%s7099_s0 + $0x130] ss:$8 sps:$4 sm:$0xff]  }
  0x29   :  { %5606 = vmatprep.subr.bf16.mxu1 %v5876_v1 }
  0x2b   :  { %554 = vmatpush1.bf16.msra.mxu0 %v5664_v27  ;;  %v5753_v27 = vld [vmem:[%s7099_s0 + $0x140] ss:$8 sps:$4 sm:$0xff]  }
  0x2c   :  { %555 = vmatprep.subr.bf16.mxu0 %v5665_v28  ;;  %5622 = vmatpush1.bf16.msra.mxu1 %v5742_v45  ;;  %v5755_v28 = vld [vmem:[%s7099_s0 + $0x154] ss:$8 sps:$4 sm:$0xff]  }
  0x2d   :  { %5607 = vmatprep.subr.bf16.mxu1 %v5876_v1 }
  0x2f   :  { %556 = vmatpush1.bf16.msra.mxu0 %v5667_v30  ;;  %v5759_v30 = vld [vmem:[%s7099_s0 + $0x164] ss:$8 sps:$4 sm:$0xff]  }
  0x30   :  { %557 = vmatprep.subr.bf16.mxu0 %v5668_v31  ;;  %5623 = vmatpush1.bf16.msra.mxu1 %v5747_v50  ;;  %v5761_v31 = vld [vmem:[%s7099_s0 + $0x160] ss:$8 sps:$4 sm:$0xff]  }
  0x31   :  { %5608 = vmatprep.subr.bf16.mxu1 %v5876_v1 }
  0x33   :  { %558 = vmatpush1.bf16.msra.mxu0 %v5670_v33  ;;  %v81_v33 = vld [vmem:[%s7099_s0 + $0x180] sm:$0xff] }
  0x34   :  { %559 = vmatprep.subr.bf16.mxu0 %v5671_v34  ;;  %5624 = vmatpush1.bf16.msra.mxu1 %v5754_v55  ;;  %v5764_v34 = vld [vmem:[%s7099_s0 + $0x170] ss:$8 sps:$4 sm:$0xff]  }
  0x35   :  { %5609 = vmatprep.subr.bf16.mxu1 %v5876_v1 }
  0x37   :  { %560 = vmatpush1.bf16.msra.mxu0 %v5673_v35  ;;  %v4631_v35 = vcombine.high %v81_v33, %v81_v33 }
  0x38   :  { %561 = vmatprep.subr.bf16.mxu0 %v5674_v37  ;;  %5625 = vmatpush1.bf16.msra.mxu1 %v5758_v58  ;;  %v116_v37 = vlaneseq }
  0x39   :  { %5610 = vmatprep.subr.bf16.mxu1 %v5876_v1 }
  0x3b   :  { %562 = vmatpush1.bf16.msra.mxu0 %v5676_v39 }
  0x3c   :  { %563 = vmatprep.subr.bf16.mxu0 %v5677_v40  ;;  %5626 = vmatpush1.bf16.msra.mxu1 %v5765_v63  ;;  %v114_v40 = vld [vmem:[%s7102_s2] sm:$0x3] }
  0x3d   :  { %5611 = vmatprep.subr.bf16.mxu1 %v5876_v1 }
  0x3f   :  { %564 = vmatpush1.bf16.msra.mxu0 %v5679_v42 }
  0x40   :  { %1139 = vmatprep.subr.bf16.mxu0 %v5876_v1  ;;  %5627 = vmatpush1.bf16.msra.mxu1 %v5768_v3 }
  0x41   :  { %5612 = vmatprep.subr.bf16.mxu1 %v5876_v1 }
  0x42   :  { %566 = vmatmul.mubr.bf16.vlgmr.msra.gmra.mrb[0].mxu0 %v5680_v43 }
  0x43   :  { %575 = vmatprep.mubr.bf16.mxu0 %v5683_v44  ;;  %1140 = vmatpush1.bf16.msra.mxu0 %v5981_v17  ;;  %v5737_v17 = vld [vmem:[%s7099_s0 + $0x104] ss:$8 sps:$4 sm:$0xff]  }
  0x44   :  { %1141 = vmatprep.subr.bf16.mxu0 %v5876_v1  ;;  %5628 = vmatpush1.bf16.msra.mxu1 %v5769_v4 }
  0x45   :  { %5193 = vmatprep.subr.bf16.mxu1 %v5877_v22 }
  0x47   :  { %1142 = vmatpush1.bf16.msra.mxu0 %v5994_v20  ;;  %v5743_v20 = vld [vmem:[%s7099_s0 + $0x110] ss:$8 sps:$4 sm:$0xff]  }
  0x48   :  { %1143 = vmatprep.subr.bf16.mxu0 %v5876_v1 }
  0x4a   :  { %576 = vmatmul.mubr.bf16.gmra.mrb[4].mxu0 %v5685_v46 }
  0x4b   :  { %585 = vmatprep.mubr.bf16.mxu0 %v5686_v47  ;;  %1144 = vmatpush1.bf16.msra.mxu0 %v6007_v23  ;;  %v5746_v23 = vld [vmem:[%s7099_s0 + $0x120] ss:$8 sps:$4 sm:$0xff]  }
  0x4c   :  { %1145 = vmatprep.subr.bf16.mxu0 %v5876_v1 }
  0x4f   :  { %1146 = vmatpush1.bf16.msra.mxu0 %v5707_v26  ;;  %v5751_v26 = vld [vmem:[%s7099_s0 + $0x144] ss:$8 sps:$4 sm:$0xff]  }
  0x50   :  { %1147 = vmatprep.subr.bf16.mxu0 %v5876_v1 }
  0x52   :  { %586 = vmatmul.mubr.bf16.gmra.mrb[8].mxu0 %v5688_v48 }
  0x53   :  { %595 = vmatprep.mubr.bf16.mxu0 %v5690_v49  ;;  %1148 = vmatpush1.bf16.msra.mxu0 %v5714_v29  ;;  %v5757_v29 = vld [vmem:[%s7099_s0 + $0x150] ss:$8 sps:$4 sm:$0xff]  }
  0x54   :  { %1149 = vmatprep.subr.bf16.mxu0 %v5876_v1 }
  0x57   :  { %1150 = vmatpush1.bf16.msra.mxu0 %v5718_v32  ;;  %v5762_v32 = vld [vmem:[%s7099_s0 + $0x174] ss:$8 sps:$4 sm:$0xff]  }
  0x58   :  { %1151 = vmatprep.subr.bf16.mxu0 %v5876_v1 }
  0x5a   :  { %596 = vmatmul.mubr.bf16.gmra.mrb[12].mxu0 %v5692_v51 }
  0x5b   :  { %605 = vmatprep.mubr.bf16.mxu0 %v5693_v52  ;;  %1152 = vmatpush1.bf16.msra.mxu0 %v5725_v36  ;;  %v4630_v36 = vcombine.low %v81_v33, %v81_v33 }
  0x5c   :  { %1153 = vmatprep.subr.bf16.mxu0 %v5876_v1 }
  0x5f   :  { %1154 = vmatpush1.bf16.msra.mxu0 %v5729_v38  ;;  %v117_v38 = vshrl.u32 %v116_v37, 7 }
  0x60   :  { %1155 = vmatprep.subr.bf16.mxu0 %v5876_v1 }
  0x61   :  { %v118_v39 = vsub.s32 0, %v117_v38 }
  0x62   :  { %606 = vmatmul.mubr.bf16.gmra.mrb[16].mxu0 %v5695_v53 }
  0x63   :  { %615 = vmatprep.mubr.bf16.mxu0 %v5697_v54  ;;  %1156 = vmatpush1.bf16.msra.mxu0 %v5736_v41  ;;  %v122_v41 = vsub.s32 1, %v117_v38  ;;  %v6269_v42 = vrot.slane %v114_v40, %v118_v39 }
  0x64   :  { %1157 = vmatprep.subr.bf16.mxu0 %v5876_v1 }
  0x65   :  { %v6271_v43 = vrot.slane %v114_v40, %v122_v41 }
  0x67   :  { %1158 = vmatpush1.bf16.msra.mxu0 %v5742_v45 }
  0x68   :  { %1159 = vmatprep.subr.bf16.mxu0 %v5876_v1 }
  0x6a   :  { %616 = vmatmul.mubr.bf16.gmra.mrb[20].mxu0 %v5699_v56 }
  0x6b   :  { %625 = vmatprep.mubr.bf16.mxu0 %v5700_v57  ;;  %1160 = vmatpush1.bf16.msra.mxu0 %v5747_v50 }
  0x6c   :  { %1161 = vmatprep.subr.bf16.mxu0 %v5876_v1 }
  0x6f   :  { %1162 = vmatpush1.bf16.msra.mxu0 %v5754_v55 }
  0x70   :  { %1163 = vmatprep.subr.bf16.mxu0 %v5876_v1 }
  0x72   :  { %626 = vmatmul.mubr.bf16.gmra.mrb[24].mxu0 %v5703_v59 }
  0x73   :  { %635 = vmatprep.mubr.bf16.mxu0 %v5704_v60  ;;  %1164 = vmatpush1.bf16.msra.mxu0 %v5758_v58 }
  0x74   :  { %1165 = vmatprep.subr.bf16.mxu0 %v5876_v1 }
  0x77   :  { %1166 = vmatpush1.bf16.msra.mxu0 %v5765_v63 }
  0x78   :  { %1167 = vmatprep.subr.bf16.mxu0 %v5876_v1 }
  0x7a   :  { %636 = vmatmul.mubr.bf16.gmra.mrb[28].mxu0 %v5706_v61 }
  0x7b   :  { %645 = vmatprep.mubr.bf16.mxu0 %v5708_v62  ;;  %1168 = vmatpush1.bf16.msra.mxu0 %v5768_v3 }
  0x7c   :  { %1169 = vmatprep.subr.bf16.mxu0 %v5876_v1  ;;  %v5719_v1 = vld [vmem:[%s7099_s0 + $0xb4] ss:$8 sps:$4 sm:$0xff]  }
  0x7f   :  { %1170 = vmatpush1.bf16.msra.mxu0 %v5769_v4 }
  0x80   :  { %5185 = vmatprep.subr.bf16.mxu0 %v5877_v22 }
  0x82   :  { %646 = vmatmul.mubr.bf16.gmra.mrb[32].mxu0 %v5710_v0 }
  0x83   :  { %655 = vmatprep.mubr.bf16.mxu0 %v5711_v2 }
  0x8a   :  { %656 = vmatmul.mubr.bf16.gmra.mrb[36].mxu0 %v5713_v5 }
  0x8b   :  { %665 = vmatprep.mubr.bf16.mxu0 %v5715_v6 }
  0x92   :  { %666 = vmatmul.mubr.bf16.gmra.mrb[40].mxu0 %v5717_v7 }
  0x93   :  { %675 = vmatprep.mubr.bf16.mxu0 %v5719_v1 }
  0x9a   :  { %676 = vmatmul.mubr.bf16.gmra.mrb[44].mxu0 %v5721_v8 }
  0x9b   :  { %685 = vmatprep.mubr.bf16.mxu0 %v5722_v9  ;;  %v5770_v9 = vld [vmem:[%s7101_s5] sm:$0xff]  }
  0xa2   :  { %686 = vmatmul.mubr.bf16.gmra.mrb[48].mxu0 %v5724_v10 }
  0xa3   :  { %695 = vmatprep.mubr.bf16.mxu0 %v5726_v11 }
  0xaa   :  { %696 = vmatmul.mubr.bf16.gmra.mrb[52].mxu0 %v5728_v12 }
  0xab   :  { %705 = vmatprep.mubr.bf16.mxu0 %v5730_v13 }
  0xb2   :  { %706 = vmatmul.mubr.bf16.gmra.mrb[56].mxu0 %v5732_v14 }
  0xb3   :  { %715 = vmatprep.mubr.bf16.mxu0 %v5733_v15 }
  0xba   :  { %716 = vmatmul.mubr.bf16.gmra.mrb[60].mxu0 %v5735_v16 }
  0xbb   :  { %725 = vmatprep.mubr.bf16.mxu0 %v5737_v17 }
  0xc2   :  { %726 = vmatmul.mubr.bf16.gmra.mrb[64].mxu0 %v5739_v18 }
  0xc3   :  { %735 = vmatprep.mubr.bf16.mxu0 %v5740_v19  ;;  %v5771_v19 = vld [vmem:[%s7101_s5 + $0x8] sm:$0xff]  }
  0xca   :  { %736 = vmatmul.mubr.bf16.gmra.mrb[68].mxu0 %v5743_v20 }
  0xcb   :  { %745 = vmatprep.mubr.bf16.mxu0 %v5744_v21 }
  0xd2   :  { %746 = vmatmul.mubr.bf16.gmra.mrb[72].mxu0 %v5746_v23 }
  0xd3   :  { %755 = vmatprep.mubr.bf16.mxu0 %v5748_v24 }
  0xda   :  { %756 = vmatmul.mubr.bf16.gmra.mrb[76].mxu0 %v5750_v25 }
  0xdb   :  { %765 = vmatprep.mubr.bf16.mxu0 %v5751_v26 }
  0xe2   :  { %766 = vmatmul.mubr.bf16.gmra.mrb[80].mxu0 %v5753_v27 }
  0xe3   :  { %775 = vmatprep.mubr.bf16.mxu0 %v5755_v28 }
  0xea   :  { %776 = vmatmul.mubr.bf16.gmra.mrb[84].mxu0 %v5757_v29 }
  0xeb   :  { %785 = vmatprep.mubr.bf16.mxu0 %v5759_v30 }
  0xf2   :  { %786 = vmatmul.mubr.bf16.gmra.mrb[88].mxu0 %v5761_v31 }
  0xf3   :  { %795 = vmatprep.mubr.bf16.mxu0 %v5762_v32 }
  0xfa   :  { %796 = vmatmul.mubr.bf16.gmra.mrb[92].mxu0 %v5764_v34 }
  0xfb   :  { %805 = vmatprep.mubr.bf16.mxu0 %v4631_v35 }
 0x102   :  { %806 = vmatmul.mubr.bf16.gmra.mrb[96].mxu0 %v4630_v36 }
 0x115   :  { %v567_v44 = vpop.f32.mrb[0].mxu0 }
 0x116   :  { %v568_v45 = vadd.f32 %v567_v44, %v6269_v42  ;;  %v569_v46 = vpop.f32.mrb[1].mxu0 }
 0x117   :  { %v570_v47 = vadd.f32 %v569_v46, %v6271_v43  ;;  %v571_v48 = vpop.f32.mrb[2].mxu0 }
 0x118   :  { %v572_v49 = vadd.f32 %v571_v48, %v6269_v42  ;;  %v573_v50 = vpop.f32.mrb[3].mxu0  ;;  %v814_v52 = vmax.f32 %v568_v45, 0.0 }
 0x119   :  { %v574_v51 = vadd.f32 %v573_v50, %v6271_v43  ;;  %v815_v54 = vmax.f32 %v570_v47, 0.0 }
 0x11a   :  { %v816_v53 = vmax.f32 %v572_v49, 0.0 }
 0x11b   :  { %v817_v55 = vmax.f32 %v574_v51, 0.0 }
 0x11c   :  { %v912_v56 = vpack.c.bf16 %v816_v53, %v814_v52 }
 0x11d   :  { %v913_v57 = vpack.c.bf16 %v817_v55, %v815_v54  ;;  %v577_v58 = vpop.f32.mrb[4].mxu0 }
 0x11e   :  { %v578_v59 = vadd.f32 %v577_v58, %v6269_v42  ;;  %v579_v60 = vpop.f32.mrb[5].mxu0 }
 0x11f   :  { %v580_v61 = vadd.f32 %v579_v60, %v6271_v43  ;;  %v581_v62 = vpop.f32.mrb[6].mxu0  ;;  %1171 = vmatprep.mubr.bf16.mxu0 %v913_v57 }
 0x120   :  { %v818_v63 = vmax.f32 %v578_v59, 0.0  ;;  %v582_v0 = vadd.f32 %v581_v62, %v6269_v42  ;;  %v583_v2 = vpop.f32.mrb[7].mxu0  ;;  %1172 = vmatmul.mubr.bf16.vlgmr.msra.gmra.mrb[100].mxu0 %v912_v56 }
 0x121   :  { %v819_v3 = vmax.f32 %v580_v61, 0.0  ;;  %v584_v4 = vadd.f32 %v583_v2, %v6271_v43  ;;  %5189 = vmatprep.mubr.msk.bf16.mxu0 %vm5878_vm0, %v5877_v22 }
 0x122   :  { %v820_v5 = vmax.f32 %v582_v0, 0.0 }
 0x123   :  { %v821_v6 = vmax.f32 %v584_v4, 0.0 }
 0x124   :  { %v914_v7 = vpack.c.bf16 %v820_v5, %v818_v63 }
 0x125   :  { %v587_v1 = vpop.f32.mrb[8].mxu0  ;;  %v915_v8 = vpack.c.bf16 %v821_v6, %v819_v3 }
 0x126   :  { %v588_v10 = vadd.f32 %v587_v1, %v6269_v42  ;;  %v589_v11 = vpop.f32.mrb[9].mxu0 }
 0x127   :  { %v590_v12 = vadd.f32 %v589_v11, %v6271_v43  ;;  %v591_v13 = vpop.f32.mrb[10].mxu0  ;;  %1179 = vmatprep.mubr.bf16.mxu1 %v915_v8 }
 0x128   :  { %v822_v14 = vmax.f32 %v588_v10, 0.0  ;;  %v592_v15 = vadd.f32 %v591_v13, %v6269_v42  ;;  %v593_v16 = vpop.f32.mrb[11].mxu0  ;;  %1180 = vmatmul.mubr.bf16.vlgmr.msra.gmra.mrb[0].mxu1 %v914_v7 }
 0x129   :  { %v823_v17 = vmax.f32 %v590_v12, 0.0  ;;  %v594_v18 = vadd.f32 %v593_v16, %v6271_v43  ;;  %5194 = vmatpush3.bf16.msra.mxu1 %v5770_v9 }
 0x12a   :  { %v824_v20 = vmax.f32 %v592_v15, 0.0  ;;  %5195 = vmatprep.subr.bf16.mxu1 %v5877_v22 }
 0x12b   :  { %v825_v21 = vmax.f32 %v594_v18, 0.0 }
 0x12c   :  { %v916_v23 = vpack.c.bf16 %v824_v20, %v822_v14 }
 0x12d   :  { %v917_v24 = vpack.c.bf16 %v825_v21, %v823_v17  ;;  %v597_v25 = vpop.f32.mrb[12].mxu0  ;;  %5196 = vmatpush3.bf16.msra.mxu1 %v5771_v19 }
 0x12e   :  { %v598_v26 = vadd.f32 %v597_v25, %v6269_v42  ;;  %v599_v27 = vpop.f32.mrb[13].mxu0  ;;  %5209 = vmatprep.subr.bf16.mxu1 %v5877_v22 }
 0x12f   :  { %v600_v28 = vadd.f32 %v599_v27, %v6271_v43  ;;  %v601_v29 = vpop.f32.mrb[14].mxu0  ;;  %1187 = vmatprep.mubr.bf16.mxu1 %v917_v24 }
 0x130   :  { %v826_v30 = vmax.f32 %v598_v26, 0.0  ;;  %v602_v31 = vadd.f32 %v601_v29, %v6269_v42  ;;  %v603_v32 = vpop.f32.mrb[15].mxu0  ;;  %1188 = vmatmul.mubr.bf16.gmra.mrb[4].mxu1 %v916_v23 }
 0x131   :  { %v827_v33 = vmax.f32 %v600_v28, 0.0  ;;  %v604_v34 = vadd.f32 %v603_v32, %v6271_v43 }
 0x132   :  { %v828_v35 = vmax.f32 %v602_v31, 0.0 }
 0x133   :  { %v829_v36 = vmax.f32 %v604_v34, 0.0 }
 0x134   :  { %v918_v37 = vpack.c.bf16 %v828_v35, %v826_v30 }
 0x135   :  { %v919_v38 = vpack.c.bf16 %v829_v36, %v827_v33  ;;  %v607_v39 = vpop.f32.mrb[16].mxu0 }
 0x136   :  { %v608_v40 = vadd.f32 %v607_v39, %v6269_v42  ;;  %v609_v41 = vpop.f32.mrb[17].mxu0 }
 0x137   :  { %v610_v44 = vadd.f32 %v609_v41, %v6271_v43  ;;  %v611_v45 = vpop.f32.mrb[18].mxu0  ;;  %1195 = vmatprep.mubr.bf16.mxu1 %v919_v38 }
 0x138   :  { %v830_v46 = vmax.f32 %v608_v40, 0.0  ;;  %v612_v47 = vadd.f32 %v611_v45, %v6269_v42  ;;  %v613_v48 = vpop.f32.mrb[19].mxu0  ;;  %1196 = vmatmul.mubr.bf16.gmra.mrb[8].mxu1 %v918_v37 }
 0x139   :  { %v831_v49 = vmax.f32 %v610_v44, 0.0  ;;  %v614_v50 = vadd.f32 %v613_v48, %v6271_v43 }
 0x13a   :  { %v832_v51 = vmax.f32 %v612_v47, 0.0 }
 0x13b   :  { %v833_v52 = vmax.f32 %v614_v50, 0.0 }
 0x13c   :  { %v920_v53 = vpack.c.bf16 %v832_v51, %v830_v46 }
 0x13d   :  { %v921_v54 = vpack.c.bf16 %v833_v52, %v831_v49  ;;  %v617_v55 = vpop.f32.mrb[20].mxu0 }
 0x13e   :  { %v618_v56 = vadd.f32 %v617_v55, %v6269_v42  ;;  %v619_v57 = vpop.f32.mrb[21].mxu0 }
 0x13f   :  { %v620_v58 = vadd.f32 %v619_v57, %v6271_v43  ;;  %v621_v59 = vpop.f32.mrb[22].mxu0  ;;  %1203 = vmatprep.mubr.bf16.mxu1 %v921_v54 }
 0x140   :  { %v834_v60 = vmax.f32 %v618_v56, 0.0  ;;  %v622_v61 = vadd.f32 %v621_v59, %v6269_v42  ;;  %v623_v62 = vpop.f32.mrb[23].mxu0  ;;  %1204 = vmatmul.mubr.bf16.gmra.mrb[12].mxu1 %v920_v53 }
 0x141   :  { %v835_v63 = vmax.f32 %v620_v58, 0.0  ;;  %v624_v0 = vadd.f32 %v623_v62, %v6271_v43 }
 0x142   :  { %v836_v2 = vmax.f32 %v622_v61, 0.0 }
 0x143   :  { %v837_v3 = vmax.f32 %v624_v0, 0.0 }
 0x144   :  { %v922_v4 = vpack.c.bf16 %v836_v2, %v834_v60 }
 0x145   :  { %v923_v5 = vpack.c.bf16 %v837_v3, %v835_v63  ;;  %v627_v6 = vpop.f32.mrb[24].mxu0 }
 0x146   :  { %v628_v7 = vadd.f32 %v627_v6, %v6269_v42  ;;  %v629_v1 = vpop.f32.mrb[25].mxu0 }
 0x147   :  { %v630_v8 = vadd.f32 %v629_v1, %v6271_v43  ;;  %v631_v9 = vpop.f32.mrb[26].mxu0  ;;  %1211 = vmatprep.mubr.bf16.mxu1 %v923_v5 }
 0x148   :  { %v838_v10 = vmax.f32 %v628_v7, 0.0  ;;  %v632_v11 = vadd.f32 %v631_v9, %v6269_v42  ;;  %v633_v12 = vpop.f32.mrb[27].mxu0  ;;  %1212 = vmatmul.mubr.bf16.gmra.mrb[16].mxu1 %v922_v4 }
 0x149   :  { %v839_v13 = vmax.f32 %v630_v8, 0.0  ;;  %v634_v14 = vadd.f32 %v633_v12, %v6271_v43 }
 0x14a   :  { %v840_v15 = vmax.f32 %v632_v11, 0.0 }
 0x14b   :  { %v841_v16 = vmax.f32 %v634_v14, 0.0 }
 0x14c   :  { %v924_v17 = vpack.c.bf16 %v840_v15, %v838_v10 }
 0x14d   :  { %v925_v18 = vpack.c.bf16 %v841_v16, %v839_v13  ;;  %v637_v19 = vpop.f32.mrb[28].mxu0 }
 0x14e   :  { %v638_v20 = vadd.f32 %v637_v19, %v6269_v42  ;;  %v639_v21 = vpop.f32.mrb[29].mxu0 }
 0x14f   :  { %v640_v23 = vadd.f32 %v639_v21, %v6271_v43  ;;  %v641_v24 = vpop.f32.mrb[30].mxu0  ;;  %1219 = vmatprep.mubr.bf16.mxu1 %v925_v18 }
 0x150   :  { %v842_v25 = vmax.f32 %v638_v20, 0.0  ;;  %v642_v26 = vadd.f32 %v641_v24, %v6269_v42  ;;  %v643_v27 = vpop.f32.mrb[31].mxu0  ;;  %1220 = vmatmul.mubr.bf16.gmra.mrb[20].mxu1 %v924_v17 }
 0x151   :  { %v843_v28 = vmax.f32 %v640_v23, 0.0  ;;  %v644_v29 = vadd.f32 %v643_v27, %v6271_v43  ;;  %v5772_v27 = vld [vmem:[%s7101_s5 + $0x10] sm:$0xff]  }
 0x152   :  { %v844_v30 = vmax.f32 %v642_v26, 0.0  ;;  %5186 = vmatpush3.bf16.msra.mxu0 %v5772_v27 }
 0x153   :  { %v845_v31 = vmax.f32 %v644_v29, 0.0  ;;  %5187 = vmatprep.subr.bf16.mxu0 %v5877_v22 }
 0x154   :  { %v926_v32 = vpack.c.bf16 %v844_v30, %v842_v25 }
 0x155   :  { %v927_v33 = vpack.c.bf16 %v845_v31, %v843_v28  ;;  %v647_v34 = vpop.f32.mrb[32].mxu0 }
 0x156   :  { %v648_v35 = vadd.f32 %v647_v34, %v6269_v42  ;;  %v649_v36 = vpop.f32.mrb[33].mxu0 }
 0x157   :  { %v650_v37 = vadd.f32 %v649_v36, %v6271_v43  ;;  %v651_v38 = vpop.f32.mrb[34].mxu0  ;;  %1227 = vmatprep.mubr.bf16.mxu1 %v927_v33 }
 0x158   :  { %v846_v39 = vmax.f32 %v648_v35, 0.0  ;;  %v652_v40 = vadd.f32 %v651_v38, %v6269_v42  ;;  %v653_v41 = vpop.f32.mrb[35].mxu0  ;;  %1228 = vmatmul.mubr.bf16.gmra.mrb[24].mxu1 %v926_v32  ;;  %v5773_v35 = vld [vmem:[%s7101_s5 + $0x18] sm:$0xff]  }
 0x159   :  { %v847_v44 = vmax.f32 %v650_v37, 0.0  ;;  %v654_v45 = vadd.f32 %v653_v41, %v6271_v43  ;;  %5188 = vmatpush3.bf16.msra.mxu0 %v5773_v35 }
 0x15a   :  { %v848_v46 = vmax.f32 %v652_v40, 0.0  ;;  %5201 = vmatprep.subr.bf16.mxu0 %v5877_v22 }
 0x15b   :  { %v849_v47 = vmax.f32 %v654_v45, 0.0 }
 0x15c   :  { %v928_v48 = vpack.c.bf16 %v848_v46, %v846_v39 }
 0x15d   :  { %v929_v49 = vpack.c.bf16 %v849_v47, %v847_v44  ;;  %v657_v50 = vpop.f32.mrb[36].mxu0 }
 0x15e   :  { %v658_v51 = vadd.f32 %v657_v50, %v6269_v42  ;;  %v659_v52 = vpop.f32.mrb[37].mxu0 }
 0x15f   :  { %v660_v53 = vadd.f32 %v659_v52, %v6271_v43  ;;  %v661_v54 = vpop.f32.mrb[38].mxu0  ;;  %1235 = vmatprep.mubr.bf16.mxu1 %v929_v49 }
 0x160   :  { %v850_v55 = vmax.f32 %v658_v51, 0.0  ;;  %v662_v56 = vadd.f32 %v661_v54, %v6269_v42  ;;  %v663_v57 = vpop.f32.mrb[39].mxu0  ;;  %1236 = vmatmul.mubr.bf16.gmra.mrb[28].mxu1 %v928_v48 }
 0x161   :  { %v851_v58 = vmax.f32 %v660_v53, 0.0  ;;  %v664_v59 = vadd.f32 %v663_v57, %v6271_v43 }
 0x162   :  { %v852_v60 = vmax.f32 %v662_v56, 0.0 }
 0x163   :  { %v853_v61 = vmax.f32 %v664_v59, 0.0 }
 0x164   :  { %v930_v62 = vpack.c.bf16 %v852_v60, %v850_v55 }
 0x165   :  { %v931_v63 = vpack.c.bf16 %v853_v61, %v851_v58  ;;  %v667_v0 = vpop.f32.mrb[40].mxu0 }
 0x166   :  { %v668_v2 = vadd.f32 %v667_v0, %v6269_v42  ;;  %v669_v3 = vpop.f32.mrb[41].mxu0 }
 0x167   :  { %v670_v4 = vadd.f32 %v669_v3, %v6271_v43  ;;  %v671_v5 = vpop.f32.mrb[42].mxu0  ;;  %1243 = vmatprep.mubr.bf16.mxu1 %v931_v63 }
 0x168   :  { %v854_v6 = vmax.f32 %v668_v2, 0.0  ;;  %v672_v7 = vadd.f32 %v671_v5, %v6269_v42  ;;  %v673_v1 = vpop.f32.mrb[43].mxu0  ;;  %1244 = vmatmul.mubr.bf16.gmra.mrb[32].mxu1 %v930_v62 }
 0x169   :  { %v855_v8 = vmax.f32 %v670_v4, 0.0  ;;  %v674_v9 = vadd.f32 %v673_v1, %v6271_v43 }
 0x16a   :  { %v856_v10 = vmax.f32 %v672_v7, 0.0 }
 0x16b   :  { %v857_v11 = vmax.f32 %v674_v9, 0.0 }
 0x16c   :  { %v932_v12 = vpack.c.bf16 %v856_v10, %v854_v6 }
 0x16d   :  { %v933_v13 = vpack.c.bf16 %v857_v11, %v855_v8  ;;  %v677_v14 = vpop.f32.mrb[44].mxu0 }
 0x16e   :  { %v678_v15 = vadd.f32 %v677_v14, %v6269_v42  ;;  %v679_v16 = vpop.f32.mrb[45].mxu0 }
 0x16f   :  { %v680_v17 = vadd.f32 %v679_v16, %v6271_v43  ;;  %v681_v18 = vpop.f32.mrb[46].mxu0  ;;  %1251 = vmatprep.mubr.bf16.mxu1 %v933_v13 }
 0x170   :  { %v858_v19 = vmax.f32 %v678_v15, 0.0  ;;  %v682_v20 = vadd.f32 %v681_v18, %v6269_v42  ;;  %v683_v21 = vpop.f32.mrb[47].mxu0  ;;  %1252 = vmatmul.mubr.bf16.gmra.mrb[36].mxu1 %v932_v12 }
 0x171   :  { %v859_v23 = vmax.f32 %v680_v17, 0.0  ;;  %v684_v24 = vadd.f32 %v683_v21, %v6271_v43 }
 0x172   :  { %v860_v25 = vmax.f32 %v682_v20, 0.0 }
 0x173   :  { %v861_v26 = vmax.f32 %v684_v24, 0.0 }
 0x174   :  { %v934_v28 = vpack.c.bf16 %v860_v25, %v858_v19 }
 0x175   :  { %v935_v29 = vpack.c.bf16 %v861_v26, %v859_v23  ;;  %v687_v30 = vpop.f32.mrb[48].mxu0 }
 0x176   :  { %v688_v31 = vadd.f32 %v687_v30, %v6269_v42  ;;  %v689_v32 = vpop.f32.mrb[49].mxu0 }
 0x177   :  { %v690_v33 = vadd.f32 %v689_v32, %v6271_v43  ;;  %v691_v34 = vpop.f32.mrb[50].mxu0  ;;  %1259 = vmatprep.mubr.bf16.mxu1 %v935_v29 }
 0x178   :  { %v862_v36 = vmax.f32 %v688_v31, 0.0  ;;  %v692_v37 = vadd.f32 %v691_v34, %v6269_v42  ;;  %v693_v38 = vpop.f32.mrb[51].mxu0  ;;  %1260 = vmatmul.mubr.bf16.gmra.mrb[40].mxu1 %v934_v28 }
 0x179   :  { %v863_v39 = vmax.f32 %v690_v33, 0.0  ;;  %v694_v40 = vadd.f32 %v693_v38, %v6271_v43 }
 0x17a   :  { %v864_v41 = vmax.f32 %v692_v37, 0.0 }
 0x17b   :  { %v865_v44 = vmax.f32 %v694_v40, 0.0 }
 0x17c   :  { %v936_v45 = vpack.c.bf16 %v864_v41, %v862_v36 }
 0x17d   :  { %v937_v46 = vpack.c.bf16 %v865_v44, %v863_v39  ;;  %v697_v47 = vpop.f32.mrb[52].mxu0 }
 0x17e   :  { %v698_v48 = vadd.f32 %v697_v47, %v6269_v42  ;;  %v699_v49 = vpop.f32.mrb[53].mxu0 }
 0x17f   :  { %v700_v50 = vadd.f32 %v699_v49, %v6271_v43  ;;  %v701_v51 = vpop.f32.mrb[54].mxu0  ;;  %1267 = vmatprep.mubr.bf16.mxu1 %v937_v46 }
 0x180   :  { %v866_v52 = vmax.f32 %v698_v48, 0.0  ;;  %v702_v53 = vadd.f32 %v701_v51, %v6269_v42  ;;  %v703_v54 = vpop.f32.mrb[55].mxu0  ;;  %1268 = vmatmul.mubr.bf16.gmra.mrb[44].mxu1 %v936_v45 }
 0x181   :  { %v867_v55 = vmax.f32 %v700_v50, 0.0  ;;  %v704_v56 = vadd.f32 %v703_v54, %v6271_v43 }
 0x182   :  { %v868_v57 = vmax.f32 %v702_v53, 0.0 }
 0x183   :  { %v869_v58 = vmax.f32 %v704_v56, 0.0 }
 0x184   :  { %v938_v59 = vpack.c.bf16 %v868_v57, %v866_v52 }
 0x185   :  { %v939_v60 = vpack.c.bf16 %v869_v58, %v867_v55  ;;  %v707_v61 = vpop.f32.mrb[56].mxu0 }
 0x186   :  { %v708_v62 = vadd.f32 %v707_v61, %v6269_v42  ;;  %v709_v63 = vpop.f32.mrb[57].mxu0 }
 0x187   :  { %v710_v0 = vadd.f32 %v709_v63, %v6271_v43  ;;  %v711_v2 = vpop.f32.mrb[58].mxu0  ;;  %1275 = vmatprep.mubr.bf16.mxu1 %v939_v60 }
 0x188   :  { %v870_v3 = vmax.f32 %v708_v62, 0.0  ;;  %v712_v4 = vadd.f32 %v711_v2, %v6269_v42  ;;  %v713_v5 = vpop.f32.mrb[59].mxu0  ;;  %1276 = vmatmul.mubr.bf16.gmra.mrb[48].mxu1 %v938_v59 }
 0x189   :  { %v871_v6 = vmax.f32 %v710_v0, 0.0  ;;  %v714_v7 = vadd.f32 %v713_v5, %v6271_v43 }
 0x18a   :  { %v872_v1 = vmax.f32 %v712_v4, 0.0 }
 0x18b   :  { %v873_v8 = vmax.f32 %v714_v7, 0.0 }
 0x18c   :  { %v940_v9 = vpack.c.bf16 %v872_v1, %v870_v3 }
 0x18d   :  { %v941_v10 = vpack.c.bf16 %v873_v8, %v871_v6  ;;  %v717_v11 = vpop.f32.mrb[60].mxu0 }
 0x18e   :  { %v718_v12 = vadd.f32 %v717_v11, %v6269_v42  ;;  %v719_v13 = vpop.f32.mrb[61].mxu0 }
 0x18f   :  { %v720_v14 = vadd.f32 %v719_v13, %v6271_v43  ;;  %v721_v15 = vpop.f32.mrb[62].mxu0  ;;  %1283 = vmatprep.mubr.bf16.mxu1 %v941_v10 }
 0x190   :  { %v874_v16 = vmax.f32 %v718_v12, 0.0  ;;  %v722_v17 = vadd.f32 %v721_v15, %v6269_v42  ;;  %v723_v18 = vpop.f32.mrb[63].mxu0  ;;  %1284 = vmatmul.mubr.bf16.gmra.mrb[52].mxu1 %v940_v9 }
 0x191   :  { %v875_v19 = vmax.f32 %v720_v14, 0.0  ;;  %v724_v20 = vadd.f32 %v723_v18, %v6271_v43 }
 0x192   :  { %v876_v21 = vmax.f32 %v722_v17, 0.0 }
 0x193   :  { %v877_v23 = vmax.f32 %v724_v20, 0.0 }
 0x194   :  { %v942_v24 = vpack.c.bf16 %v876_v21, %v874_v16 }
 0x195   :  { %v943_v25 = vpack.c.bf16 %v877_v23, %v875_v19  ;;  %v727_v26 = vpop.f32.mrb[64].mxu0 }
 0x196   :  { %v728_v27 = vadd.f32 %v727_v26, %v6269_v42  ;;  %v729_v28 = vpop.f32.mrb[65].mxu0 }
 0x197   :  { %v730_v29 = vadd.f32 %v729_v28, %v6271_v43  ;;  %v731_v30 = vpop.f32.mrb[66].mxu0  ;;  %1291 = vmatprep.mubr.bf16.mxu1 %v943_v25 }
 0x198   :  { %v878_v31 = vmax.f32 %v728_v27, 0.0  ;;  %v732_v32 = vadd.f32 %v731_v30, %v6269_v42  ;;  %v733_v33 = vpop.f32.mrb[67].mxu0  ;;  %1292 = vmatmul.mubr.bf16.gmra.mrb[56].mxu1 %v942_v24 }
 0x199   :  { %v879_v34 = vmax.f32 %v730_v29, 0.0  ;;  %v734_v35 = vadd.f32 %v733_v33, %v6271_v43 }
 0x19a   :  { %v880_v36 = vmax.f32 %v732_v32, 0.0 }
 0x19b   :  { %v881_v37 = vmax.f32 %v734_v35, 0.0 }
 0x19c   :  { %v944_v38 = vpack.c.bf16 %v880_v36, %v878_v31 }
 0x19d   :  { %v945_v39 = vpack.c.bf16 %v881_v37, %v879_v34  ;;  %v737_v40 = vpop.f32.mrb[68].mxu0 }
 0x19e   :  { %v738_v41 = vadd.f32 %v737_v40, %v6269_v42  ;;  %v739_v44 = vpop.f32.mrb[69].mxu0 }
 0x19f   :  { %v740_v45 = vadd.f32 %v739_v44, %v6271_v43  ;;  %v741_v46 = vpop.f32.mrb[70].mxu0  ;;  %1299 = vmatprep.mubr.bf16.mxu1 %v945_v39 }
 0x1a0   :  { %v882_v47 = vmax.f32 %v738_v41, 0.0  ;;  %v742_v48 = vadd.f32 %v741_v46, %v6269_v42  ;;  %v743_v49 = vpop.f32.mrb[71].mxu0  ;;  %1300 = vmatmul.mubr.bf16.gmra.mrb[60].mxu1 %v944_v38 }
 0x1a1   :  { %v883_v50 = vmax.f32 %v740_v45, 0.0  ;;  %v744_v51 = vadd.f32 %v743_v49, %v6271_v43 }
 0x1a2   :  { %v884_v52 = vmax.f32 %v742_v48, 0.0 }
 0x1a3   :  { %v885_v53 = vmax.f32 %v744_v51, 0.0 }
 0x1a4   :  { %v946_v54 = vpack.c.bf16 %v884_v52, %v882_v47 }
 0x1a5   :  { %v947_v55 = vpack.c.bf16 %v885_v53, %v883_v50  ;;  %v747_v56 = vpop.f32.mrb[72].mxu0 }
 0x1a6   :  { %v748_v57 = vadd.f32 %v747_v56, %v6269_v42  ;;  %v749_v58 = vpop.f32.mrb[73].mxu0 }
 0x1a7   :  { %v750_v59 = vadd.f32 %v749_v58, %v6271_v43  ;;  %v751_v60 = vpop.f32.mrb[74].mxu0  ;;  %1307 = vmatprep.mubr.bf16.mxu1 %v947_v55 }
 0x1a8   :  { %v886_v61 = vmax.f32 %v748_v57, 0.0  ;;  %v752_v62 = vadd.f32 %v751_v60, %v6269_v42  ;;  %v753_v63 = vpop.f32.mrb[75].mxu0  ;;  %1308 = vmatmul.mubr.bf16.gmra.mrb[64].mxu1 %v946_v54 }
 0x1a9   :  { %v887_v0 = vmax.f32 %v750_v59, 0.0  ;;  %v754_v2 = vadd.f32 %v753_v63, %v6271_v43 }
 0x1aa   :  { %v888_v3 = vmax.f32 %v752_v62, 0.0 }
 0x1ab   :  { %v889_v4 = vmax.f32 %v754_v2, 0.0 }
 0x1ac   :  { %v948_v5 = vpack.c.bf16 %v888_v3, %v886_v61 }
 0x1ad   :  { %v949_v6 = vpack.c.bf16 %v889_v4, %v887_v0  ;;  %v757_v7 = vpop.f32.mrb[76].mxu0 }
 0x1ae   :  { %v758_v1 = vadd.f32 %v757_v7, %v6269_v42  ;;  %v759_v8 = vpop.f32.mrb[77].mxu0 }
 0x1af   :  { %v760_v9 = vadd.f32 %v759_v8, %v6271_v43  ;;  %v761_v10 = vpop.f32.mrb[78].mxu0  ;;  %1315 = vmatprep.mubr.bf16.mxu1 %v949_v6 }
 0x1b0   :  { %v890_v11 = vmax.f32 %v758_v1, 0.0  ;;  %v762_v12 = vadd.f32 %v761_v10, %v6269_v42  ;;  %v763_v13 = vpop.f32.mrb[79].mxu0  ;;  %1316 = vmatmul.mubr.bf16.gmra.mrb[68].mxu1 %v948_v5 }
 0x1b1   :  { %v891_v14 = vmax.f32 %v760_v9, 0.0  ;;  %v764_v15 = vadd.f32 %v763_v13, %v6271_v43 }
 0x1b2   :  { %v892_v16 = vmax.f32 %v762_v12, 0.0 }
 0x1b3   :  { %v893_v17 = vmax.f32 %v764_v15, 0.0 }
 0x1b4   :  { %v950_v18 = vpack.c.bf16 %v892_v16, %v890_v11 }
 0x1b5   :  { %v951_v19 = vpack.c.bf16 %v893_v17, %v891_v14  ;;  %v767_v20 = vpop.f32.mrb[80].mxu0 }
 0x1b6   :  { %v768_v21 = vadd.f32 %v767_v20, %v6269_v42  ;;  %v769_v23 = vpop.f32.mrb[81].mxu0 }
 0x1b7   :  { %v770_v24 = vadd.f32 %v769_v23, %v6271_v43  ;;  %v771_v25 = vpop.f32.mrb[82].mxu0  ;;  %1323 = vmatprep.mubr.bf16.mxu1 %v951_v19 }
 0x1b8   :  { %v894_v26 = vmax.f32 %v768_v21, 0.0  ;;  %v772_v27 = vadd.f32 %v771_v25, %v6269_v42  ;;  %v773_v28 = vpop.f32.mrb[83].mxu0  ;;  %1324 = vmatmul.mubr.bf16.gmra.mrb[72].mxu1 %v950_v18 }
 0x1b9   :  { %v895_v29 = vmax.f32 %v770_v24, 0.0  ;;  %v774_v30 = vadd.f32 %v773_v28, %v6271_v43 }
 0x1ba   :  { %v896_v31 = vmax.f32 %v772_v27, 0.0 }
 0x1bb   :  { %v897_v32 = vmax.f32 %v774_v30, 0.0 }
 0x1bc   :  { %v952_v33 = vpack.c.bf16 %v896_v31, %v894_v26 }
 0x1bd   :  { %v953_v34 = vpack.c.bf16 %v897_v32, %v895_v29  ;;  %v777_v35 = vpop.f32.mrb[84].mxu0 }
 0x1be   :  { %v778_v36 = vadd.f32 %v777_v35, %v6269_v42  ;;  %v779_v37 = vpop.f32.mrb[85].mxu0 }
 0x1bf   :  { %v780_v38 = vadd.f32 %v779_v37, %v6271_v43  ;;  %v781_v39 = vpop.f32.mrb[86].mxu0  ;;  %1331 = vmatprep.mubr.bf16.mxu1 %v953_v34  ;;  %v5774_v37 = vld [vmem:[%s7101_s5 + $0x20] sm:$0xff]  }
 0x1c0   :  { %v898_v40 = vmax.f32 %v778_v36, 0.0  ;;  %v782_v41 = vadd.f32 %v781_v39, %v6269_v42  ;;  %v783_v44 = vpop.f32.mrb[87].mxu0  ;;  %1332 = vmatmul.mubr.bf16.gmra.mrb[76].mxu1 %v952_v33  ;;  %v5775_v33 = vld [vmem:[%s7101_s5 + $0x30] sm:$0xff]  }
 0x1c1   :  { %v899_v45 = vmax.f32 %v780_v38, 0.0  ;;  %v784_v46 = vadd.f32 %v783_v44, %v6271_v43  ;;  %v996_v36 = vld [vmem:[%s7103_s4 + $0x10] sm:$0xff] }
 0x1c2   :  { %v900_v47 = vmax.f32 %v782_v41, 0.0  ;;  %v5777_v41 = vld [vmem:[%s7101_s5 + $0x38] sm:$0xff]  }
 0x1c3   :  { %v901_v48 = vmax.f32 %v784_v46, 0.0 }
 0x1c4   :  { %v954_v49 = vpack.c.bf16 %v900_v47, %v898_v40  ;;  %v997_v40 = vld [vmem:[%s7103_s4 + $0x18] sm:$0xff]  ;;  %v5776_v47 = vld [vmem:[%s7101_s5 + $0x28] sm:$0xff]  }
 0x1c5   :  { %v955_v50 = vpack.c.bf16 %v901_v48, %v899_v45  ;;  %v787_v51 = vpop.f32.mrb[88].mxu0 }
 0x1c6   :  { %v788_v52 = vadd.f32 %v787_v51, %v6269_v42  ;;  %v789_v53 = vpop.f32.mrb[89].mxu0 }
 0x1c7   :  { %v790_v54 = vadd.f32 %v789_v53, %v6271_v43  ;;  %v791_v55 = vpop.f32.mrb[90].mxu0  ;;  %1339 = vmatprep.mubr.bf16.mxu1 %v955_v50  ;;  %v5778_v53 = vld [vmem:[%s7101_s5 + $0x40] sm:$0xff]  }
 0x1c8   :  { %v902_v56 = vmax.f32 %v788_v52, 0.0  ;;  %v792_v57 = vadd.f32 %v791_v55, %v6269_v42  ;;  %v793_v58 = vpop.f32.mrb[91].mxu0  ;;  %1340 = vmatmul.mubr.bf16.gmra.mrb[80].mxu1 %v954_v49  ;;  %v998_v52 = vld [vmem:[%s7103_s4 + $0x20] sm:$0xff] }
 0x1c9   :  { %v903_v59 = vmax.f32 %v790_v54, 0.0  ;;  %v794_v60 = vadd.f32 %v793_v58, %v6271_v43  ;;  %v5779_v54 = vld [vmem:[%s7101_s5 + $0x50] sm:$0xff]   ;;  %v999_v58 = vld [vmem:[%s7103_s4 + $0x28] sm:$0xff] }
 0x1ca   :  { %v904_v61 = vmax.f32 %v792_v57, 0.0 }
 0x1cb   :  { %v905_v62 = vmax.f32 %v794_v60, 0.0 }
 0x1cc   :  { %v956_v63 = vpack.c.bf16 %v904_v61, %v902_v56 }
 0x1cd   :  { %v957_v0 = vpack.c.bf16 %v905_v62, %v903_v59  ;;  %v797_v2 = vpop.f32.mrb[92].mxu0  ;;  %v5780_v62 = vld [vmem:[%s7101_s5 + $0x48] sm:$0xff]  }
 0x1ce   :  { %v798_v3 = vadd.f32 %v797_v2, %v6269_v42  ;;  %v799_v4 = vpop.f32.mrb[93].mxu0 }
 0x1cf   :  { %v800_v5 = vadd.f32 %v799_v4, %v6271_v43  ;;  %v801_v6 = vpop.f32.mrb[94].mxu0  ;;  %1347 = vmatprep.mubr.bf16.mxu1 %v957_v0 }
 0x1d0   :  { %v906_v7 = vmax.f32 %v798_v3, 0.0  ;;  %v802_v1 = vadd.f32 %v801_v6, %v6269_v42  ;;  %v803_v8 = vpop.f32.mrb[95].mxu0  ;;  %1348 = vmatmul.mubr.bf16.gmra.mrb[84].mxu1 %v956_v63  ;;  %v5781_v63 = vld [vmem:[%s7101_s5 + $0x58] sm:$0xff]   ;;  %v5782_v6 = vld [vmem:[%s7101_s5 + $0x60] sm:$0xff]  }
 0x1d1   :  { %v907_v9 = vmax.f32 %v800_v5, 0.0  ;;  %v804_v10 = vadd.f32 %v803_v8, %v6271_v43  ;;  %v1000_v5 = vld [vmem:[%s7103_s4 + $0x30] sm:$0xff] }
 0x1d2   :  { %v908_v11 = vmax.f32 %v802_v1, 0.0 }
 0x1d3   :  { %v909_v12 = vmax.f32 %v804_v10, 0.0  ;;  %v1001_v10 = vld [vmem:[%s7103_s4 + $0x38] sm:$0xff] }
 0x1d4   :  { %v958_v13 = vpack.c.bf16 %v908_v11, %v906_v7  ;;  %v5783_v7 = vld [vmem:[%s7101_s5 + $0x70] sm:$0xff]  }
 0x1d5   :  { %v959_v14 = vpack.c.bf16 %v909_v12, %v907_v9  ;;  %v807_v15 = vpop.f32.mrb[96].mxu0 }
 0x1d6   :  { %v808_v16 = vadd.f32 %v807_v15, %v6269_v42  ;;  %v809_v17 = vpop.f32.mrb[97].mxu0  ;;  %v994_v42 = vld [vmem:[%s7103_s4] sm:$0xff]  ;;  %v5785_v15 = vld [vmem:[%s7101_s5 + $0x78] sm:$0xff]  }
 0x1d7   :  { %v810_v18 = vadd.f32 %v809_v17, %v6271_v43  ;;  %1355 = vmatprep.mubr.bf16.mxu1 %v959_v14  ;;  %v811_v19 = vpop.f32.mrb[98].mxu0  ;;  %v995_v43 = vld [vmem:[%s7103_s4 + $0x8] sm:$0xff] }
 0x1d8   :  { %v910_v20 = vmax.f32 %v808_v16, 0.0  ;;  %1356 = vmatmul.mubr.bf16.gmra.mrb[88].mxu1 %v958_v13  ;;  %v812_v21 = vpop.f32.mrb[99].mxu0  ;;  %v5784_v14 = vld [vmem:[%s7101_s5 + $0x68] sm:$0xff]  }
 0x1d9   :  { %v911_v23 = vmax.f32 %v810_v18, 0.0  ;;  %v5786_v21 = vld [vmem:[%s7101_s5 + $0x80] sm:$0xff]  }
 0x1da   :  { %v960_v25 = vpack.c.bf16 %v910_v20, %v910_v20  ;;  %v1002_v20 = vld [vmem:[%s7103_s4 + $0x40] sm:$0xff] }
 0x1db   :  { %v961_v24 = vpack.c.bf16 %v911_v23, %v911_v23  ;;  %v5787_v23 = vld [vmem:[%s7101_s5 + $0x90] sm:$0xff]  }
 0x1dd   :  { %1363 = vmatprep.mubr.bf16.mxu1 %v961_v24 }
 0x1e0   :  { %1364 = vmatmul.mubr.bf16.gmra.mrb[92].mxu1 %v960_v25 }
 0x1e1   :  { %5197 = vmatprep.mubr.msk.bf16.mxu1 %vm5878_vm0, %v5877_v22 }
 0x1f3   :  { %v1173_v26 = vpop.f32.mrb[100].mxu0 }
 0x1f4   :  { %v1174_v27 = vadd.f32 %v1173_v26, %v994_v42  ;;  %v1175_v28 = vpop.f32.mrb[101].mxu0  ;;  %v1003_v26 = vld [vmem:[%s7103_s4 + $0x48] sm:$0xff] }
 0x1f5   :  { %v1176_v29 = vpop.f32.mrb[102].mxu0 }
 0x1f6   :  { %v1371_v30 = vmax.f32 %v1174_v27, 0.0  ;;  %v1177_v31 = vadd.f32 %v1176_v29, %v995_v43  ;;  %v1178_v32 = vpop.f32.mrb[103].mxu0  ;;  %v5788_v29 = vld [vmem:[%s7101_s5 + $0x88] sm:$0xff]  }
 0x1f8   :  { %v1420_v34 = vpack.c.bf16 %v1371_v30, %v1371_v30  ;;  %v1372_v35 = vmax.f32 %v1177_v31, 0.0  ;;  %v5789_v30 = vld [vmem:[%s7101_s5 + $0x98] sm:$0xff]  }
 0x1fa   :  { %v1425_v38 = vpack.c.bf16 %v1372_v35, %v1372_v35  ;;  %5198 = vmatmul.mubr.msk.bf16.vlgmr.msra.gmra.mrb[96].mxu1 %vm1443_vm1, %v1420_v34  ;;  %v1004_v35 = vld [vmem:[%s7103_s4 + $0x50] sm:$0xff] }
 0x1fb   :  { %v1181_v39 = vpop.f32.mrb[0].mxu1  ;;  %5210 = vmatpush3.bf16.msra.mxu1 %v5775_v33  ;;  %5213 = vmatprep.mubr.msk.bf16.mxu1 %vm5878_vm0, %v5877_v22 }
 0x1fc   :  { %v1182_v44 = vadd.f32 %v1181_v39, %v996_v36  ;;  %v1183_v45 = vpop.f32.mrb[1].mxu1  ;;  %5190 = vmatmul.mubr.msk.bf16.vlgmr.msra.gmra.mrb[104].mxu0 %vm1443_vm1, %v1425_v38  ;;  %5211 = vmatprep.subr.bf16.mxu1 %v5877_v22  ;;  %v5790_v36 = vld [vmem:[%s7101_s5 + $0xa0] sm:$0xff]  }
 0x1fd   :  { %5202 = vmatpush3.bf16.msra.mxu0 %v5774_v37  ;;  %v1184_v46 = vpop.f32.mrb[2].mxu1  ;;  %5205 = vmatprep.mubr.msk.bf16.mxu0 %vm5878_vm0, %v5877_v22  ;;  %v5791_v37 = vld [vmem:[%s7101_s5 + $0xb0] sm:$0xff]  }
 0x1fe   :  { %v1373_v48 = vmax.f32 %v1182_v44, 0.0  ;;  %v1185_v49 = vadd.f32 %v1184_v46, %v997_v40  ;;  %v1186_v50 = vpop.f32.mrb[3].mxu1  ;;  %5203 = vmatprep.subr.bf16.mxu0 %v5877_v22 }
 0x1ff   :  { %5212 = vmatpush3.bf16.msra.mxu1 %v5777_v41  ;;  %v1005_v41 = vld [vmem:[%s7103_s4 + $0x58] sm:$0xff] }
 0x200   :  { %v1374_v51 = vmax.f32 %v1185_v49, 0.0  ;;  %5225 = vmatprep.subr.bf16.mxu1 %v5877_v22  ;;  %v1542_v55 = vpack.c.bf16 %v1373_v48, %v1373_v48  ;;  %v5793_v48 = vld [vmem:[%s7101_s5 + $0xb8] sm:$0xff]  }
 0x201   :  { %5204 = vmatpush3.bf16.msra.mxu0 %v5776_v47  ;;  %v5792_v47 = vld [vmem:[%s7101_s5 + $0xa8] sm:$0xff]  }
 0x202   :  { %v1604_v56 = vpack.c.bf16 %v1374_v51, %v1374_v51  ;;  %5217 = vmatprep.subr.bf16.mxu0 %v5877_v22 }
 0x203   :  { %v1189_v57 = vpop.f32.mrb[4].mxu1 }
 0x204   :  { %v1190_v59 = vadd.f32 %v1189_v57, %v998_v52  ;;  %v1191_v60 = vpop.f32.mrb[5].mxu1  ;;  %5206 = vmatmul.mubr.msk.bf16.vlgmr.msra.gmra.mrb[108].mxu0 %vm1443_vm1, %v1542_v55  ;;  %5214 = vmatmul.mubr.msk.bf16.vlgmr.msra.gmra.mrb[100].mxu1 %vm1443_vm1, %v1604_v56  ;;  %v5795_v55 = vld [vmem:[%s7101_s5 + $0xd0] sm:$0xff]  }
 0x205   :  { %5218 = vmatpush3.bf16.msra.mxu0 %v5778_v53  ;;  %v1192_v61 = vpop.f32.mrb[6].mxu1  ;;  %5226 = vmatpush3.bf16.msra.mxu1 %v5779_v54  ;;  %v1006_v53 = vld [vmem:[%s7103_s4 + $0x60] sm:$0xff] }
 0x206   :  { %v1375_v0 = vmax.f32 %v1190_v59, 0.0  ;;  %v1193_v2 = vadd.f32 %v1192_v61, %v999_v58  ;;  %v1194_v3 = vpop.f32.mrb[7].mxu1  ;;  %5219 = vmatprep.subr.bf16.mxu0 %v5877_v22  ;;  %5227 = vmatprep.subr.bf16.mxu1 %v5877_v22  ;;  %v5794_v54 = vld [vmem:[%s7101_s5 + $0xc0] sm:$0xff]   ;;  %v1007_v59 = vld [vmem:[%s7103_s4 + $0x68] sm:$0xff] }
 0x207   :  { %5221 = vmatprep.mubr.msk.bf16.mxu0 %vm5878_vm0, %v5877_v22  ;;  %5229 = vmatprep.mubr.msk.bf16.mxu1 %vm5878_vm0, %v5877_v22 }
 0x208   :  { %v1376_v4 = vmax.f32 %v1193_v2, 0.0  ;;  %v1666_v1 = vpack.c.bf16 %v1375_v0, %v1375_v0  ;;  %v5797_v0 = vld [vmem:[%s7101_s5 + $0xd8] sm:$0xff]  }
 0x209   :  { %5220 = vmatpush3.bf16.msra.mxu0 %v5780_v62  ;;  %5228 = vmatpush3.bf16.msra.mxu1 %v5781_v63  ;;  %v5796_v63 = vld [vmem:[%s7101_s5 + $0xc8] sm:$0xff]  }
 0x20a   :  { %v1728_v8 = vpack.c.bf16 %v1376_v4, %v1376_v4  ;;  %5233 = vmatprep.subr.bf16.mxu0 %v5877_v22  ;;  %5241 = vmatprep.subr.bf16.mxu1 %v5877_v22 }
 0x20b   :  { %v1197_v9 = vpop.f32.mrb[8].mxu1 }
 0x20c   :  { %v1198_v11 = vadd.f32 %v1197_v9, %v1000_v5  ;;  %v1199_v12 = vpop.f32.mrb[9].mxu1  ;;  %5222 = vmatmul.mubr.msk.bf16.vlgmr.msra.gmra.mrb[112].mxu0 %vm1443_vm1, %v1666_v1  ;;  %5230 = vmatmul.mubr.msk.bf16.vlgmr.msra.gmra.mrb[104].mxu1 %vm1443_vm1, %v1728_v8  ;;  %v5799_v1 = vld [vmem:[%s7101_s5 + $0xf0] sm:$0xff]  }
 0x20d   :  { %5234 = vmatpush3.bf16.msra.mxu0 %v5782_v6  ;;  %v1200_v13 = vpop.f32.mrb[10].mxu1  ;;  %5242 = vmatpush3.bf16.msra.mxu1 %v5783_v7  ;;  %v1008_v6 = vld [vmem:[%s7103_s4 + $0x70] sm:$0xff]  ;;  %v5798_v7 = vld [vmem:[%s7101_s5 + $0xe0] sm:$0xff]  }
 0x20e   :  { %v1377_v16 = vmax.f32 %v1198_v11, 0.0  ;;  %v1201_v17 = vadd.f32 %v1200_v13, %v1001_v10  ;;  %v1202_v18 = vpop.f32.mrb[11].mxu1  ;;  %5235 = vmatprep.subr.bf16.mxu0 %v5877_v22  ;;  %5243 = vmatprep.subr.bf16.mxu1 %v5877_v22  ;;  %v1009_v11 = vld [vmem:[%s7103_s4 + $0x78] sm:$0xff] }
 0x20f   :  { %5237 = vmatprep.mubr.msk.bf16.mxu0 %vm5878_vm0, %v5877_v22  ;;  %5245 = vmatprep.mubr.msk.bf16.mxu1 %vm5878_vm0, %v5877_v22 }
 0x210   :  { %v1378_v19 = vmax.f32 %v1201_v17, 0.0  ;;  %v1790_v24 = vpack.c.bf16 %v1377_v16, %v1377_v16  ;;  %v5801_v16 = vld [vmem:[%s7101_s5 + $0xf8] sm:$0xff]  }
 0x211   :  { %5236 = vmatpush3.bf16.msra.mxu0 %v5784_v14  ;;  %5244 = vmatpush3.bf16.msra.mxu1 %v5785_v15  ;;  %v5800_v15 = vld [vmem:[%s7101_s5 + $0xe8] sm:$0xff]  }
 0x212   :  { %v1852_v25 = vpack.c.bf16 %v1378_v19, %v1378_v19  ;;  %5249 = vmatprep.subr.bf16.mxu0 %v5877_v22  ;;  %5257 = vmatprep.subr.bf16.mxu1 %v5877_v22 }
 0x213   :  { %v1205_v42 = vpop.f32.mrb[12].mxu1 }
 0x214   :  { %v1206_v43 = vadd.f32 %v1205_v42, %v1002_v20  ;;  %v1207_v27 = vpop.f32.mrb[13].mxu1  ;;  %5238 = vmatmul.mubr.msk.bf16.vlgmr.msra.gmra.mrb[116].mxu0 %vm1443_vm1, %v1790_v24  ;;  %5246 = vmatmul.mubr.msk.bf16.vlgmr.msra.gmra.mrb[108].mxu1 %vm1443_vm1, %v1852_v25  ;;  %v5803_v24 = vld [vmem:[%s7101_s5 + $0x110] sm:$0xff]  }
 0x215   :  { %5250 = vmatpush3.bf16.msra.mxu0 %v5786_v21  ;;  %v1208_v28 = vpop.f32.mrb[14].mxu1  ;;  %5258 = vmatpush3.bf16.msra.mxu1 %v5787_v23  ;;  %v1010_v21 = vld [vmem:[%s7103_s4 + $0x80] sm:$0xff] }
 0x216   :  { %v1379_v31 = vmax.f32 %v1206_v43, 0.0  ;;  %v1209_v32 = vadd.f32 %v1208_v28, %v1003_v26  ;;  %v1210_v33 = vpop.f32.mrb[15].mxu1  ;;  %5251 = vmatprep.subr.bf16.mxu0 %v5877_v22  ;;  %5259 = vmatprep.subr.bf16.mxu1 %v5877_v22  ;;  %v5802_v23 = vld [vmem:[%s7101_s5 + $0x100] sm:$0xff]   ;;  %v1011_v43 = vld [vmem:[%s7103_s4 + $0x88] sm:$0xff] }
 0x217   :  { %5253 = vmatprep.mubr.msk.bf16.mxu0 %vm5878_vm0, %v5877_v22  ;;  %5261 = vmatprep.mubr.msk.bf16.mxu1 %vm5878_vm0, %v5877_v22 }
 0x218   :  { %v1380_v34 = vmax.f32 %v1209_v32, 0.0  ;;  %v1914_v38 = vpack.c.bf16 %v1379_v31, %v1379_v31  ;;  %v5805_v31 = vld [vmem:[%s7101_s5 + $0x118] sm:$0xff]  }
 0x219   :  { %5252 = vmatpush3.bf16.msra.mxu0 %v5788_v29  ;;  %5260 = vmatpush3.bf16.msra.mxu1 %v5789_v30  ;;  %v5804_v30 = vld [vmem:[%s7101_s5 + $0x108] sm:$0xff]  }
 0x21a   :  { %v1976_v39 = vpack.c.bf16 %v1380_v34, %v1380_v34  ;;  %5265 = vmatprep.subr.bf16.mxu0 %v5877_v22  ;;  %5273 = vmatprep.subr.bf16.mxu1 %v5877_v22 }
 0x21b   :  { %v1213_v40 = vpop.f32.mrb[16].mxu1 }
 0x21c   :  { %v1214_v44 = vadd.f32 %v1213_v40, %v1004_v35  ;;  %v1215_v45 = vpop.f32.mrb[17].mxu1  ;;  %5254 = vmatmul.mubr.msk.bf16.vlgmr.msra.gmra.mrb[120].mxu0 %vm1443_vm1, %v1914_v38  ;;  %5262 = vmatmul.mubr.msk.bf16.vlgmr.msra.gmra.mrb[112].mxu1 %vm1443_vm1, %v1976_v39  ;;  %v5807_v38 = vld [vmem:[%s7101_s5 + $0x130] sm:$0xff]  }
 0x21d   :  { %5266 = vmatpush3.bf16.msra.mxu0 %v5790_v36  ;;  %v1216_v46 = vpop.f32.mrb[18].mxu1  ;;  %5274 = vmatpush3.bf16.msra.mxu1 %v5791_v37  ;;  %v1012_v36 = vld [vmem:[%s7103_s4 + $0x90] sm:$0xff]  ;;  %v5806_v37 = vld [vmem:[%s7101_s5 + $0x120] sm:$0xff]  }
 0x21e   :  { %v1381_v49 = vmax.f32 %v1214_v44, 0.0  ;;  %v1217_v50 = vadd.f32 %v1216_v46, %v1005_v41  ;;  %v1218_v51 = vpop.f32.mrb[19].mxu1  ;;  %5267 = vmatprep.subr.bf16.mxu0 %v5877_v22  ;;  %5275 = vmatprep.subr.bf16.mxu1 %v5877_v22  ;;  %v1013_v44 = vld [vmem:[%s7103_s4 + $0x98] sm:$0xff] }
 0x21f   :  { %5269 = vmatprep.mubr.msk.bf16.mxu0 %vm5878_vm0, %v5877_v22  ;;  %5277 = vmatprep.mubr.msk.bf16.mxu1 %vm5878_vm0, %v5877_v22 }
 0x220   :  { %v1382_v52 = vmax.f32 %v1217_v50, 0.0  ;;  %v2038_v56 = vpack.c.bf16 %v1381_v49, %v1381_v49  ;;  %v5809_v49 = vld [vmem:[%s7101_s5 + $0x138] sm:$0xff]  }
 0x221   :  { %5268 = vmatpush3.bf16.msra.mxu0 %v5792_v47  ;;  %5276 = vmatpush3.bf16.msra.mxu1 %v5793_v48  ;;  %v5808_v48 = vld [vmem:[%s7101_s5 + $0x128] sm:$0xff]  }
 0x222   :  { %v2100_v57 = vpack.c.bf16 %v1382_v52, %v1382_v52  ;;  %5281 = vmatprep.subr.bf16.mxu0 %v5877_v22  ;;  %5289 = vmatprep.subr.bf16.mxu1 %v5877_v22 }
 0x223   :  { %v1221_v58 = vpop.f32.mrb[20].mxu1 }
 0x224   :  { %v1222_v60 = vadd.f32 %v1221_v58, %v1006_v53  ;;  %v1223_v61 = vpop.f32.mrb[21].mxu1  ;;  %5270 = vmatmul.mubr.msk.bf16.vlgmr.msra.gmra.mrb[124].mxu0 %vm1443_vm1, %v2038_v56  ;;  %5278 = vmatmul.mubr.msk.bf16.vlgmr.msra.gmra.mrb[116].mxu1 %vm1443_vm1, %v2100_v57  ;;  %v5811_v56 = vld [vmem:[%s7101_s5 + $0x150] sm:$0xff]  }
 0x225   :  { %5282 = vmatpush3.bf16.msra.mxu0 %v5794_v54  ;;  %v1224_v62 = vpop.f32.mrb[22].mxu1  ;;  %5290 = vmatpush3.bf16.msra.mxu1 %v5795_v55  ;;  %v1014_v54 = vld [vmem:[%s7103_s4 + $0xa0] sm:$0xff] }
 0x226   :  { %v1383_v2 = vmax.f32 %v1222_v60, 0.0  ;;  %v1225_v3 = vadd.f32 %v1224_v62, %v1007_v59  ;;  %v1226_v4 = vpop.f32.mrb[23].mxu1  ;;  %5283 = vmatprep.subr.bf16.mxu0 %v5877_v22  ;;  %5291 = vmatprep.subr.bf16.mxu1 %v5877_v22  ;;  %v5810_v55 = vld [vmem:[%s7101_s5 + $0x140] sm:$0xff]   ;;  %v1015_v60 = vld [vmem:[%s7103_s4 + $0xa8] sm:$0xff] }
 0x227   :  { %5285 = vmatprep.mubr.msk.bf16.mxu0 %vm5878_vm0, %v5877_v22  ;;  %5293 = vmatprep.mubr.msk.bf16.mxu1 %vm5878_vm0, %v5877_v22 }
 0x228   :  { %v1384_v5 = vmax.f32 %v1225_v3, 0.0  ;;  %v2162_v8 = vpack.c.bf16 %v1383_v2, %v1383_v2  ;;  %v5813_v2 = vld [vmem:[%s7101_s5 + $0x158] sm:$0xff]  }
 0x229   :  { %5284 = vmatpush3.bf16.msra.mxu0 %v5796_v63  ;;  %5292 = vmatpush3.bf16.msra.mxu1 %v5797_v0  ;;  %v5812_v0 = vld [vmem:[%s7101_s5 + $0x148] sm:$0xff]  }
 0x22a   :  { %v2224_v9 = vpack.c.bf16 %v1384_v5, %v1384_v5  ;;  %5297 = vmatprep.subr.bf16.mxu0 %v5877_v22  ;;  %5305 = vmatprep.subr.bf16.mxu1 %v5877_v22 }
 0x22b   :  { %v1229_v10 = vpop.f32.mrb[24].mxu1 }
 0x22c   :  { %v1230_v12 = vadd.f32 %v1229_v10, %v1008_v6  ;;  %v1231_v13 = vpop.f32.mrb[25].mxu1  ;;  %5286 = vmatmul.mubr.msk.bf16.vlgmr.msra.gmra.mrb[128].mxu0 %vm1443_vm1, %v2162_v8  ;;  %5294 = vmatmul.mubr.msk.bf16.vlgmr.msra.gmra.mrb[120].mxu1 %vm1443_vm1, %v2224_v9  ;;  %v5815_v8 = vld [vmem:[%s7101_s5 + $0x170] sm:$0xff]  }
 0x22d   :  { %5298 = vmatpush3.bf16.msra.mxu0 %v5798_v7  ;;  %v1232_v14 = vpop.f32.mrb[26].mxu1  ;;  %5306 = vmatpush3.bf16.msra.mxu1 %v5799_v1  ;;  %v1016_v7 = vld [vmem:[%s7103_s4 + $0xb0] sm:$0xff]  ;;  %v5814_v1 = vld [vmem:[%s7101_s5 + $0x160] sm:$0xff]  }
 0x22e   :  { %v1385_v17 = vmax.f32 %v1230_v12, 0.0  ;;  %v1233_v18 = vadd.f32 %v1232_v14, %v1009_v11  ;;  %v1234_v19 = vpop.f32.mrb[27].mxu1  ;;  %5299 = vmatprep.subr.bf16.mxu0 %v5877_v22  ;;  %5307 = vmatprep.subr.bf16.mxu1 %v5877_v22  ;;  %v1017_v12 = vld [vmem:[%s7103_s4 + $0xb8] sm:$0xff] }
 0x22f   :  { %5301 = vmatprep.mubr.msk.bf16.mxu0 %vm5878_vm0, %v5877_v22  ;;  %5309 = vmatprep.mubr.msk.bf16.mxu1 %vm5878_vm0, %v5877_v22 }
 0x230   :  { %v1386_v20 = vmax.f32 %v1233_v18, 0.0  ;;  %v2286_v25 = vpack.c.bf16 %v1385_v17, %v1385_v17  ;;  %v5817_v17 = vld [vmem:[%s7101_s5 + $0x178] sm:$0xff]  }
 0x231   :  { %5300 = vmatpush3.bf16.msra.mxu0 %v5800_v15  ;;  %5308 = vmatpush3.bf16.msra.mxu1 %v5801_v16  ;;  %v5816_v16 = vld [vmem:[%s7101_s5 + $0x168] sm:$0xff]  }
 0x232   :  { %v2348_v42 = vpack.c.bf16 %v1386_v20, %v1386_v20  ;;  %5313 = vmatprep.subr.bf16.mxu0 %v5877_v22  ;;  %5321 = vmatprep.subr.bf16.mxu1 %v5877_v22 }
 0x233   :  { %v1237_v26 = vpop.f32.mrb[28].mxu1 }
 0x234   :  { %v1238_v27 = vadd.f32 %v1237_v26, %v1010_v21  ;;  %v1239_v28 = vpop.f32.mrb[29].mxu1  ;;  %5302 = vmatmul.mubr.msk.bf16.vlgmr.msra.gmra.mrb[132].mxu0 %vm1443_vm1, %v2286_v25  ;;  %5310 = vmatmul.mubr.msk.bf16.vlgmr.msra.gmra.mrb[124].mxu1 %vm1443_vm1, %v2348_v42  ;;  %v5819_v25 = vld [vmem:[%s7101_s5 + $0x190] sm:$0xff]  }
 0x235   :  { %5314 = vmatpush3.bf16.msra.mxu0 %v5802_v23  ;;  %v1240_v29 = vpop.f32.mrb[30].mxu1  ;;  %5322 = vmatpush3.bf16.msra.mxu1 %v5803_v24  ;;  %v1018_v23 = vld [vmem:[%s7103_s4 + $0xc0] sm:$0xff] }
 0x236   :  { %v1387_v32 = vmax.f32 %v1238_v27, 0.0  ;;  %v1241_v33 = vadd.f32 %v1240_v29, %v1011_v43  ;;  %v1242_v34 = vpop.f32.mrb[31].mxu1  ;;  %5315 = vmatprep.subr.bf16.mxu0 %v5877_v22  ;;  %5323 = vmatprep.subr.bf16.mxu1 %v5877_v22  ;;  %v5818_v24 = vld [vmem:[%s7101_s5 + $0x180] sm:$0xff]   ;;  %v1019_v27 = vld [vmem:[%s7103_s4 + $0xc8] sm:$0xff] }
 0x237   :  { %5317 = vmatprep.mubr.msk.bf16.mxu0 %vm5878_vm0, %v5877_v22  ;;  %5325 = vmatprep.mubr.msk.bf16.mxu1 %vm5878_vm0, %v5877_v22 }
 0x238   :  { %v1388_v35 = vmax.f32 %v1241_v33, 0.0  ;;  %v2410_v39 = vpack.c.bf16 %v1387_v32, %v1387_v32  ;;  %v5821_v32 = vld [vmem:[%s7101_s5 + $0x198] sm:$0xff]  }
 0x239   :  { %5316 = vmatpush3.bf16.msra.mxu0 %v5804_v30  ;;  %5324 = vmatpush3.bf16.msra.mxu1 %v5805_v31  ;;  %v5820_v31 = vld [vmem:[%s7101_s5 + $0x188] sm:$0xff]  }
 0x23a   :  { %v2472_v40 = vpack.c.bf16 %v1388_v35, %v1388_v35  ;;  %5329 = vmatprep.subr.bf16.mxu0 %v5877_v22  ;;  %5337 = vmatprep.subr.bf16.mxu1 %v5877_v22 }
 0x23b   :  { %v1245_v41 = vpop.f32.mrb[32].mxu1 }
 0x23c   :  { %v1246_v45 = vadd.f32 %v1245_v41, %v1012_v36  ;;  %v1247_v46 = vpop.f32.mrb[33].mxu1  ;;  %5318 = vmatmul.mubr.msk.bf16.vlgmr.msra.gmra.mrb[136].mxu0 %vm1443_vm1, %v2410_v39  ;;  %5326 = vmatmul.mubr.msk.bf16.vlgmr.msra.gmra.mrb[128].mxu1 %vm1443_vm1, %v2472_v40  ;;  %v5823_v39 = vld [vmem:[%s7101_s5 + $0x1b0] sm:$0xff]  }
 0x23d   :  { %5330 = vmatpush3.bf16.msra.mxu0 %v5806_v37  ;;  %v1248_v47 = vpop.f32.mrb[34].mxu1  ;;  %5338 = vmatpush3.bf16.msra.mxu1 %v5807_v38  ;;  %v1020_v37 = vld [vmem:[%s7103_s4 + $0xd0] sm:$0xff]  ;;  %v5822_v38 = vld [vmem:[%s7101_s5 + $0x1a0] sm:$0xff]  }
 0x23e   :  { %v1389_v50 = vmax.f32 %v1246_v45, 0.0  ;;  %v1249_v51 = vadd.f32 %v1248_v47, %v1013_v44  ;;  %v1250_v52 = vpop.f32.mrb[35].mxu1  ;;  %5331 = vmatprep.subr.bf16.mxu0 %v5877_v22  ;;  %5339 = vmatprep.subr.bf16.mxu1 %v5877_v22  ;;  %v1021_v45 = vld [vmem:[%s7103_s4 + $0xd8] sm:$0xff] }
 0x23f   :  { %5333 = vmatprep.mubr.msk.bf16.mxu0 %vm5878_vm0, %v5877_v22  ;;  %5341 = vmatprep.mubr.msk.bf16.mxu1 %vm5878_vm0, %v5877_v22 }
 0x240   :  { %v1390_v53 = vmax.f32 %v1249_v51, 0.0  ;;  %v2534_v57 = vpack.c.bf16 %v1389_v50, %v1389_v50  ;;  %v5825_v50 = vld [vmem:[%s7101_s5 + $0x1b8] sm:$0xff]  }
 0x241   :  { %5332 = vmatpush3.bf16.msra.mxu0 %v5808_v48  ;;  %5340 = vmatpush3.bf16.msra.mxu1 %v5809_v49  ;;  %v5824_v49 = vld [vmem:[%s7101_s5 + $0x1a8] sm:$0xff]  }
 0x242   :  { %v2596_v58 = vpack.c.bf16 %v1390_v53, %v1390_v53  ;;  %5345 = vmatprep.subr.bf16.mxu0 %v5877_v22  ;;  %5353 = vmatprep.subr.bf16.mxu1 %v5877_v22 }
 0x243   :  { %v1253_v59 = vpop.f32.mrb[36].mxu1 }
 0x244   :  { %v1254_v61 = vadd.f32 %v1253_v59, %v1014_v54  ;;  %v1255_v62 = vpop.f32.mrb[37].mxu1  ;;  %5334 = vmatmul.mubr.msk.bf16.vlgmr.msra.gmra.mrb[140].mxu0 %vm1443_vm1, %v2534_v57  ;;  %5342 = vmatmul.mubr.msk.bf16.vlgmr.msra.gmra.mrb[132].mxu1 %vm1443_vm1, %v2596_v58  ;;  %v5827_v57 = vld [vmem:[%s7101_s5 + $0x1d0] sm:$0xff]  }
 0x245   :  { %5346 = vmatpush3.bf16.msra.mxu0 %v5810_v55  ;;  %v1256_v63 = vpop.f32.mrb[38].mxu1  ;;  %5354 = vmatpush3.bf16.msra.mxu1 %v5811_v56  ;;  %v1022_v55 = vld [vmem:[%s7103_s4 + $0xe0] sm:$0xff] }
 0x246   :  { %v1391_v3 = vmax.f32 %v1254_v61, 0.0  ;;  %v1257_v4 = vadd.f32 %v1256_v63, %v1015_v60  ;;  %v1258_v5 = vpop.f32.mrb[39].mxu1  ;;  %5347 = vmatprep.subr.bf16.mxu0 %v5877_v22  ;;  %5355 = vmatprep.subr.bf16.mxu1 %v5877_v22  ;;  %v5826_v56 = vld [vmem:[%s7101_s5 + $0x1c0] sm:$0xff]   ;;  %v1023_v61 = vld [vmem:[%s7103_s4 + $0xe8] sm:$0xff] }
 0x247   :  { %5349 = vmatprep.mubr.msk.bf16.mxu0 %vm5878_vm0, %v5877_v22  ;;  %5357 = vmatprep.mubr.msk.bf16.mxu1 %vm5878_vm0, %v5877_v22 }
 0x248   :  { %v1392_v6 = vmax.f32 %v1257_v4, 0.0  ;;  %v2658_v9 = vpack.c.bf16 %v1391_v3, %v1391_v3  ;;  %v5829_v3 = vld [vmem:[%s7101_s5 + $0x1d8] sm:$0xff]  }
 0x249   :  { %5348 = vmatpush3.bf16.msra.mxu0 %v5812_v0  ;;  %5356 = vmatpush3.bf16.msra.mxu1 %v5813_v2  ;;  %v5828_v2 = vld [vmem:[%s7101_s5 + $0x1c8] sm:$0xff]  }
 0x24a   :  { %v2720_v10 = vpack.c.bf16 %v1392_v6, %v1392_v6  ;;  %5361 = vmatprep.subr.bf16.mxu0 %v5877_v22  ;;  %5369 = vmatprep.subr.bf16.mxu1 %v5877_v22 }
 0x24b   :  { %v1261_v11 = vpop.f32.mrb[40].mxu1 }
 0x24c   :  { %v1262_v13 = vadd.f32 %v1261_v11, %v1016_v7  ;;  %v1263_v14 = vpop.f32.mrb[41].mxu1  ;;  %5350 = vmatmul.mubr.msk.bf16.vlgmr.msra.gmra.mrb[144].mxu0 %vm1443_vm1, %v2658_v9  ;;  %5358 = vmatmul.mubr.msk.bf16.vlgmr.msra.gmra.mrb[136].mxu1 %vm1443_vm1, %v2720_v10  ;;  %v5831_v9 = vld [vmem:[%s7101_s5 + $0x1f0] sm:$0xff]  }
 0x24d   :  { %5362 = vmatpush3.bf16.msra.mxu0 %v5814_v1  ;;  %v1264_v15 = vpop.f32.mrb[42].mxu1  ;;  %5370 = vmatpush3.bf16.msra.mxu1 %v5815_v8  ;;  %v1024_v1 = vld [vmem:[%s7103_s4 + $0xf0] sm:$0xff]  ;;  %v5830_v8 = vld [vmem:[%s7101_s5 + $0x1e0] sm:$0xff]  }
 0x24e   :  { %v1393_v18 = vmax.f32 %v1262_v13, 0.0  ;;  %v1265_v19 = vadd.f32 %v1264_v15, %v1017_v12  ;;  %v1266_v20 = vpop.f32.mrb[43].mxu1  ;;  %5363 = vmatprep.subr.bf16.mxu0 %v5877_v22  ;;  %5371 = vmatprep.subr.bf16.mxu1 %v5877_v22  ;;  %v1025_v13 = vld [vmem:[%s7103_s4 + $0xf8] sm:$0xff] }
 0x24f   :  { %5365 = vmatprep.mubr.msk.bf16.mxu0 %vm5878_vm0, %v5877_v22  ;;  %5373 = vmatprep.mubr.msk.bf16.mxu1 %vm5878_vm0, %v5877_v22 }
 0x250   :  { %v1394_v21 = vmax.f32 %v1265_v19, 0.0  ;;  %v2782_v42 = vpack.c.bf16 %v1393_v18, %v1393_v18  ;;  %v5833_v18 = vld [vmem:[%s7101_s5 + $0x1f8] sm:$0xff]  }
 0x251   :  { %5364 = vmatpush3.bf16.msra.mxu0 %v5816_v16  ;;  %5372 = vmatpush3.bf16.msra.mxu1 %v5817_v17  ;;  %v5832_v17 = vld [vmem:[%s7101_s5 + $0x1e8] sm:$0xff]  }
 0x252   :  { %v2844_v26 = vpack.c.bf16 %v1394_v21, %v1394_v21  ;;  %5377 = vmatprep.subr.bf16.mxu0 %v5877_v22  ;;  %5385 = vmatprep.subr.bf16.mxu1 %v5877_v22 }
 0x253   :  { %v1269_v43 = vpop.f32.mrb[44].mxu1 }
 0x254   :  { %v1270_v28 = vadd.f32 %v1269_v43, %v1018_v23  ;;  %v1271_v29 = vpop.f32.mrb[45].mxu1  ;;  %5366 = vmatmul.mubr.msk.bf16.vlgmr.msra.gmra.mrb[148].mxu0 %vm1443_vm1, %v2782_v42  ;;  %5374 = vmatmul.mubr.msk.bf16.vlgmr.msra.gmra.mrb[140].mxu1 %vm1443_vm1, %v2844_v26  ;;  %v5835_v42 = vld [vmem:[%s7101_s5 + $0x210] sm:$0xff]  }
 0x255   :  { %5378 = vmatpush3.bf16.msra.mxu0 %v5818_v24  ;;  %v1272_v30 = vpop.f32.mrb[46].mxu1  ;;  %5386 = vmatpush3.bf16.msra.mxu1 %v5819_v25  ;;  %v1026_v24 = vld [vmem:[%s7103_s4 + $0x100] sm:$0xff] }
 0x256   :  { %v1395_v33 = vmax.f32 %v1270_v28, 0.0  ;;  %v1273_v34 = vadd.f32 %v1272_v30, %v1019_v27  ;;  %v1274_v35 = vpop.f32.mrb[47].mxu1  ;;  %5379 = vmatprep.subr.bf16.mxu0 %v5877_v22  ;;  %5387 = vmatprep.subr.bf16.mxu1 %v5877_v22  ;;  %v5834_v25 = vld [vmem:[%s7101_s5 + $0x200] sm:$0xff]   ;;  %v1027_v28 = vld [vmem:[%s7103_s4 + $0x108] sm:$0xff] }
 0x257   :  { %5381 = vmatprep.mubr.msk.bf16.mxu0 %vm5878_vm0, %v5877_v22  ;;  %5389 = vmatprep.mubr.msk.bf16.mxu1 %vm5878_vm0, %v5877_v22 }
 0x258   :  { %v1396_v36 = vmax.f32 %v1273_v34, 0.0  ;;  %v2906_v40 = vpack.c.bf16 %v1395_v33, %v1395_v33  ;;  %v5837_v33 = vld [vmem:[%s7101_s5 + $0x218] sm:$0xff]  }
 0x259   :  { %5380 = vmatpush3.bf16.msra.mxu0 %v5820_v31  ;;  %5388 = vmatpush3.bf16.msra.mxu1 %v5821_v32  ;;  %v5836_v32 = vld [vmem:[%s7101_s5 + $0x208] sm:$0xff]  }
 0x25a   :  { %v2968_v41 = vpack.c.bf16 %v1396_v36, %v1396_v36  ;;  %5393 = vmatprep.subr.bf16.mxu0 %v5877_v22  ;;  %5401 = vmatprep.subr.bf16.mxu1 %v5877_v22 }
 0x25b   :  { %v1277_v44 = vpop.f32.mrb[48].mxu1 }
 0x25c   :  { %v1278_v46 = vadd.f32 %v1277_v44, %v1020_v37  ;;  %v1279_v47 = vpop.f32.mrb[49].mxu1  ;;  %5382 = vmatmul.mubr.msk.bf16.vlgmr.msra.gmra.mrb[152].mxu0 %vm1443_vm1, %v2906_v40  ;;  %5390 = vmatmul.mubr.msk.bf16.vlgmr.msra.gmra.mrb[144].mxu1 %vm1443_vm1, %v2968_v41  ;;  %v5839_v40 = vld [vmem:[%s7101_s5 + $0x230] sm:$0xff]  }
 0x25d   :  { %5394 = vmatpush3.bf16.msra.mxu0 %v5822_v38  ;;  %v1280_v48 = vpop.f32.mrb[50].mxu1  ;;  %5402 = vmatpush3.bf16.msra.mxu1 %v5823_v39  ;;  %v1028_v38 = vld [vmem:[%s7103_s4 + $0x110] sm:$0xff]  ;;  %v5838_v39 = vld [vmem:[%s7101_s5 + $0x220] sm:$0xff]  }
 0x25e   :  { %v1397_v51 = vmax.f32 %v1278_v46, 0.0  ;;  %v1281_v52 = vadd.f32 %v1280_v48, %v1021_v45  ;;  %v1282_v53 = vpop.f32.mrb[51].mxu1  ;;  %5395 = vmatprep.subr.bf16.mxu0 %v5877_v22  ;;  %5403 = vmatprep.subr.bf16.mxu1 %v5877_v22  ;;  %v1029_v46 = vld [vmem:[%s7103_s4 + $0x118] sm:$0xff] }
 0x25f   :  { %5397 = vmatprep.mubr.msk.bf16.mxu0 %vm5878_vm0, %v5877_v22  ;;  %5405 = vmatprep.mubr.msk.bf16.mxu1 %vm5878_vm0, %v5877_v22 }
 0x260   :  { %v1398_v54 = vmax.f32 %v1281_v52, 0.0  ;;  %v3030_v58 = vpack.c.bf16 %v1397_v51, %v1397_v51  ;;  %v5841_v51 = vld [vmem:[%s7101_s5 + $0x238] sm:$0xff]  }
 0x261   :  { %5396 = vmatpush3.bf16.msra.mxu0 %v5824_v49  ;;  %5404 = vmatpush3.bf16.msra.mxu1 %v5825_v50  ;;  %v5840_v50 = vld [vmem:[%s7101_s5 + $0x228] sm:$0xff]  }
 0x262   :  { %v3092_v59 = vpack.c.bf16 %v1398_v54, %v1398_v54  ;;  %5409 = vmatprep.subr.bf16.mxu0 %v5877_v22  ;;  %5417 = vmatprep.subr.bf16.mxu1 %v5877_v22 }
 0x263   :  { %v1285_v60 = vpop.f32.mrb[52].mxu1 }
 0x264   :  { %v1286_v62 = vadd.f32 %v1285_v60, %v1022_v55  ;;  %v1287_v63 = vpop.f32.mrb[53].mxu1  ;;  %5398 = vmatmul.mubr.msk.bf16.vlgmr.msra.gmra.mrb[156].mxu0 %vm1443_vm1, %v3030_v58  ;;  %5406 = vmatmul.mubr.msk.bf16.vlgmr.msra.gmra.mrb[148].mxu1 %vm1443_vm1, %v3092_v59  ;;  %v5843_v58 = vld [vmem:[%s7101_s5 + $0x250] sm:$0xff]  }
 0x265   :  { %5410 = vmatpush3.bf16.msra.mxu0 %v5826_v56  ;;  %v1288_v0 = vpop.f32.mrb[54].mxu1  ;;  %5418 = vmatpush3.bf16.msra.mxu1 %v5827_v57  ;;  %v1030_v56 = vld [vmem:[%s7103_s4 + $0x120] sm:$0xff] }
 0x266   :  { %v1399_v4 = vmax.f32 %v1286_v62, 0.0  ;;  %v1289_v5 = vadd.f32 %v1288_v0, %v1023_v61  ;;  %v1290_v6 = vpop.f32.mrb[55].mxu1  ;;  %5411 = vmatprep.subr.bf16.mxu0 %v5877_v22  ;;  %5419 = vmatprep.subr.bf16.mxu1 %v5877_v22  ;;  %v5842_v57 = vld [vmem:[%s7101_s5 + $0x240] sm:$0xff]   ;;  %v1031_v62 = vld [vmem:[%s7103_s4 + $0x128] sm:$0xff] }
 0x267   :  { %5413 = vmatprep.mubr.msk.bf16.mxu0 %vm5878_vm0, %v5877_v22  ;;  %5421 = vmatprep.mubr.msk.bf16.mxu1 %vm5878_vm0, %v5877_v22 }
 0x268   :  { %v1400_v7 = vmax.f32 %v1289_v5, 0.0  ;;  %v3154_v10 = vpack.c.bf16 %v1399_v4, %v1399_v4  ;;  %v5845_v4 = vld [vmem:[%s7101_s5 + $0x258] sm:$0xff]  }
 0x269   :  { %5412 = vmatpush3.bf16.msra.mxu0 %v5828_v2  ;;  %5420 = vmatpush3.bf16.msra.mxu1 %v5829_v3  ;;  %v5844_v3 = vld [vmem:[%s7101_s5 + $0x248] sm:$0xff]  }
 0x26a   :  { %v3216_v11 = vpack.c.bf16 %v1400_v7, %v1400_v7  ;;  %5425 = vmatprep.subr.bf16.mxu0 %v5877_v22  ;;  %5433 = vmatprep.subr.bf16.mxu1 %v5877_v22 }
 0x26b   :  { %v1293_v12 = vpop.f32.mrb[56].mxu1 }
 0x26c   :  { %v1294_v14 = vadd.f32 %v1293_v12, %v1024_v1  ;;  %v1295_v15 = vpop.f32.mrb[57].mxu1  ;;  %5414 = vmatmul.mubr.msk.bf16.vlgmr.msra.gmra.mrb[160].mxu0 %vm1443_vm1, %v3154_v10  ;;  %5422 = vmatmul.mubr.msk.bf16.vlgmr.msra.gmra.mrb[152].mxu1 %vm1443_vm1, %v3216_v11  ;;  %v5847_v10 = vld [vmem:[%s7101_s5 + $0x270] sm:$0xff]  }
 0x26d   :  { %5426 = vmatpush3.bf16.msra.mxu0 %v5830_v8  ;;  %v1296_v16 = vpop.f32.mrb[58].mxu1  ;;  %5434 = vmatpush3.bf16.msra.mxu1 %v5831_v9  ;;  %v1032_v8 = vld [vmem:[%s7103_s4 + $0x130] sm:$0xff]  ;;  %v5846_v9 = vld [vmem:[%s7101_s5 + $0x260] sm:$0xff]  }
 0x26e   :  { %v1401_v19 = vmax.f32 %v1294_v14, 0.0  ;;  %v1297_v20 = vadd.f32 %v1296_v16, %v1025_v13  ;;  %v1298_v21 = vpop.f32.mrb[59].mxu1  ;;  %5427 = vmatprep.subr.bf16.mxu0 %v5877_v22  ;;  %5435 = vmatprep.subr.bf16.mxu1 %v5877_v22  ;;  %v1033_v14 = vld [vmem:[%s7103_s4 + $0x138] sm:$0xff] }
 0x26f   :  { %5429 = vmatprep.mubr.msk.bf16.mxu0 %vm5878_vm0, %v5877_v22  ;;  %5437 = vmatprep.mubr.msk.bf16.mxu1 %vm5878_vm0, %v5877_v22 }
 0x270   :  { %v1402_v23 = vmax.f32 %v1297_v20, 0.0  ;;  %v3278_v26 = vpack.c.bf16 %v1401_v19, %v1401_v19  ;;  %v5849_v19 = vld [vmem:[%s7101_s5 + $0x278] sm:$0xff]  }
 0x271   :  { %5428 = vmatpush3.bf16.msra.mxu0 %v5832_v17  ;;  %5436 = vmatpush3.bf16.msra.mxu1 %v5833_v18  ;;  %v5848_v18 = vld [vmem:[%s7101_s5 + $0x268] sm:$0xff]  }
 0x272   :  { %v3340_v43 = vpack.c.bf16 %v1402_v23, %v1402_v23  ;;  %5441 = vmatprep.subr.bf16.mxu0 %v5877_v22  ;;  %5449 = vmatprep.subr.bf16.mxu1 %v5877_v22 }
 0x273   :  { %v1301_v27 = vpop.f32.mrb[60].mxu1 }
 0x274   :  { %v1302_v29 = vadd.f32 %v1301_v27, %v1026_v24  ;;  %v1303_v30 = vpop.f32.mrb[61].mxu1  ;;  %5430 = vmatmul.mubr.msk.bf16.vlgmr.msra.gmra.mrb[164].mxu0 %vm1443_vm1, %v3278_v26  ;;  %5438 = vmatmul.mubr.msk.bf16.vlgmr.msra.gmra.mrb[156].mxu1 %vm1443_vm1, %v3340_v43  ;;  %v5851_v26 = vld [vmem:[%s7101_s5 + $0x290] sm:$0xff]  }
 0x275   :  { %5442 = vmatpush3.bf16.msra.mxu0 %v5834_v25  ;;  %v1304_v31 = vpop.f32.mrb[62].mxu1  ;;  %5450 = vmatpush3.bf16.msra.mxu1 %v5835_v42  ;;  %v1034_v25 = vld [vmem:[%s7103_s4 + $0x140] sm:$0xff] }
 0x276   :  { %v1403_v34 = vmax.f32 %v1302_v29, 0.0  ;;  %v1305_v35 = vadd.f32 %v1304_v31, %v1027_v28  ;;  %v1306_v36 = vpop.f32.mrb[63].mxu1  ;;  %5443 = vmatprep.subr.bf16.mxu0 %v5877_v22  ;;  %5451 = vmatprep.subr.bf16.mxu1 %v5877_v22  ;;  %v5850_v42 = vld [vmem:[%s7101_s5 + $0x280] sm:$0xff]   ;;  %v1035_v29 = vld [vmem:[%s7103_s4 + $0x148] sm:$0xff] }
 0x277   :  { %5445 = vmatprep.mubr.msk.bf16.mxu0 %vm5878_vm0, %v5877_v22  ;;  %5453 = vmatprep.mubr.msk.bf16.mxu1 %vm5878_vm0, %v5877_v22 }
 0x278   :  { %v1404_v37 = vmax.f32 %v1305_v35, 0.0  ;;  %v3402_v41 = vpack.c.bf16 %v1403_v34, %v1403_v34  ;;  %v5853_v34 = vld [vmem:[%s7101_s5 + $0x298] sm:$0xff]  }
 0x279   :  { %5444 = vmatpush3.bf16.msra.mxu0 %v5836_v32  ;;  %5452 = vmatpush3.bf16.msra.mxu1 %v5837_v33  ;;  %v5852_v33 = vld [vmem:[%s7101_s5 + $0x288] sm:$0xff]  }
 0x27a   :  { %v3464_v44 = vpack.c.bf16 %v1404_v37, %v1404_v37  ;;  %5457 = vmatprep.subr.bf16.mxu0 %v5877_v22  ;;  %5465 = vmatprep.subr.bf16.mxu1 %v5877_v22 }
 0x27b   :  { %v1309_v45 = vpop.f32.mrb[64].mxu1 }
 0x27c   :  { %v1310_v47 = vadd.f32 %v1309_v45, %v1028_v38  ;;  %v1311_v48 = vpop.f32.mrb[65].mxu1  ;;  %5446 = vmatmul.mubr.msk.bf16.vlgmr.msra.gmra.mrb[168].mxu0 %vm1443_vm1, %v3402_v41  ;;  %5454 = vmatmul.mubr.msk.bf16.vlgmr.msra.gmra.mrb[160].mxu1 %vm1443_vm1, %v3464_v44  ;;  %v5855_v41 = vld [vmem:[%s7101_s5 + $0x2b0] sm:$0xff]  }
 0x27d   :  { %5458 = vmatpush3.bf16.msra.mxu0 %v5838_v39  ;;  %v1312_v49 = vpop.f32.mrb[66].mxu1  ;;  %5466 = vmatpush3.bf16.msra.mxu1 %v5839_v40  ;;  %v1036_v39 = vld [vmem:[%s7103_s4 + $0x150] sm:$0xff]  ;;  %v5854_v40 = vld [vmem:[%s7101_s5 + $0x2a0] sm:$0xff]  }
 0x27e   :  { %v1405_v52 = vmax.f32 %v1310_v47, 0.0  ;;  %v1313_v53 = vadd.f32 %v1312_v49, %v1029_v46  ;;  %v1314_v54 = vpop.f32.mrb[67].mxu1  ;;  %5459 = vmatprep.subr.bf16.mxu0 %v5877_v22  ;;  %5467 = vmatprep.subr.bf16.mxu1 %v5877_v22  ;;  %v1037_v47 = vld [vmem:[%s7103_s4 + $0x158] sm:$0xff] }
 0x27f   :  { %5461 = vmatprep.mubr.msk.bf16.mxu0 %vm5878_vm0, %v5877_v22  ;;  %5469 = vmatprep.mubr.msk.bf16.mxu1 %vm5878_vm0, %v5877_v22 }
 0x280   :  { %v1406_v55 = vmax.f32 %v1313_v53, 0.0  ;;  %v3526_v59 = vpack.c.bf16 %v1405_v52, %v1405_v52  ;;  %v5857_v52 = vld [vmem:[%s7101_s5 + $0x2b8] sm:$0xff]  }
 0x281   :  { %5460 = vmatpush3.bf16.msra.mxu0 %v5840_v50  ;;  %5468 = vmatpush3.bf16.msra.mxu1 %v5841_v51  ;;  %v5856_v51 = vld [vmem:[%s7101_s5 + $0x2a8] sm:$0xff]  }
 0x282   :  { %v3588_v60 = vpack.c.bf16 %v1406_v55, %v1406_v55  ;;  %5473 = vmatprep.subr.bf16.mxu0 %v5877_v22  ;;  %5481 = vmatprep.subr.bf16.mxu1 %v5877_v22 }
 0x283   :  { %v1317_v61 = vpop.f32.mrb[68].mxu1 }
 0x284   :  { %v1318_v63 = vadd.f32 %v1317_v61, %v1030_v56  ;;  %v1319_v0 = vpop.f32.mrb[69].mxu1  ;;  %5462 = vmatmul.mubr.msk.bf16.vlgmr.msra.gmra.mrb[172].mxu0 %vm1443_vm1, %v3526_v59  ;;  %5470 = vmatmul.mubr.msk.bf16.vlgmr.msra.gmra.mrb[164].mxu1 %vm1443_vm1, %v3588_v60  ;;  %v5859_v59 = vld [vmem:[%s7101_s5 + $0x2d0] sm:$0xff]  }
 0x285   :  { %5474 = vmatpush3.bf16.msra.mxu0 %v5842_v57  ;;  %v1320_v2 = vpop.f32.mrb[70].mxu1  ;;  %5482 = vmatpush3.bf16.msra.mxu1 %v5843_v58  ;;  %v1038_v57 = vld [vmem:[%s7103_s4 + $0x160] sm:$0xff] }
 0x286   :  { %v1407_v5 = vmax.f32 %v1318_v63, 0.0  ;;  %v1321_v6 = vadd.f32 %v1320_v2, %v1031_v62  ;;  %v1322_v7 = vpop.f32.mrb[71].mxu1  ;;  %5475 = vmatprep.subr.bf16.mxu0 %v5877_v22  ;;  %5483 = vmatprep.subr.bf16.mxu1 %v5877_v22  ;;  %v5858_v58 = vld [vmem:[%s7101_s5 + $0x2c0] sm:$0xff]   ;;  %v1039_v63 = vld [vmem:[%s7103_s4 + $0x168] sm:$0xff] }
 0x287   :  { %5477 = vmatprep.mubr.msk.bf16.mxu0 %vm5878_vm0, %v5877_v22  ;;  %5485 = vmatprep.mubr.msk.bf16.mxu1 %vm5878_vm0, %v5877_v22 }
 0x288   :  { %v1408_v1 = vmax.f32 %v1321_v6, 0.0  ;;  %v3650_v11 = vpack.c.bf16 %v1407_v5, %v1407_v5  ;;  %v5861_v5 = vld [vmem:[%s7101_s5 + $0x2d8] sm:$0xff]  }
 0x289   :  { %5476 = vmatpush3.bf16.msra.mxu0 %v5844_v3  ;;  %5484 = vmatpush3.bf16.msra.mxu1 %v5845_v4  ;;  %v5860_v4 = vld [vmem:[%s7101_s5 + $0x2c8] sm:$0xff]  }
 0x28a   :  { %v3712_v12 = vpack.c.bf16 %v1408_v1, %v1408_v1  ;;  %5489 = vmatprep.subr.bf16.mxu0 %v5877_v22  ;;  %5497 = vmatprep.subr.bf16.mxu1 %v5877_v22 }
 0x28b   :  { %v1325_v13 = vpop.f32.mrb[72].mxu1 }
 0x28c   :  { %v1326_v15 = vadd.f32 %v1325_v13, %v1032_v8  ;;  %v1327_v16 = vpop.f32.mrb[73].mxu1  ;;  %5478 = vmatmul.mubr.msk.bf16.vlgmr.msra.gmra.mrb[176].mxu0 %vm1443_vm1, %v3650_v11  ;;  %5486 = vmatmul.mubr.msk.bf16.vlgmr.msra.gmra.mrb[168].mxu1 %vm1443_vm1, %v3712_v12  ;;  %v5863_v11 = vld [vmem:[%s7101_s5 + $0x2f0] sm:$0xff]  }
 0x28d   :  { %5490 = vmatpush3.bf16.msra.mxu0 %v5846_v9  ;;  %v1328_v17 = vpop.f32.mrb[74].mxu1  ;;  %5498 = vmatpush3.bf16.msra.mxu1 %v5847_v10  ;;  %v1040_v9 = vld [vmem:[%s7103_s4 + $0x170] sm:$0xff]  ;;  %v5862_v10 = vld [vmem:[%s7101_s5 + $0x2e0] sm:$0xff]  }
 0x28e   :  { %v1409_v20 = vmax.f32 %v1326_v15, 0.0  ;;  %v1329_v21 = vadd.f32 %v1328_v17, %v1033_v14  ;;  %v1330_v23 = vpop.f32.mrb[75].mxu1  ;;  %5491 = vmatprep.subr.bf16.mxu0 %v5877_v22  ;;  %5499 = vmatprep.subr.bf16.mxu1 %v5877_v22  ;;  %v1041_v15 = vld [vmem:[%s7103_s4 + $0x178] sm:$0xff] }
 0x28f   :  { %5493 = vmatprep.mubr.msk.bf16.mxu0 %vm5878_vm0, %v5877_v22  ;;  %5501 = vmatprep.mubr.msk.bf16.mxu1 %vm5878_vm0, %v5877_v22 }
 0x290   :  { %v1410_v24 = vmax.f32 %v1329_v21, 0.0  ;;  %v3774_v43 = vpack.c.bf16 %v1409_v20, %v1409_v20  ;;  %v5865_v20 = vld [vmem:[%s7101_s5 + $0x2f8] sm:$0xff]  }
 0x291   :  { %5492 = vmatpush3.bf16.msra.mxu0 %v5848_v18  ;;  %5500 = vmatpush3.bf16.msra.mxu1 %v5849_v19  ;;  %v5864_v19 = vld [vmem:[%s7101_s5 + $0x2e8] sm:$0xff]  }
 0x292   :  { %v3836_v27 = vpack.c.bf16 %v1410_v24, %v1410_v24  ;;  %5505 = vmatprep.subr.bf16.mxu0 %v5877_v22  ;;  %5513 = vmatprep.subr.bf16.mxu1 %v5877_v22 }
 0x293   :  { %v1333_v28 = vpop.f32.mrb[76].mxu1 }
 0x294   :  { %v1334_v30 = vadd.f32 %v1333_v28, %v1034_v25  ;;  %v1335_v31 = vpop.f32.mrb[77].mxu1  ;;  %5494 = vmatmul.mubr.msk.bf16.vlgmr.msra.gmra.mrb[180].mxu0 %vm1443_vm1, %v3774_v43  ;;  %5502 = vmatmul.mubr.msk.bf16.vlgmr.msra.gmra.mrb[172].mxu1 %vm1443_vm1, %v3836_v27 }
 0x295   :  { %5506 = vmatpush3.bf16.msra.mxu0 %v5850_v42  ;;  %v1336_v32 = vpop.f32.mrb[78].mxu1  ;;  %5514 = vmatpush3.bf16.msra.mxu1 %v5851_v26  ;;  %v1042_v42 = vld [vmem:[%s7103_s4 + $0x180] sm:$0xff] }
 0x296   :  { %v1411_v35 = vmax.f32 %v1334_v30, 0.0  ;;  %v1337_v36 = vadd.f32 %v1336_v32, %v1035_v29  ;;  %v1338_v37 = vpop.f32.mrb[79].mxu1  ;;  %5507 = vmatprep.subr.bf16.mxu0 %v5877_v22  ;;  %5515 = vmatprep.subr.bf16.mxu1 %v5877_v22  ;;  %v5866_v26 = vld [vmem:[%s7101_s5 + $0x300] sm:$0xff]   ;;  %v5867_v32 = vld [vmem:[%s7101_s5 + $0x308] sm:$0xff]  }
 0x297   :  { %5509 = vmatprep.mubr.msk.bf16.mxu0 %vm5878_vm0, %v5877_v22  ;;  %5517 = vmatprep.mubr.msk.bf16.mxu1 %vm5878_vm0, %v5877_v22 }
 0x298   :  { %v1412_v38 = vmax.f32 %v1337_v36, 0.0  ;;  %v3898_v44 = vpack.c.bf16 %v1411_v35, %v1411_v35 }
 0x299   :  { %5508 = vmatpush3.bf16.msra.mxu0 %v5852_v33  ;;  %5516 = vmatpush3.bf16.msra.mxu1 %v5853_v34 }
 0x29a   :  { %v3960_v45 = vpack.c.bf16 %v1412_v38, %v1412_v38  ;;  %5521 = vmatprep.subr.bf16.mxu0 %v5877_v22  ;;  %5529 = vmatprep.subr.bf16.mxu1 %v5877_v22 }
 0x29b   :  { %v1341_v46 = vpop.f32.mrb[80].mxu1 }
 0x29c   :  { %v1342_v48 = vadd.f32 %v1341_v46, %v1036_v39  ;;  %v1343_v49 = vpop.f32.mrb[81].mxu1  ;;  %5510 = vmatmul.mubr.msk.bf16.vlgmr.msra.gmra.mrb[184].mxu0 %vm1443_vm1, %v3898_v44  ;;  %5518 = vmatmul.mubr.msk.bf16.vlgmr.msra.gmra.mrb[176].mxu1 %vm1443_vm1, %v3960_v45 }
 0x29d   :  { %5522 = vmatpush3.bf16.msra.mxu0 %v5854_v40  ;;  %v1344_v50 = vpop.f32.mrb[82].mxu1  ;;  %5530 = vmatpush3.bf16.msra.mxu1 %v5855_v41 }
 0x29e   :  { %v1413_v53 = vmax.f32 %v1342_v48, 0.0  ;;  %v1345_v54 = vadd.f32 %v1344_v50, %v1037_v47  ;;  %v1346_v55 = vpop.f32.mrb[83].mxu1  ;;  %5523 = vmatprep.subr.bf16.mxu0 %v5877_v22  ;;  %5531 = vmatprep.subr.bf16.mxu1 %v5877_v22 }
 0x29f   :  { %5525 = vmatprep.mubr.msk.bf16.mxu0 %vm5878_vm0, %v5877_v22  ;;  %5533 = vmatprep.mubr.msk.bf16.mxu1 %vm5878_vm0, %v5877_v22 }
 0x2a0   :  { %v1414_v56 = vmax.f32 %v1345_v54, 0.0  ;;  %v4022_v60 = vpack.c.bf16 %v1413_v53, %v1413_v53 }
 0x2a1   :  { %5524 = vmatpush3.bf16.msra.mxu0 %v5856_v51  ;;  %5532 = vmatpush3.bf16.msra.mxu1 %v5857_v52 }
 0x2a2   :  { %v4084_v61 = vpack.c.bf16 %v1414_v56, %v1414_v56  ;;  %5537 = vmatprep.subr.bf16.mxu0 %v5877_v22  ;;  %5545 = vmatprep.subr.bf16.mxu1 %v5877_v22 }
 0x2a3   :  { %v1349_v62 = vpop.f32.mrb[84].mxu1 }
 0x2a4   :  { %v1350_v0 = vadd.f32 %v1349_v62, %v1038_v57  ;;  %v1351_v2 = vpop.f32.mrb[85].mxu1  ;;  %5526 = vmatmul.mubr.msk.bf16.vlgmr.msra.gmra.mrb[188].mxu0 %vm1443_vm1, %v4022_v60  ;;  %5534 = vmatmul.mubr.msk.bf16.vlgmr.msra.gmra.mrb[180].mxu1 %vm1443_vm1, %v4084_v61 }
 0x2a5   :  { %5538 = vmatpush3.bf16.msra.mxu0 %v5858_v58  ;;  %v1352_v3 = vpop.f32.mrb[86].mxu1  ;;  %5546 = vmatpush3.bf16.msra.mxu1 %v5859_v59 }
 0x2a6   :  { %v1415_v6 = vmax.f32 %v1350_v0, 0.0  ;;  %v1353_v7 = vadd.f32 %v1352_v3, %v1039_v63  ;;  %v1354_v1 = vpop.f32.mrb[87].mxu1  ;;  %5539 = vmatprep.subr.bf16.mxu0 %v5877_v22  ;;  %5547 = vmatprep.subr.bf16.mxu1 %v5877_v22 }
 0x2a7   :  { %5541 = vmatprep.mubr.msk.bf16.mxu0 %vm5878_vm0, %v5877_v22  ;;  %5549 = vmatprep.mubr.msk.bf16.mxu1 %vm5878_vm0, %v5877_v22 }
 0x2a8   :  { %v1416_v8 = vmax.f32 %v1353_v7, 0.0  ;;  %v4146_v12 = vpack.c.bf16 %v1415_v6, %v1415_v6 }
 0x2a9   :  { %5540 = vmatpush3.bf16.msra.mxu0 %v5860_v4  ;;  %5548 = vmatpush3.bf16.msra.mxu1 %v5861_v5 }
 0x2aa   :  { %v4208_v13 = vpack.c.bf16 %v1416_v8, %v1416_v8  ;;  %5553 = vmatprep.subr.bf16.mxu0 %v5877_v22  ;;  %5561 = vmatprep.subr.bf16.mxu1 %v5877_v22 }
 0x2ab   :  { %v1357_v14 = vpop.f32.mrb[88].mxu1 }
 0x2ac   :  { %v1358_v16 = vadd.f32 %v1357_v14, %v1040_v9  ;;  %v1359_v17 = vpop.f32.mrb[89].mxu1  ;;  %5542 = vmatmul.mubr.msk.bf16.vlgmr.msra.gmra.mrb[192].mxu0 %vm1443_vm1, %v4146_v12  ;;  %5550 = vmatmul.mubr.msk.bf16.vlgmr.msra.gmra.mrb[184].mxu1 %vm1443_vm1, %v4208_v13 }
 0x2ad   :  { %5554 = vmatpush3.bf16.msra.mxu0 %v5862_v10  ;;  %v1360_v18 = vpop.f32.mrb[90].mxu1  ;;  %5562 = vmatpush3.bf16.msra.mxu1 %v5863_v11 }
 0x2ae   :  { %v1417_v21 = vmax.f32 %v1358_v16, 0.0  ;;  %v1361_v23 = vadd.f32 %v1360_v18, %v1041_v15  ;;  %v1362_v24 = vpop.f32.mrb[91].mxu1  ;;  %5555 = vmatprep.subr.bf16.mxu0 %v5877_v22  ;;  %5563 = vmatprep.subr.bf16.mxu1 %v5877_v22 }
 0x2af   :  { %5557 = vmatprep.mubr.msk.bf16.mxu0 %vm5878_vm0, %v5877_v22  ;;  %5565 = vmatprep.mubr.msk.bf16.mxu1 %vm5878_vm0, %v5877_v22 }
 0x2b0   :  { %v1418_v25 = vmax.f32 %v1361_v23, 0.0  ;;  %v4270_v43 = vpack.c.bf16 %v1417_v21, %v1417_v21 }
 0x2b1   :  { %5556 = vmatpush3.bf16.msra.mxu0 %v5864_v19  ;;  %5564 = vmatpush3.bf16.msra.mxu1 %v5865_v20 }
 0x2b2   :  { %v4332_v27 = vpack.c.bf16 %v1418_v25, %v1418_v25  ;;  %5569 = vmatprep.subr.bf16.mxu0 %v5877_v22  ;;  %5577 = vmatprep.subr.bf16.mxu1 %v5877_v22 }
 0x2b3   :  { %v1365_v28 = vpop.f32.mrb[92].mxu1 }
 0x2b4   :  { %v1366_v29 = vadd.f32 %v1365_v28, %v1042_v42  ;;  %v1367_v30 = vpop.f32.mrb[93].mxu1  ;;  %5558 = vmatmul.mubr.msk.bf16.vlgmr.msra.gmra.mrb[196].mxu0 %vm1443_vm1, %v4270_v43  ;;  %5566 = vmatmul.mubr.msk.bf16.vlgmr.msra.gmra.mrb[188].mxu1 %vm1443_vm1, %v4332_v27  ;;  %v5868_v27 = vld [vmem:[%s7104_s7] sm:$0xff]  }
 0x2b5   :  { %5570 = vmatpush3.bf16.msra.mxu0 %v5866_v26  ;;  %v1368_v31 = vpop.f32.mrb[94].mxu1  ;;  %5573 = vmatprep.mubr.msk.bf16.mxu0 %vm5878_vm0, %v5877_v22 }
 0x2b6   :  { %v1419_v33 = vmax.f32 %v1366_v29, 0.0  ;;  %v1369_v34 = vpop.f32.mrb[95].mxu1  ;;  %5571 = vmatprep.subr.bf16.mxu0 %v5877_v22  ;;  %5593 = vmatprep.mubr.msk.bf16.mxu1 %vm5878_vm0, %v5877_v22 }
 0x2b7   :  { %5578 = vmatpush3.bf16.msra.mxu1 %v5868_v27 }
 0x2b8   :  { %v4394_v35 = vpack.c.bf16 %v1419_v33, %v1419_v33  ;;  %v5869_v33 = vld [vmem:[%s7104_s7 + $0x8] sm:$0xff]   ;;  %5579 = vmatprep.subr.bf16.mxu1 %v5877_v22 }
 0x2b9   :  { %5572 = vmatpush3.bf16.msra.mxu0 %v5867_v32 }
 0x2bb   :  { %5580 = vmatpush3.bf16.msra.mxu1 %v5869_v33 }
 0x2bc   :  { %5574 = vmatmul.mubr.msk.bf16.vlgmr.msra.gmra.mrb[200].mxu0 %vm1443_vm1, %v4394_v35  ;;  %5581 = vmatprep.subr.bf16.mxu1 %v5877_v22 }
 0x2cd   :  { %v1536_v36 = vpop.f32.mrb[96].mxu1 }
 0x2ce   :  { %v5199_v37 = vpop.f32.mrb[97].mxu1 }
 0x2cf   :  { %v1481_v38 = vpop.f32.mrb[104].mxu0  ;;  %v1539_v39 = vpop.f32.mrb[98].mxu1 }
 0x2d0   :  { %v1537_v40 = vadd.f32 %v1536_v36, %v1481_v38  ;;  %v5191_v41 = vpop.f32.mrb[105].mxu0  ;;  %v5200_v44 = vpop.f32.mrb[99].mxu1  ;;  %v5870_v36 = vld [vmem:[%s7104_s7 + $0x10] sm:$0xff]  }
 0x2d1   :  { %v1484_v45 = vpop.f32.mrb[106].mxu0  ;;  %5582 = vmatpush3.bf16.msra.mxu1 %v5870_v36 }
 0x2d2   :  { %v5192_v46 = vpop.f32.mrb[107].mxu0  ;;  %5583 = vmatprep.subr.bf16.mxu1 %v5877_v22 }
 0x2d7   :  { %v1597_v47 = vpop.f32.mrb[108].mxu0  ;;  %v1659_v48 = vpop.f32.mrb[100].mxu1 }
 0x2d8   :  { %v1603_v49 = vadd.f32 %v1597_v47, %v1537_v40  ;;  %v5207_v50 = vpop.f32.mrb[109].mxu0  ;;  %v5215_v51 = vpop.f32.mrb[101].mxu1  ;;  %v5871_v47 = vld [vmem:[%s7104_s7 + $0x18] sm:$0xff]  }
 0x2d9   :  { %v1600_v52 = vpop.f32.mrb[110].mxu0  ;;  %v1662_v53 = vpop.f32.mrb[102].mxu1  ;;  %5584 = vmatpush3.bf16.msra.mxu1 %v5871_v47  ;;  %v5872_v50 = vld [vmem:[%s7104_s7 + $0x20] sm:$0xff]  }
 0x2da   :  { %v1665_v54 = vadd.f32 %v1659_v48, %v1603_v49  ;;  %v5208_v55 = vpop.f32.mrb[111].mxu0  ;;  %v5216_v56 = vpop.f32.mrb[103].mxu1  ;;  %5585 = vmatprep.subr.bf16.mxu1 %v5877_v22 }
 0x2dd   :  { %5586 = vmatpush3.bf16.msra.mxu1 %v5872_v50 }
 0x2de   :  { %5587 = vmatprep.subr.bf16.mxu1 %v5877_v22 }
 0x2df   :  { %v1721_v57 = vpop.f32.mrb[112].mxu0  ;;  %v1783_v58 = vpop.f32.mrb[104].mxu1 }
 0x2e0   :  { %v1727_v59 = vadd.f32 %v1721_v57, %v1665_v54  ;;  %v5223_v60 = vpop.f32.mrb[113].mxu0  ;;  %v5231_v61 = vpop.f32.mrb[105].mxu1 }
 0x2e1   :  { %v1724_v62 = vpop.f32.mrb[114].mxu0  ;;  %v1786_v63 = vpop.f32.mrb[106].mxu1 }
 0x2e2   :  { %v1789_v0 = vadd.f32 %v1783_v58, %v1727_v59  ;;  %v5224_v2 = vpop.f32.mrb[115].mxu0  ;;  %v5232_v3 = vpop.f32.mrb[107].mxu1  ;;  %v5873_v59 = vld [vmem:[%s7104_s7 + $0x28] sm:$0xff]   ;;  %v5874_v62 = vld [vmem:[%s7104_s7 + $0x30] sm:$0xff]  }
 0x2e3   :  { %5588 = vmatpush3.bf16.msra.mxu1 %v5873_v59 }
 0x2e4   :  { %5589 = vmatprep.subr.bf16.mxu1 %v5877_v22 }
 0x2e7   :  { %v1845_v4 = vpop.f32.mrb[116].mxu0  ;;  %v1907_v5 = vpop.f32.mrb[108].mxu1  ;;  %5590 = vmatpush3.bf16.msra.mxu1 %v5874_v62 }
 0x2e8   :  { %v1851_v6 = vadd.f32 %v1845_v4, %v1789_v0  ;;  %v5239_v7 = vpop.f32.mrb[117].mxu0  ;;  %v5247_v1 = vpop.f32.mrb[109].mxu1  ;;  %5591 = vmatprep.subr.bf16.mxu1 %v5877_v22 }
 0x2e9   :  { %v1848_v8 = vpop.f32.mrb[118].mxu0  ;;  %v1910_v9 = vpop.f32.mrb[110].mxu1  ;;  %v5875_v1 = vld [vmem:[%s7104_s7 + $0x38] sm:$0xff]  }
 0x2ea   :  { %v1913_v10 = vadd.f32 %v1907_v5, %v1851_v6  ;;  %v5240_v11 = vpop.f32.mrb[119].mxu0  ;;  %v5248_v12 = vpop.f32.mrb[111].mxu1 }
 0x2eb   :  { %5592 = vmatpush3.bf16.msra.mxu1 %v5875_v1 }
 0x2ef   :  { %v1969_v13 = vpop.f32.mrb[120].mxu0  ;;  %v2031_v14 = vpop.f32.mrb[112].mxu1 }
 0x2f0   :  { %v1975_v15 = vadd.f32 %v1969_v13, %v1913_v10  ;;  %v5255_v16 = vpop.f32.mrb[121].mxu0  ;;  %v5263_v17 = vpop.f32.mrb[113].mxu1 }
 0x2f1   :  { %v1972_v18 = vpop.f32.mrb[122].mxu0  ;;  %v2034_v19 = vpop.f32.mrb[114].mxu1 }
 0x2f2   :  { %v2037_v20 = vadd.f32 %v2031_v14, %v1975_v15  ;;  %v5256_v21 = vpop.f32.mrb[123].mxu0  ;;  %v5264_v23 = vpop.f32.mrb[115].mxu1 }
 0x2f7   :  { %v2093_v24 = vpop.f32.mrb[124].mxu0  ;;  %v2155_v25 = vpop.f32.mrb[116].mxu1 }
 0x2f8   :  { %v2099_v42 = vadd.f32 %v2093_v24, %v2037_v20  ;;  %v5271_v26 = vpop.f32.mrb[125].mxu0  ;;  %v5279_v43 = vpop.f32.mrb[117].mxu1 }
 0x2f9   :  { %v2096_v28 = vpop.f32.mrb[126].mxu0  ;;  %v2158_v29 = vpop.f32.mrb[118].mxu1 }
 0x2fa   :  { %v2161_v30 = vadd.f32 %v2155_v25, %v2099_v42  ;;  %v5272_v31 = vpop.f32.mrb[127].mxu0  ;;  %v5280_v32 = vpop.f32.mrb[119].mxu1 }
 0x2ff   :  { %v2217_v34 = vpop.f32.mrb[128].mxu0  ;;  %v2279_v35 = vpop.f32.mrb[120].mxu1 }
 0x300   :  { %v2223_v37 = vadd.f32 %v2217_v34, %v2161_v30  ;;  %v5287_v38 = vpop.f32.mrb[129].mxu0  ;;  %v5295_v39 = vpop.f32.mrb[121].mxu1 }
 0x301   :  { %v2220_v40 = vpop.f32.mrb[130].mxu0  ;;  %v2282_v41 = vpop.f32.mrb[122].mxu1 }
 0x302   :  { %v2285_v44 = vadd.f32 %v2279_v35, %v2223_v37  ;;  %v5288_v45 = vpop.f32.mrb[131].mxu0  ;;  %v5296_v46 = vpop.f32.mrb[123].mxu1 }
 0x307   :  { %v2341_v48 = vpop.f32.mrb[132].mxu0  ;;  %v2403_v49 = vpop.f32.mrb[124].mxu1 }
 0x308   :  { %v2347_v51 = vadd.f32 %v2341_v48, %v2285_v44  ;;  %v5303_v52 = vpop.f32.mrb[133].mxu0  ;;  %v5311_v53 = vpop.f32.mrb[125].mxu1 }
 0x309   :  { %v2344_v54 = vpop.f32.mrb[134].mxu0  ;;  %v2406_v55 = vpop.f32.mrb[126].mxu1 }
 0x30a   :  { %v2409_v56 = vadd.f32 %v2403_v49, %v2347_v51  ;;  %v5304_v57 = vpop.f32.mrb[135].mxu0  ;;  %v5312_v58 = vpop.f32.mrb[127].mxu1 }
 0x30f   :  { %v2465_v60 = vpop.f32.mrb[136].mxu0  ;;  %v2527_v61 = vpop.f32.mrb[128].mxu1 }
 0x310   :  { %v2471_v63 = vadd.f32 %v2465_v60, %v2409_v56  ;;  %v5319_v0 = vpop.f32.mrb[137].mxu0  ;;  %v5327_v2 = vpop.f32.mrb[129].mxu1 }
 0x311   :  { %v2468_v3 = vpop.f32.mrb[138].mxu0  ;;  %v2530_v4 = vpop.f32.mrb[130].mxu1 }
 0x312   :  { %v2533_v5 = vadd.f32 %v2527_v61, %v2471_v63  ;;  %v5320_v6 = vpop.f32.mrb[139].mxu0  ;;  %v5328_v7 = vpop.f32.mrb[131].mxu1 }
 0x317   :  { %v2589_v8 = vpop.f32.mrb[140].mxu0  ;;  %v2651_v9 = vpop.f32.mrb[132].mxu1 }
 0x318   :  { %v2595_v10 = vadd.f32 %v2589_v8, %v2533_v5  ;;  %v5335_v11 = vpop.f32.mrb[141].mxu0  ;;  %v5343_v12 = vpop.f32.mrb[133].mxu1 }
 0x319   :  { %v2592_v13 = vpop.f32.mrb[142].mxu0  ;;  %v2654_v14 = vpop.f32.mrb[134].mxu1 }
 0x31a   :  { %v2657_v15 = vadd.f32 %v2651_v9, %v2595_v10  ;;  %v5336_v16 = vpop.f32.mrb[143].mxu0  ;;  %v5344_v17 = vpop.f32.mrb[135].mxu1 }
 0x31f   :  { %v2713_v18 = vpop.f32.mrb[144].mxu0  ;;  %v2775_v19 = vpop.f32.mrb[136].mxu1 }
 0x320   :  { %v2719_v20 = vadd.f32 %v2713_v18, %v2657_v15  ;;  %v5351_v21 = vpop.f32.mrb[145].mxu0  ;;  %v5359_v22 = vpop.f32.mrb[137].mxu1 }
 0x321   :  { %v2716_v23 = vpop.f32.mrb[146].mxu0  ;;  %v2778_v24 = vpop.f32.mrb[138].mxu1 }
 0x322   :  { %v2781_v25 = vadd.f32 %v2775_v19, %v2719_v20  ;;  %v5352_v42 = vpop.f32.mrb[147].mxu0  ;;  %v5360_v26 = vpop.f32.mrb[139].mxu1 }
 0x327   :  { %v2837_v43 = vpop.f32.mrb[148].mxu0  ;;  %v2899_v27 = vpop.f32.mrb[140].mxu1 }
 0x328   :  { %v2843_v28 = vadd.f32 %v2837_v43, %v2781_v25  ;;  %v5367_v29 = vpop.f32.mrb[149].mxu0  ;;  %v5375_v30 = vpop.f32.mrb[141].mxu1 }
 0x329   :  { %v2840_v31 = vpop.f32.mrb[150].mxu0  ;;  %v2902_v32 = vpop.f32.mrb[142].mxu1 }
 0x32a   :  { %v2905_v33 = vadd.f32 %v2899_v27, %v2843_v28  ;;  %v5368_v34 = vpop.f32.mrb[151].mxu0  ;;  %v5376_v35 = vpop.f32.mrb[143].mxu1 }
 0x32f   :  { %v2961_v36 = vpop.f32.mrb[152].mxu0  ;;  %v3023_v37 = vpop.f32.mrb[144].mxu1 }
 0x330   :  { %v2967_v38 = vadd.f32 %v2961_v36, %v2905_v33  ;;  %v5383_v39 = vpop.f32.mrb[153].mxu0  ;;  %v5391_v40 = vpop.f32.mrb[145].mxu1 }
 0x331   :  { %v2964_v41 = vpop.f32.mrb[154].mxu0  ;;  %v3026_v44 = vpop.f32.mrb[146].mxu1 }
 0x332   :  { %v3029_v45 = vadd.f32 %v3023_v37, %v2967_v38  ;;  %v5384_v46 = vpop.f32.mrb[155].mxu0  ;;  %v5392_v47 = vpop.f32.mrb[147].mxu1 }
 0x337   :  { %v3085_v48 = vpop.f32.mrb[156].mxu0  ;;  %v3147_v49 = vpop.f32.mrb[148].mxu1 }
 0x338   :  { %v3091_v50 = vadd.f32 %v3085_v48, %v3029_v45  ;;  %v5399_v51 = vpop.f32.mrb[157].mxu0  ;;  %v5407_v52 = vpop.f32.mrb[149].mxu1 }
 0x339   :  { %v3088_v53 = vpop.f32.mrb[158].mxu0  ;;  %v3150_v54 = vpop.f32.mrb[150].mxu1 }
 0x33a   :  { %v3153_v55 = vadd.f32 %v3147_v49, %v3091_v50  ;;  %v5400_v56 = vpop.f32.mrb[159].mxu0  ;;  %v5408_v57 = vpop.f32.mrb[151].mxu1 }
 0x33f   :  { %v3209_v58 = vpop.f32.mrb[160].mxu0  ;;  %v3271_v59 = vpop.f32.mrb[152].mxu1 }
 0x340   :  { %v3215_v60 = vadd.f32 %v3209_v58, %v3153_v55  ;;  %v5415_v61 = vpop.f32.mrb[161].mxu0  ;;  %v5423_v62 = vpop.f32.mrb[153].mxu1 }
 0x341   :  { %v3212_v63 = vpop.f32.mrb[162].mxu0  ;;  %v3274_v0 = vpop.f32.mrb[154].mxu1 }
 0x342   :  { %v3277_v2 = vadd.f32 %v3271_v59, %v3215_v60  ;;  %v5416_v3 = vpop.f32.mrb[163].mxu0  ;;  %v5424_v4 = vpop.f32.mrb[155].mxu1 }
 0x347   :  { %v3333_v5 = vpop.f32.mrb[164].mxu0  ;;  %v3395_v6 = vpop.f32.mrb[156].mxu1 }
 0x348   :  { %v3339_v7 = vadd.f32 %v3333_v5, %v3277_v2  ;;  %v5431_v1 = vpop.f32.mrb[165].mxu0  ;;  %v5439_v8 = vpop.f32.mrb[157].mxu1 }
 0x349   :  { %v3336_v9 = vpop.f32.mrb[166].mxu0  ;;  %v3398_v10 = vpop.f32.mrb[158].mxu1 }
 0x34a   :  { %v3401_v11 = vadd.f32 %v3395_v6, %v3339_v7  ;;  %v5432_v12 = vpop.f32.mrb[167].mxu0  ;;  %v5440_v13 = vpop.f32.mrb[159].mxu1 }
 0x34f   :  { %v3457_v14 = vpop.f32.mrb[168].mxu0  ;;  %v3519_v15 = vpop.f32.mrb[160].mxu1 }
 0x350   :  { %v3463_v16 = vadd.f32 %v3457_v14, %v3401_v11  ;;  %v5447_v17 = vpop.f32.mrb[169].mxu0  ;;  %v5455_v18 = vpop.f32.mrb[161].mxu1 }
 0x351   :  { %v3460_v19 = vpop.f32.mrb[170].mxu0  ;;  %v3522_v20 = vpop.f32.mrb[162].mxu1 }
 0x352   :  { %v3525_v21 = vadd.f32 %v3519_v15, %v3463_v16  ;;  %v5448_v22 = vpop.f32.mrb[171].mxu0  ;;  %v5456_v23 = vpop.f32.mrb[163].mxu1 }
 0x357   :  { %v3581_v24 = vpop.f32.mrb[172].mxu0  ;;  %v3643_v25 = vpop.f32.mrb[164].mxu1 }
 0x358   :  { %v3587_v42 = vadd.f32 %v3581_v24, %v3525_v21  ;;  %v5463_v26 = vpop.f32.mrb[173].mxu0  ;;  %v5471_v43 = vpop.f32.mrb[165].mxu1 }
 0x359   :  { %v3584_v27 = vpop.f32.mrb[174].mxu0  ;;  %v3646_v28 = vpop.f32.mrb[166].mxu1 }
 0x35a   :  { %v3649_v29 = vadd.f32 %v3643_v25, %v3587_v42  ;;  %v5464_v30 = vpop.f32.mrb[175].mxu0  ;;  %v5472_v31 = vpop.f32.mrb[167].mxu1 }
 0x35f   :  { %v3705_v32 = vpop.f32.mrb[176].mxu0  ;;  %v3767_v33 = vpop.f32.mrb[168].mxu1 }
 0x360   :  { %v3711_v34 = vadd.f32 %v3705_v32, %v3649_v29  ;;  %v5479_v35 = vpop.f32.mrb[177].mxu0  ;;  %v5487_v36 = vpop.f32.mrb[169].mxu1  ;;  %v5019_v29 = vld [vmem:[%s7105_s6] ss:$0 sm:$0xff] }
 0x361   :  { %v3708_v37 = vpop.f32.mrb[178].mxu0  ;;  %v3770_v38 = vpop.f32.mrb[170].mxu1 }
 0x362   :  { %v3773_v39 = vadd.f32 %v3767_v33, %v3711_v34  ;;  %v5480_v40 = vpop.f32.mrb[179].mxu0  ;;  %v5488_v41 = vpop.f32.mrb[171].mxu1  ;;  %v5020_v37 = vld [vmem:[%s7106_s8] ss:$0 sm:$0xff] }
 0x367   :  { %v3829_v44 = vpop.f32.mrb[180].mxu0  ;;  %v3891_v45 = vpop.f32.mrb[172].mxu1 }
 0x368   :  { %v3835_v46 = vadd.f32 %v3829_v44, %v3773_v39  ;;  %v5495_v47 = vpop.f32.mrb[181].mxu0  ;;  %v5503_v48 = vpop.f32.mrb[173].mxu1 }
 0x369   :  { %v3832_v49 = vpop.f32.mrb[182].mxu0  ;;  %v3894_v50 = vpop.f32.mrb[174].mxu1 }
 0x36a   :  { %v3897_v51 = vadd.f32 %v3891_v45, %v3835_v46  ;;  %v5496_v52 = vpop.f32.mrb[183].mxu0  ;;  %v5504_v53 = vpop.f32.mrb[175].mxu1 }
 0x36f   :  { %v3953_v54 = vpop.f32.mrb[184].mxu0  ;;  %v4015_v55 = vpop.f32.mrb[176].mxu1 }
 0x370   :  { %v3959_v56 = vadd.f32 %v3953_v54, %v3897_v51  ;;  %v5511_v57 = vpop.f32.mrb[185].mxu0  ;;  %v5519_v58 = vpop.f32.mrb[177].mxu1 }
 0x371   :  { %v3956_v59 = vpop.f32.mrb[186].mxu0  ;;  %v4018_v60 = vpop.f32.mrb[178].mxu1 }
 0x372   :  { %v4021_v61 = vadd.f32 %v4015_v55, %v3959_v56  ;;  %v5512_v62 = vpop.f32.mrb[187].mxu0  ;;  %v5520_v63 = vpop.f32.mrb[179].mxu1 }
 0x377   :  { %v4077_v0 = vpop.f32.mrb[188].mxu0  ;;  %v4139_v2 = vpop.f32.mrb[180].mxu1 }
 0x378   :  { %v4083_v3 = vadd.f32 %v4077_v0, %v4021_v61  ;;  %v5527_v4 = vpop.f32.mrb[189].mxu0  ;;  %v5535_v5 = vpop.f32.mrb[181].mxu1 }
 0x379   :  { %v4080_v6 = vpop.f32.mrb[190].mxu0  ;;  %v4142_v7 = vpop.f32.mrb[182].mxu1 }
 0x37a   :  { %v4145_v1 = vadd.f32 %v4139_v2, %v4083_v3  ;;  %v5528_v8 = vpop.f32.mrb[191].mxu0  ;;  %v5536_v9 = vpop.f32.mrb[183].mxu1 }
 0x37f   :  { %v4201_v10 = vpop.f32.mrb[192].mxu0  ;;  %v4263_v11 = vpop.f32.mrb[184].mxu1 }
 0x380   :  { %v4207_v12 = vadd.f32 %v4201_v10, %v4145_v1  ;;  %v5543_v13 = vpop.f32.mrb[193].mxu0  ;;  %v5551_v14 = vpop.f32.mrb[185].mxu1 }
 0x381   :  { %v4204_v15 = vpop.f32.mrb[194].mxu0  ;;  %v4266_v16 = vpop.f32.mrb[186].mxu1 }
 0x382   :  { %v4269_v17 = vadd.f32 %v4263_v11, %v4207_v12  ;;  %v5544_v18 = vpop.f32.mrb[195].mxu0  ;;  %v5552_v19 = vpop.f32.mrb[187].mxu1 }
 0x387   :  { %v4325_v20 = vpop.f32.mrb[196].mxu0  ;;  %v4387_v21 = vpop.f32.mrb[188].mxu1 }
 0x388   :  { %v4331_v22 = vadd.f32 %v4325_v20, %v4269_v17  ;;  %v5559_v23 = vpop.f32.mrb[197].mxu0  ;;  %v5567_v24 = vpop.f32.mrb[189].mxu1 }
 0x389   :  { %v4328_v25 = vpop.f32.mrb[198].mxu0  ;;  %v4390_v42 = vpop.f32.mrb[190].mxu1 }
 0x38a   :  { %v4393_v26 = vadd.f32 %v4387_v21, %v4331_v22  ;;  %v5560_v43 = vpop.f32.mrb[199].mxu0  ;;  %v5568_v27 = vpop.f32.mrb[191].mxu1 }
 0x38f   :  { %v4449_v28 = vpop.f32.mrb[200].mxu0 }
 0x390   :  { %v4455_v30 = vadd.f32 %v4449_v28, %v4393_v26  ;;  %v5575_v31 = vpop.f32.mrb[201].mxu0 }
 0x391   :  { %v4452_v32 = vpop.f32.mrb[202].mxu0 }
 0x392   :  { %v4463_v33 = vadd.f32 %v5019_v29, %v4455_v30  ;;  %v5576_v34 = vpop.f32.mrb[203].mxu0 }
 0x394   :  { %v4464_v35 = vmax.f32 %v4463_v33, 0.0 }
 0x396   :  { %v4465_v36 = vpack.c.bf16 %v4464_v35, %v4464_v35 }
 0x398   :  { %5594 = vmatmul.mubr.bf16.vlgmr.msra.gmra.mrb[192].mxu1 %v4465_v36 }
 0x46b   :  { %v4571_v38 = vpop.f32.mrb[192].mxu1 }
 0x46c   :  { %v4572_v39 = vadd.f32 %v5020_v37, %v4571_v38  ;;  %v5595_v40 = vpop.f32.mrb[193].mxu1 }
 0x46d   :  { %v4574_v41 = vpop.f32.mrb[194].mxu1 }
 0x46e   :  { %4577 = vst [vmem:[%s7107_s9] sm:$0xff] %v4572_v39  ;;  %v5596_v44 = vpop.f32.mrb[195].mxu1 }

</bundles_post_ra>
